<compile_context>
chip_gen: v7x
topology: tpu7x:2x2x1
jax: 0.10.0
libtpu: 0.0.40
codegen_flags: <defaults>
</compile_context>

<pallas_src>
import jax
import jax.numpy as jnp
from jax import lax
from jax.experimental import pallas as pl
from jax.experimental.pallas import tpu as pltpu

LANE = 128


def _round_up(x, m):
    return (x + m - 1) // m * m


# ----------------------------- Pallas kernel -----------------------------

def bottleneck_kernel(x_ref, w1_ref, b1_ref, w2_ref, b2_ref, w3_ref, b3_ref,
                      o_ref, y1p_ref):
    """Fused Bottleneck forward for a block of `nb` images.

    x_ref  : (nb, H, W, Cin)        activations (compute dtype)
    w1_ref : (Cin, width)           conv1 1x1 weight, bn1 scale folded in
    b1_ref : (1, width)             bn1 bias (f32)
    w2_ref : (9*width, width)       conv2 3x3 weight, rows tap-major, bn2 folded
    b2_ref : (1, width)             bn2 bias (f32)
    w3_ref : (width, Cout)          conv3 1x1 weight, bn3 scale folded in
    b3_ref : (1, Cout)              bn3 bias (f32)
    o_ref  : (nb, H, W, Cout)       output (out dtype)
    y1p_ref: VMEM (H+2, W+2, width) scratch: zero-padded relu(conv1) image
    """
    nb, H, W, cin = x_ref.shape
    width = w1_ref.shape[1]
    cout = w3_ref.shape[1]
    cdt = y1p_ref.dtype

    # Zero only the top/bottom halo rows; the left/right halo columns are
    # rewritten together with the interior below.  Cheap vs a full memset.
    y1p_ref[0, :, :] = jnp.zeros((W + 2, width), cdt)
    y1p_ref[H + 1, :, :] = jnp.zeros((W + 2, width), cdt)

    zcol = jnp.zeros((H, 1, width), cdt)

    for n in range(nb):                              # nb is static and small
        x2d = x_ref[n].reshape(H * W, cin)

        # ---- conv1 (1x1) + bn1 + relu ------------------------------------
        y1 = jnp.dot(x2d, w1_ref[...], preferred_element_type=jnp.float32)
        y1 = jnp.maximum(y1 + b1_ref[...], 0.0)
        y1_img = y1.reshape(H, W, width).astype(cdt)

        # interior rows (with the left/right halo columns) in one dense store
        y1p_ref[pl.ds(1, H), :, :] = jnp.concatenate(
            [zcol, y1_img, zcol], axis=1)

        # ---- conv2 (3x3, stride 1, pad 1) + bn2 + relu ----------------------
        # im2col: concatenate the nine shifted taps -> one K = 9*width matmul.
        taps = []
        for kh in range(3):
            for kw in range(3):
                taps.append(
                    y1p_ref[pl.ds(kh, H), pl.ds(kw, W), :].reshape(H * W, width))
        im2col = jnp.concatenate(taps, axis=1)                # (H*W, 9*width)
        y2 = jnp.dot(im2col, w2_ref[...], preferred_element_type=jnp.float32)
        y2 = jnp.maximum(y2 + b2_ref[...], 0.0).astype(cdt)

        # ---- conv3 (1x1) + bn3 + residual + relu ----------------------------
        y3 = jnp.dot(y2, w3_ref[...], preferred_element_type=jnp.float32)
        out = jnp.maximum(y3 + b3_ref[...] + x2d.astype(jnp.float32), 0.0)
        o_ref[n] = out.reshape(H, W, cout).astype(o_ref.dtype)


# ----------------------------- pallas_call wrapper -----------------------------

def _pick_images_per_block(n_images, per_image_bytes, target_bytes=4 << 20):
    """Largest divisor of N whose activation block fits `target_bytes`, while
    keeping >= 2 grid steps when possible (both TensorCores busy on v7x)."""
    nb = 1
    for d in range(1, n_images + 1):
        if n_images % d:
            continue
        if d * per_image_bytes > target_bytes:
            continue
        if n_images >= 2 and n_images // d < 2:
            continue
        nb = d
    return nb


def _bottleneck_pallas(x_nhwc, w1, b1, w2, b2, w3, b3, out_dtype):
    N, H, W, cin = x_nhwc.shape
    width = w1.shape[1]
    cout = w3.shape[1]
    cdt = w1.dtype
    isz = jnp.dtype(cdt).itemsize
    osz = jnp.dtype(out_dtype).itemsize

    per_image_bytes = H * W * (cin * isz + cout * osz)
    nb = _pick_images_per_block(N, per_image_bytes)
    grid = (N // nb,)

    flops = 2 * N * H * W * (cin * width + 9 * width * width + width * cout)
    bytes_accessed = int(
        x_nhwc.size * isz + N * H * W * cout * osz
        + (w1.size + w2.size + w3.size) * isz
        + (b1.size + b2.size + b3.size) * 4)

    # VMEM budget: double-buffered activation blocks + resident weights (Pallas
    # double-buffers them too) + padded scratch + in-kernel temporaries
    # (im2col slab, f32 accumulators).  Clamp to 64 MiB so it also fits v7x.
    weight_bytes = ((w1.size + w2.size + w3.size) * isz
                    + (b1.size + b2.size + b3.size) * 4)
    scratch_bytes = (H + 2) * (W + 2) * width * isz
    temps_bytes = H * W * (9 * width * isz + 4 * width * 4)
    vmem_est = (2 * nb * H * W * (cin * isz + cout * osz)
                + 2 * weight_bytes + scratch_bytes + temps_bytes)
    vmem_limit = int(min(max(32 << 20, int(1.5 * vmem_est)), 64 << 20))

    return pl.pallas_call(
        bottleneck_kernel,
        out_shape=jax.ShapeDtypeStruct((N, H, W, cout), out_dtype),
        grid=grid,
        in_specs=[
            pl.BlockSpec((nb, H, W, cin), lambda n: (n, 0, 0, 0)),
            pl.BlockSpec((cin, width), lambda n: (0, 0)),         # resident
            pl.BlockSpec((1, width), lambda n: (0, 0)),           # resident
            pl.BlockSpec((9 * width, width), lambda n: (0, 0)),   # resident
            pl.BlockSpec((1, width), lambda n: (0, 0)),           # resident
            pl.BlockSpec((width, cout), lambda n: (0, 0)),        # resident
            pl.BlockSpec((1, cout), lambda n: (0, 0)),            # resident
        ],
        out_specs=pl.BlockSpec((nb, H, W, cout), lambda n: (n, 0, 0, 0)),
        scratch_shapes=[pltpu.VMEM((H + 2, W + 2, width), cdt)],
        compiler_params=pltpu.CompilerParams(
            dimension_semantics=("parallel",),
            vmem_limit_bytes=vmem_limit),
        cost_estimate=pl.CostEstimate(
            flops=flops, transcendentals=0, bytes_accessed=bytes_accessed),
    )(x_nhwc, w1, b1, w2, b2, w3, b3)


# ----------------------------- params / weight prep -----------------------------

def _fold_bn(gamma, beta, mean, var, eps=1e-5):
    scale = gamma / jnp.sqrt(var + eps)
    bias = beta - mean * scale
    return scale, bias


def _bn_init(key, c):
    k1, k2, k3, k4 = jax.random.split(key, 4)
    return dict(
        gamma=1.0 + 0.1 * jax.random.normal(k1, (c,), jnp.float32),
        beta=0.1 * jax.random.normal(k2, (c,), jnp.float32),
        mean=0.1 * jax.random.normal(k3, (c,), jnp.float32),
        var=0.5 + jax.random.uniform(k4, (c,), jnp.float32),
    )


def init_params(key, inplanes, planes, groups=1, base_width=64):
    expansion = 4
    width = int(planes * (base_width / 64.0)) * groups
    k = jax.random.split(key, 6)
    return dict(
        w1=0.1 * jax.random.normal(k[0], (width, inplanes, 1, 1), jnp.float32),   # OIHW
        w2=0.1 * jax.random.normal(k[1], (width, width, 3, 3), jnp.float32),      # OIHW
        w3=0.1 * jax.random.normal(k[2], (planes * expansion, width, 1, 1), jnp.float32),
        bn1=_bn_init(k[3], width),
        bn2=_bn_init(k[4], width),
        bn3=_bn_init(k[5], planes * expansion),
    )


def _prepare_weights(p, compute_dtype):
    """Fold BN into the convs, reshape for the kernel, and zero-pad every
    channel axis to a lane-dense multiple of 128 (mathematically a no-op)."""
    width, cin = p["w1"].shape[:2]
    cout = p["w3"].shape[0]
    wp = _round_up(width, LANE)
    cinp = _round_up(cin, LANE)
    coutp = _round_up(cout, LANE)

    s1, b1 = _fold_bn(**p["bn1"])
    s2, b2 = _fold_bn(**p["bn2"])
    s3, b3 = _fold_bn(**p["bn3"])

    w1 = jnp.transpose(p["w1"][:, :, 0, 0]) * s1[None, :]                 # (cin, width)
    w1 = jnp.pad(w1, ((0, cinp - cin), (0, wp - width)))
    # OIHW -> (kh, kw, in, out) -> (9, in, out); rows tap-major for the im2col
    w2 = (jnp.transpose(p["w2"], (2, 3, 1, 0)).reshape(9, width, width)
          * s2[None, None, :])
    w2 = jnp.pad(w2, ((0, 0), (0, wp - width), (0, wp - width))).reshape(9 * wp, wp)
    w3 = jnp.transpose(p["w3"][:, :, 0, 0]) * s3[None, :]                 # (width, cout)
    w3 = jnp.pad(w3, ((0, wp - width), (0, coutp - cout)))

    b1 = jnp.pad(b1, (0, wp - width))[None, :].astype(jnp.float32)
    b2 = jnp.pad(b2, (0, wp - width))[None, :].astype(jnp.float32)
    b3 = jnp.pad(b3, (0, coutp - cout))[None, :].astype(jnp.float32)
    return (w1.astype(compute_dtype), b1, w2.astype(compute_dtype), b2,
            w3.astype(compute_dtype), b3)


# ----------------------------- forward passes -----------------------------

def bottleneck_forward_nhwc(x_nhwc, p, compute_dtype=jnp.bfloat16, out_dtype=None):
    """NHWC forward — the production entry point (no layout transposes)."""
    N, H, W, cin = x_nhwc.shape
    cout = p["w3"].shape[0]
    assert cin == p["w1"].shape[1]
    assert cin == cout, "downsample=None requires inplanes == planes * expansion"
    out_dtype = compute_dtype if out_dtype is None else out_dtype

    w1, b1, w2, b2, w3, b3 = _prepare_weights(p, compute_dtype)
    cinp = w1.shape[0]
    coutp = w3.shape[1]

    x = x_nhwc.astype(compute_dtype)
    if cinp != cin:
        x = jnp.pad(x, ((0, 0), (0, 0), (0, 0), (0, cinp - cin)))

    out = _bottleneck_pallas(x, w1, b1, w2, b2, w3, b3, out_dtype)
    if coutp != cout:
        out = out[..., :cout]
    return out


def bottleneck_forward(x_nchw, p, compute_dtype=jnp.bfloat16, out_dtype=None):
    """NCHW wrapper for parity with the PyTorch module.  The transposes here
    are test plumbing only; chain bottleneck_forward_nhwc across layers."""
    x_nhwc = jnp.transpose(x_nchw, (0, 2, 3, 1))
    out = bottleneck_forward_nhwc(x_nhwc, p, compute_dtype, out_dtype)
    return jnp.transpose(out, (0, 3, 1, 2))


# ----------------------------- pure-JAX reference -----------------------------

def reference_forward(x, p, eps=1e-5):
    def conv(x, w, stride=1, pad=0):
        return lax.conv_general_dilated(
            x, w, (stride, stride), [(pad, pad), (pad, pad)],
            dimension_numbers=("NCHW", "OIHW", "NCHW"),
            precision=lax.Precision.HIGHEST)

    def bn(x, bnp):
        inv = bnp["gamma"] / jnp.sqrt(bnp["var"] + eps)
        return ((x - bnp["mean"][None, :, None, None]) * inv[None, :, None, None]
                + bnp["beta"][None, :, None, None])

    out = jax.nn.relu(bn(conv(x, p["w1"]), p["bn1"]))
    out = jax.nn.relu(bn(conv(out, p["w2"], 1, 1), p["bn2"]))
    out = bn(conv(out, p["w3"]), p["bn3"])
    return jax.nn.relu(out + x)


if __name__ == "__main__":
    key = jax.random.PRNGKey(0)
    kx, kp = jax.random.split(key)

    # downsample=None requires inplanes == planes * expansion.
    # Cin = Cout = 128 are lane-dense; width = 32 is zero-padded to 128 inside.
    inplanes, planes = 128, 32
    N, H, W = 2, 16, 16
    x = jax.random.normal(kx, (N, inplanes, H, W), jnp.float32)
    params = init_params(kp, inplanes, planes)

    ref = jax.block_until_ready(reference_forward(x, params))

    # strict correctness check: f32 operands, f32 output
    out_f32 = jax.block_until_ready(
        bottleneck_forward(x, params, compute_dtype=jnp.float32))
    assert out_f32.shape == (N, planes * 4, H, W), out_f32.shape
    err_f32 = float(jnp.max(jnp.abs(out_f32 - ref)))
    assert jnp.allclose(out_f32, ref, rtol=5e-3, atol=5e-3), f"f32 max abs err {err_f32}"

    # default performance path: bf16 operands + bf16 output, f32 accumulation
    out_bf16 = jax.block_until_ready(bottleneck_forward(x, params))
    out_bf16 = out_bf16.astype(jnp.float32)
    rel = float(jnp.linalg.norm(out_bf16 - ref) / jnp.linalg.norm(ref))
    err_bf16 = float(jnp.max(jnp.abs(out_bf16 - ref)))
    assert rel < 3e-2 and err_bf16 < 0.5, (rel, err_bf16)

    print("KERNEL_OK")
</pallas_src>

<mosaic_0001>
module attributes {stable_mosaic.version = 11 : i64} {
  func.func @bottleneck_kernel(%arg0: i32, %arg1: memref<1x16x16x128xf32, #tpu.memory_space<vmem>>, %arg2: memref<128x128xf32, #tpu.memory_space<vmem>>, %arg3: memref<1x128xf32, #tpu.memory_space<vmem>>, %arg4: memref<1152x128xf32, #tpu.memory_space<vmem>>, %arg5: memref<1x128xf32, #tpu.memory_space<vmem>>, %arg6: memref<128x128xf32, #tpu.memory_space<vmem>>, %arg7: memref<1x128xf32, #tpu.memory_space<vmem>>, %arg8: memref<1x16x16x128xf32, #tpu.memory_space<vmem>>, %arg9: memref<18x18x128xf32, #tpu.memory_space<vmem>>) attributes {dimension_semantics = [#tpu.dimension_semantics<parallel>], iteration_bounds = array<i64: 2>, scalar_prefetch = 0 : i64, scratch_operands = 1 : i64, tpu.core_type = #tpu.core_type<tc>, window_params = [{transform_indices = @transform_0, window_bounds = array<i64: 1, 16, 16, 128>}, {pipeline_mode = #tpu.pipeline_mode<synchronous>, transform_indices = @transform_1, window_bounds = array<i64: 128, 128>}, {pipeline_mode = #tpu.pipeline_mode<synchronous>, transform_indices = @transform_2, window_bounds = array<i64: 1, 128>}, {pipeline_mode = #tpu.pipeline_mode<synchronous>, transform_indices = @transform_3, window_bounds = array<i64: 1152, 128>}, {pipeline_mode = #tpu.pipeline_mode<synchronous>, transform_indices = @transform_4, window_bounds = array<i64: 1, 128>}, {pipeline_mode = #tpu.pipeline_mode<synchronous>, transform_indices = @transform_5, window_bounds = array<i64: 128, 128>}, {pipeline_mode = #tpu.pipeline_mode<synchronous>, transform_indices = @transform_6, window_bounds = array<i64: 1, 128>}, {transform_indices = @transform_7, window_bounds = array<i64: 1, 16, 16, 128>}]} {
    %cst = arith.constant 0.000000e+00 : f32
    %0 = vector.broadcast %cst : f32 to vector<18x128xf32>
    %c0 = arith.constant 0 : index
    %c0_0 = arith.constant 0 : index
    %c0_1 = arith.constant 0 : index
    %1 = vector.load %arg9[%c0, %c0_0, %c0_1] : memref<18x18x128xf32, #tpu.memory_space<vmem>>, vector<1x18x128xf32>
    %2 = vector.shape_cast %1 : vector<1x18x128xf32> to vector<18x128xf32>
    %3 = vector.shape_cast %0 : vector<18x128xf32> to vector<1x18x128xf32>
    tpu.vector_store %arg9[%c0, %c0_0, %c0_1], %3 {strides = array<i32>} : memref<18x18x128xf32, #tpu.memory_space<vmem>>, vector<1x18x128xf32>,
    %cst_2 = arith.constant 0.000000e+00 : f32
    %4 = vector.broadcast %cst_2 : f32 to vector<18x128xf32>
    %c17 = arith.constant 17 : index
    %c0_3 = arith.constant 0 : index
    %c0_4 = arith.constant 0 : index
    %5 = vector.load %arg9[%c17, %c0_3, %c0_4] : memref<18x18x128xf32, #tpu.memory_space<vmem>>, vector<1x18x128xf32>
    %6 = vector.shape_cast %5 : vector<1x18x128xf32> to vector<18x128xf32>
    %7 = vector.shape_cast %4 : vector<18x128xf32> to vector<1x18x128xf32>
    tpu.vector_store %arg9[%c17, %c0_3, %c0_4], %7 {strides = array<i32>} : memref<18x18x128xf32, #tpu.memory_space<vmem>>, vector<1x18x128xf32>,
    %cst_5 = arith.constant 0.000000e+00 : f32
    %8 = vector.broadcast %cst_5 : f32 to vector<16x1x128xf32>
    %c0_6 = arith.constant 0 : index
    %c0_7 = arith.constant 0 : index
    %c0_8 = arith.constant 0 : index
    %c0_9 = arith.constant 0 : index
    %9 = vector.load %arg1[%c0_6, %c0_7, %c0_8, %c0_9] : memref<1x16x16x128xf32, #tpu.memory_space<vmem>>, vector<1x16x16x128xf32>
    %10 = vector.shape_cast %9 : vector<1x16x16x128xf32> to vector<16x16x128xf32>
    %11 = vector.shape_cast %10 : vector<16x16x128xf32> to vector<256x128xf32>
    %c0_10 = arith.constant 0 : index
    %c0_11 = arith.constant 0 : index
    %12 = vector.load %arg2[%c0_10, %c0_11] : memref<128x128xf32, #tpu.memory_space<vmem>>, vector<128x128xf32>
    %cst_12 = arith.constant dense<0.000000e+00> : vector<256x128xf32>
    %13 = tpu.matmul %11, %12, %cst_12 {dimension_numbers = #tpu.dot_dimension_numbers<[1], [0], [0], [1], [0, 0, 1, 1], [], []>} : vector<256x128xf32>, vector<128x128xf32>, vector<256x128xf32> -> vector<256x128xf32>
    %c0_13 = arith.constant 0 : index
    %c0_14 = arith.constant 0 : index
    %14 = vector.load %arg3[%c0_13, %c0_14] : memref<1x128xf32, #tpu.memory_space<vmem>>, vector<1x128xf32>
    %15 = vector.broadcast %14 : vector<1x128xf32> to vector<256x128xf32>
    %16 = arith.addf %13, %15 : vector<256x128xf32>
    %cst_15 = arith.constant 0.000000e+00 : f32
    %17 = vector.broadcast %cst_15 : f32 to vector<256x128xf32>
    %18 = arith.maximumf %16, %17 : vector<256x128xf32>
    %19 = vector.shape_cast %18 : vector<256x128xf32> to vector<16x16x128xf32>
    %20 = tpu.concatenate %8, %19, %8 in 1 : vector<16x1x128xf32>, vector<16x16x128xf32>, vector<16x1x128xf32> -> vector<16x18x128xf32>
    %c1 = arith.constant 1 : index
    %c0_16 = arith.constant 0 : index
    %c0_17 = arith.constant 0 : index
    %21 = vector.load %arg9[%c1, %c0_16, %c0_17] : memref<18x18x128xf32, #tpu.memory_space<vmem>>, vector<16x18x128xf32>
    tpu.vector_store %arg9[%c1, %c0_16, %c0_17], %20 {strides = array<i32>} : memref<18x18x128xf32, #tpu.memory_space<vmem>>, vector<16x18x128xf32>,
    %c0_18 = arith.constant 0 : index
    %c0_19 = arith.constant 0 : index
    %c0_20 = arith.constant 0 : index
    %22 = vector.load %arg9[%c0_18, %c0_19, %c0_20] : memref<18x18x128xf32, #tpu.memory_space<vmem>>, vector<16x16x128xf32>
    %23 = vector.shape_cast %22 : vector<16x16x128xf32> to vector<256x128xf32>
    %c0_21 = arith.constant 0 : index
    %c1_22 = arith.constant 1 : index
    %c0_23 = arith.constant 0 : index
    %24 = vector.load %arg9[%c0_21, %c1_22, %c0_23] : memref<18x18x128xf32, #tpu.memory_space<vmem>>, vector<16x16x128xf32>
    %25 = vector.shape_cast %24 : vector<16x16x128xf32> to vector<256x128xf32>
    %c0_24 = arith.constant 0 : index
    %c2 = arith.constant 2 : index
    %c0_25 = arith.constant 0 : index
    %26 = vector.load %arg9[%c0_24, %c2, %c0_25] : memref<18x18x128xf32, #tpu.memory_space<vmem>>, vector<16x16x128xf32>
    %27 = vector.shape_cast %26 : vector<16x16x128xf32> to vector<256x128xf32>
    %c1_26 = arith.constant 1 : index
    %c0_27 = arith.constant 0 : index
    %c0_28 = arith.constant 0 : index
    %28 = vector.load %arg9[%c1_26, %c0_27, %c0_28] : memref<18x18x128xf32, #tpu.memory_space<vmem>>, vector<16x16x128xf32>
    %29 = vector.shape_cast %28 : vector<16x16x128xf32> to vector<256x128xf32>
    %c1_29 = arith.constant 1 : index
    %c1_30 = arith.constant 1 : index
    %c0_31 = arith.constant 0 : index
    %30 = vector.load %arg9[%c1_29, %c1_30, %c0_31] : memref<18x18x128xf32, #tpu.memory_space<vmem>>, vector<16x16x128xf32>
    %31 = vector.shape_cast %30 : vector<16x16x128xf32> to vector<256x128xf32>
    %c1_32 = arith.constant 1 : index
    %c2_33 = arith.constant 2 : index
    %c0_34 = arith.constant 0 : index
    %32 = vector.load %arg9[%c1_32, %c2_33, %c0_34] : memref<18x18x128xf32, #tpu.memory_space<vmem>>, vector<16x16x128xf32>
    %33 = vector.shape_cast %32 : vector<16x16x128xf32> to vector<256x128xf32>
    %c2_35 = arith.constant 2 : index
    %c0_36 = arith.constant 0 : index
    %c0_37 = arith.constant 0 : index
    %34 = vector.load %arg9[%c2_35, %c0_36, %c0_37] : memref<18x18x128xf32, #tpu.memory_space<vmem>>, vector<16x16x128xf32>
    %35 = vector.shape_cast %34 : vector<16x16x128xf32> to vector<256x128xf32>
    %c2_38 = arith.constant 2 : index
    %c1_39 = arith.constant 1 : index
    %c0_40 = arith.constant 0 : index
    %36 = vector.load %arg9[%c2_38, %c1_39, %c0_40] : memref<18x18x128xf32, #tpu.memory_space<vmem>>, vector<16x16x128xf32>
    %37 = vector.shape_cast %36 : vector<16x16x128xf32> to vector<256x128xf32>
    %c2_41 = arith.constant 2 : index
    %c2_42 = arith.constant 2 : index
    %c0_43 = arith.constant 0 : index
    %38 = vector.load %arg9[%c2_41, %c2_42, %c0_43] : memref<18x18x128xf32, #tpu.memory_space<vmem>>, vector<16x16x128xf32>
    %39 = vector.shape_cast %38 : vector<16x16x128xf32> to vector<256x128xf32>
    %40 = tpu.concatenate %23, %25, %27, %29, %31, %33, %35, %37, %39 in 1 : vector<256x128xf32>, vector<256x128xf32>, vector<256x128xf32>, vector<256x128xf32>, vector<256x128xf32>, vector<256x128xf32>, vector<256x128xf32>, vector<256x128xf32>, vector<256x128xf32> -> vector<256x1152xf32>
    %c0_44 = arith.constant 0 : index
    %c0_45 = arith.constant 0 : index
    %41 = vector.load %arg4[%c0_44, %c0_45] : memref<1152x128xf32, #tpu.memory_space<vmem>>, vector<1152x128xf32>
    %cst_46 = arith.constant dense<0.000000e+00> : vector<256x128xf32>
    %42 = tpu.matmul %40, %41, %cst_46 {dimension_numbers = #tpu.dot_dimension_numbers<[1], [0], [0], [1], [0, 0, 1, 1], [], []>} : vector<256x1152xf32>, vector<1152x128xf32>, vector<256x128xf32> -> vector<256x128xf32>
    %c0_47 = arith.constant 0 : index
    %c0_48 = arith.constant 0 : index
    %43 = vector.load %arg5[%c0_47, %c0_48] : memref<1x128xf32, #tpu.memory_space<vmem>>, vector<1x128xf32>
    %44 = vector.broadcast %43 : vector<1x128xf32> to vector<256x128xf32>
    %45 = arith.addf %42, %44 : vector<256x128xf32>
    %cst_49 = arith.constant 0.000000e+00 : f32
    %46 = vector.broadcast %cst_49 : f32 to vector<256x128xf32>
    %47 = arith.maximumf %45, %46 : vector<256x128xf32>
    %c0_50 = arith.constant 0 : index
    %c0_51 = arith.constant 0 : index
    %48 = vector.load %arg6[%c0_50, %c0_51] : memref<128x128xf32, #tpu.memory_space<vmem>>, vector<128x128xf32>
    %cst_52 = arith.constant dense<0.000000e+00> : vector<256x128xf32>
    %49 = tpu.matmul %47, %48, %cst_52 {dimension_numbers = #tpu.dot_dimension_numbers<[1], [0], [0], [1], [0, 0, 1, 1], [], []>} : vector<256x128xf32>, vector<128x128xf32>, vector<256x128xf32> -> vector<256x128xf32>
    %c0_53 = arith.constant 0 : index
    %c0_54 = arith.constant 0 : index
    %50 = vector.load %arg7[%c0_53, %c0_54] : memref<1x128xf32, #tpu.memory_space<vmem>>, vector<1x128xf32>
    %51 = vector.broadcast %50 : vector<1x128xf32> to vector<256x128xf32>
    %52 = arith.addf %49, %51 : vector<256x128xf32>
    %53 = arith.addf %52, %11 : vector<256x128xf32>
    %cst_55 = arith.constant 0.000000e+00 : f32
    %54 = vector.broadcast %cst_55 : f32 to vector<256x128xf32>
    %55 = arith.maximumf %53, %54 : vector<256x128xf32>
    %56 = vector.shape_cast %55 : vector<256x128xf32> to vector<16x16x128xf32>
    %c0_56 = arith.constant 0 : index
    %c0_57 = arith.constant 0 : index
    %c0_58 = arith.constant 0 : index
    %c0_59 = arith.constant 0 : index
    %57 = vector.load %arg8[%c0_56, %c0_57, %c0_58, %c0_59] : memref<1x16x16x128xf32, #tpu.memory_space<vmem>>, vector<1x16x16x128xf32>
    %58 = vector.shape_cast %57 : vector<1x16x16x128xf32> to vector<16x16x128xf32>
    %59 = vector.shape_cast %56 : vector<16x16x128xf32> to vector<1x16x16x128xf32>
    tpu.vector_store %arg8[%c0_56, %c0_57, %c0_58, %c0_59], %59 {strides = array<i32>} : memref<1x16x16x128xf32, #tpu.memory_space<vmem>>, vector<1x16x16x128xf32>,
    return
  }
  func.func @transform_0(%arg0: i32) -> (i32, i32, i32, i32) {
    %c0_i32 = arith.constant 0 : i32
    %c0_i32_0 = arith.constant 0 : i32
    %c0_i32_1 = arith.constant 0 : i32
    %c0_i32_2 = arith.constant 0 : i32
    return %arg0, %c0_i32, %c0_i32_0, %c0_i32_1 : i32, i32, i32, i32
  }
  func.func @transform_1(%arg0: i32) -> (i32, i32) {
    %c0_i32 = arith.constant 0 : i32
    %c0_i32_0 = arith.constant 0 : i32
    %c0_i32_1 = arith.constant 0 : i32
    return %c0_i32, %c0_i32_0 : i32, i32
  }
  func.func @transform_2(%arg0: i32) -> (i32, i32) {
    %c0_i32 = arith.constant 0 : i32
    %c0_i32_0 = arith.constant 0 : i32
    %c0_i32_1 = arith.constant 0 : i32
    return %c0_i32, %c0_i32_0 : i32, i32
  }
  func.func @transform_3(%arg0: i32) -> (i32, i32) {
    %c0_i32 = arith.constant 0 : i32
    %c0_i32_0 = arith.constant 0 : i32
    %c0_i32_1 = arith.constant 0 : i32
    return %c0_i32, %c0_i32_0 : i32, i32
  }
  func.func @transform_4(%arg0: i32) -> (i32, i32) {
    %c0_i32 = arith.constant 0 : i32
    %c0_i32_0 = arith.constant 0 : i32
    %c0_i32_1 = arith.constant 0 : i32
    return %c0_i32, %c0_i32_0 : i32, i32
  }
  func.func @transform_5(%arg0: i32) -> (i32, i32) {
    %c0_i32 = arith.constant 0 : i32
    %c0_i32_0 = arith.constant 0 : i32
    %c0_i32_1 = arith.constant 0 : i32
    return %c0_i32, %c0_i32_0 : i32, i32
  }
  func.func @transform_6(%arg0: i32) -> (i32, i32) {
    %c0_i32 = arith.constant 0 : i32
    %c0_i32_0 = arith.constant 0 : i32
    %c0_i32_1 = arith.constant 0 : i32
    return %c0_i32, %c0_i32_0 : i32, i32
  }
  func.func @transform_7(%arg0: i32) -> (i32, i32, i32, i32) {
    %c0_i32 = arith.constant 0 : i32
    %c0_i32_0 = arith.constant 0 : i32
    %c0_i32_1 = arith.constant 0 : i32
    %c0_i32_2 = arith.constant 0 : i32
    return %arg0, %c0_i32, %c0_i32_0, %c0_i32_1 : i32, i32, i32, i32
  }
}

</mosaic_0001>

<bundles_post_ra>
// kernel: tpu_custom_call.1
= control target key start
LH: loop header
LB: loop body
LE: loop exit
PB: predicated region body
PF: predicated region fallthrough
CT: control target
= control target key end

     0   :  { %12 = vsyncpa [#allocation4], 0  ;;  %s5599_s0 = inlined_call_operand.hbm [shape: f32[2,16,16,128], index: 0, kind: input, shape index: {}]   ;;  %s5600_s1 = inlined_call_operand.hbm [shape: f32[128,128], index: 1, kind: input, shape index: {}]   ;;  %s5601_s2 = inlined_call_operand.vmem [shape: f32[1,128], index: 2, kind: input, shape index: {}]   ;;  %s5602_s3 = inlined_call_operand.hbm [shape: f32[1152,128], index: 3, kind: input, shape index: {}]   ;;  %s5603_s4 = inlined_call_operand.vmem [shape: f32[1,128], index: 4, kind: input, shape index: {}]   ;;  %s5604_s5 = inlined_call_operand.hbm [shape: f32[128,128], index: 5, kind: input, shape index: {}]   ;;  %s5605_s6 = inlined_call_operand.vmem [shape: f32[1,128], index: 6, kind: input, shape index: {}]   ;;  %s5606_s7 = inlined_call_operand.hbm [shape: f32[2,16,16,128], index: 7, kind: output, shape index: {}]  }
   0x1   :  { %14 = vsyncpa [#allocation4 + $0x1], 0 }
   0x2   :  { %15 = vsyncpa [#allocation7], 0 }
   0x3   :  { %16 = vsyncpa [#allocation10], 0 }
   0x4   :  { %17 = vsyncpa [#allocation5], 0 }
   0x5   :  { %19 = vsyncpa [#allocation5 + $0x1], 0  ;;  %s4255_s24 = smov 0   ;;  %s4257_s25 = smov 0  }
   0x6   :  { %s4259_s26 = smov 0   ;;  %s4261_s27 = smov 0  }
   0x7 LB: > { %s4276_s28 = sadd.s32 4294967295, %s4202_s27   ;;  %s2927_s29 = sadd.s32 4294967294, %s4202_s27   ;;  %s4202_s27 = sphi %s4261_s27, %s5681_s27   ;;  %s4198_s26 = sphi %s4259_s26, %s5680_s26   ;;  %s4194_s25 = sphi %s4257_s25, %s5679_s25   ;;  %s4190_s24 = sphi %s4255_s24, %s5678_s24  }
   0x8   : > { %p45_p0 = scmp.ne.s32.totalorder %s4194_s25, %s4190_s24  ;;  %p5607_p1 = scmp.eq.s32.totalorder %s4276_s28, 0 }
   0x9   : > { %p201_p3 = scmp.eq.s32.totalorder %s2927_s29, 1  ;;  %p2928_p5 = scmp.ge.s32.totalorder %s4202_s27, 1 }
   0xa   : > { %p4285_p4 = por %p5607_p1, %p45_p0  ;;  %p208_p7 = scmp.lt.s32.totalorder %s4202_s27, 3 }
   0xb   : > { %p4290_p6 = por %p201_p3, %p45_p0  ;;  %s4204_s10 = smov [#allocation6]  }
   0xc   : > { %s5618_s30 = scalar_select %p4285_p4, 1, 0 }
   0xd   : > { %s5619_s8 = scalar_select %p4290_p6, 1, 0 }
   0xe   : > { %p4295_p8 = pnand %p2928_p5, %p208_p7  ;;  %s220_s11 = sshll.u32 %s4204_s10, 4  ;;  %s4299_s11 = int_to_ptr.vmem [resolvable:$true] %s220_s11 }
   0xf   : > { %5620 = sst [smem:[#allocation16_spill]] %s5619_s8  ;;  %s4205_s13 = smov [#allocation8]  }
  0x10   : > { %s5621_s9 = scalar_select %p4295_p8, 1, 0 }
  0x11   : > { %p3864_p9 = pneg %p4295_p8  ;;  %s236_s14 = sshll.u32 %s4205_s13, 4  ;;  %s4310_s14 = int_to_ptr.vmem [resolvable:$true] %s236_s14 }
  0x12   : > { %s4206_s15 = smov [#allocation9]   ;;  %s4014_s19 = scalar_lea.hbm %s5600_s1, 2048 }
  0x13   : > { %p4306_p11 = pnand %p3864_p9, %p5607_p1  ;;  %s4312_s16 = sshll.u32 %s4206_s15, 4  ;;  %s253_s16 = int_to_ptr.vmem [resolvable:$true] %s4312_s16 }
  0x14   : > { %p4015_p12 = scmp.ne.s32.totalorder %s5600_s1, %s4014_s19  ;;  %p4021_p5 = scmp.lt.u32.totalorder %s4014_s19, %s5600_s1 }
  0x15   : > { %p4322_p13 = pneg %p4306_p11 }
  0x17   : > { %p4017_p0 = pnand %p4322_p13, %p4015_p12 }
  0x19   : > { %p4018_p3 = pneg %p4017_p0 }
  0x1b   : > { %p4023_p7 = pnand %p4021_p5, %p4018_p3 }
  0x1d   : > { %4026 = shalt.err (!%p4023_p7)
}
  0x1e   : > { %s4027_s10 = scalar_lea.vmem %s4299_s11, 2048  ;;  %p4035_p2 = scmp.lt.s32.totalorder %s4299_s11, %s4299_s11 }
  0x1f   : > { %p4028_p9 = scmp.ne.s32.totalorder %s4299_s11, %s4027_s10  ;;  %p4036_p6 = scmp.lt.s32.totalorder %s4027_s10, %s4027_s10 }
  0x21   : > { %p4030_p10 = pnand %p4028_p9, %p4322_p13  ;;  %p4037_p12 = por %p4036_p6, %p4035_p2 }
  0x23   : > { %p4031_p1 = pneg %p4030_p10 }
  0x25   : > { %p4038_p0 = pnand %p4037_p12, %p4031_p1 }
  0x27   : > { %4041 = shalt.err (!%p4038_p0)
}
  0x28   : > { %s4207_s13 = smov 128   ;;  %s4208_s15 = smov 8  }
  0x29   : > { %3867 = dma.hbm_to_vmem [thread:$0]  (!%p4306_p11), %s5600_s1, 2048, %s4299_s11, [#allocation7], %s4207_s13, %s4207_s13, %s4208_s15  }
  0x2a   : > { %s4042_s21 = scalar_lea.hbm %s5602_s3, 18432 }
  0x2b   : > { %p4043_p1 = scmp.ne.s32.totalorder %s5602_s3, %s4042_s21  ;;  %p4049_p10 = scmp.lt.u32.totalorder %s4042_s21, %s5602_s3 }
  0x2d   : > { %p4045_p2 = pnand %p4043_p1, %p4322_p13 }
  0x2f   : > { %p4046_p6 = pneg %p4045_p2 }
  0x31   : > { %p4051_p3 = pnand %p4049_p10, %p4046_p6 }
  0x33   : > { %4054 = shalt.err (!%p4051_p3)
}
  0x34   : > { %s4055_s11 = scalar_lea.vmem %s4310_s14, 18432  ;;  %p4063_p12 = scmp.lt.s32.totalorder %s4310_s14, %s4310_s14 }
  0x35   : > { %p4056_p5 = scmp.ne.s32.totalorder %s4310_s14, %s4055_s11  ;;  %p4064_p0 = scmp.lt.s32.totalorder %s4055_s11, %s4055_s11 }
  0x37   : > { %p4058_p7 = pnand %p4056_p5, %p4322_p13  ;;  %p4065_p1 = por %p4064_p0, %p4063_p12 }
  0x39   : > { %p4059_p9 = pneg %p4058_p7 }
  0x3b   : > { %p4066_p2 = pnand %p4065_p1, %p4059_p9 }
  0x3d   : > { %4069 = shalt.err (!%p4066_p2)
}
  0x3e   : > { %3870 = dma.hbm_to_vmem [thread:$0]  (!%p4306_p11), %s5602_s3, 18432, %s4310_s14, [#allocation7], %s4207_s13, %s4207_s13, %s4208_s15  }
  0x3f   : > { %s4070_s20 = scalar_lea.hbm %s5604_s5, 2048 }
  0x40   : > { %p4071_p6 = scmp.ne.s32.totalorder %s5604_s5, %s4070_s20  ;;  %p4077_p5 = scmp.lt.u32.totalorder %s4070_s20, %s5604_s5 }
  0x42   : > { %p4073_p10 = pnand %p4071_p6, %p4322_p13 }
  0x44   : > { %p4074_p3 = pneg %p4073_p10 }
  0x46   : > { %p4079_p7 = pnand %p4077_p5, %p4074_p3 }
  0x48   : > { %4082 = shalt.err (!%p4079_p7)
}
  0x49   : > { %s4083_s11 = scalar_lea.vmem %s253_s16, 2048  ;;  %p4091_p1 = scmp.lt.s32.totalorder %s253_s16, %s253_s16 }
  0x4a   : > { %p4084_p9 = scmp.ne.s32.totalorder %s253_s16, %s4083_s11  ;;  %p4092_p2 = scmp.lt.s32.totalorder %s4083_s11, %s4083_s11 }
  0x4c   : > { %p4086_p12 = pnand %p4084_p9, %p4322_p13  ;;  %p4093_p4 = por %p4092_p2, %p4091_p1 }
  0x4e   : > { %p4087_p0 = pneg %p4086_p12 }
  0x50   : > { %p4094_p8 = pnand %p4093_p4, %p4087_p0 }
  0x52   : > { %4097 = shalt.err (!%p4094_p8)
}
  0x53   : > { %3873 = dma.hbm_to_vmem [thread:$0]  (!%p4306_p11), %s5604_s5, 2048, %s253_s16, [#allocation10], %s4207_s13, %s4207_s13, %s4208_s15  }
  0x54   : > { %s4395_s22 = sadd.s32 1, %s4202_s27   ;;  %s32_s17 = sadd.s32 1, %s4198_s26 }
  0x55   : > { %s29_s12 = ssub.s32 %s4202_s27, %s4395_s22  ;;  %p39_p8 = scmp.ne.s32.totalorder %s4198_s26, %s4194_s25 }
  0x56   : > { %p30_p4 = scmp.eq.s32.totalorder %s29_s12, 0  ;;  %p40_p13 = scmp.eq.s32.totalorder %s4202_s27, 0 }
  0x57   : > { %p3885_p6 = scmp.lt.s32.totalorder %s4202_s27, 2  ;;  %p5624_p3 = scmp.eq.s32.totalorder %s4276_s28, 1 }
  0x58   : > { %s4405_s18 = scalar_select %p30_p4, %s4198_s26, %s32_s17  }
  0x59   : > { %p41_p10 = por %p40_p13, %p39_p8  ;;  %p4409_p5 = por %p5624_p3, %p39_p8 }
  0x5a   : > { %s269_s20 = sand.u32 1, %s4198_s26   ;;  %s2950_s21 = sshll.u32 %s4202_s27, 12 }
  0x5b   : > { %s2933_s16 = sshll.u32 %s269_s20, 8  ;;  %s4418_s10 = scalar_lea.hbm %s5599_s0, %s2950_s21 }
  0x5c   : > { %s273_s11 = scalar_lea.vmem [#allocation3], %s2933_s16  ;;  %p4420_p11 = pnand %p3885_p6, %p41_p10 }
  0x5d   : > { %s280_s14 = sshll.u32 %s273_s11, 4  ;;  %s4426_s12 = scalar_lea.sflag [#allocation4], %s269_s20  ;;  %s4424_s14 = int_to_ptr.vmem [resolvable:$true] %s280_s14 }
  0x5e   : > { %s4098_s17 = scalar_lea.hbm %s4418_s10, 4096  ;;  %p4100_p9 = pneg %p4420_p11 }
  0x5f   : > { %p4099_p7 = scmp.ne.s32.totalorder %s4418_s10, %s4098_s17  ;;  %s4103_s23 = scalar_lea.hbm %s5599_s0, 8192 }
  0x60   : > { %p4104_p1 = scmp.lt.u32.totalorder %s4418_s10, %s5599_s0  ;;  %p4105_p2 = scmp.lt.u32.totalorder %s4103_s23, %s4098_s17 }
  0x61   : > { %p4101_p12 = pnand %p4100_p9, %p4099_p7  ;;  %p4107_p8 = scmp.lt.u32.totalorder %s4098_s17, %s4418_s10 }
  0x62   : > { %p4106_p4 = por %p4105_p2, %p4104_p1 }
  0x63   : > { %p4102_p0 = pneg %p4101_p12 }
  0x64   : > { %p4108_p13 = por %p4107_p8, %p4106_p4 }
  0x66   : > { %p4109_p6 = pnand %p4108_p13, %p4102_p0 }
  0x68   : > { %4112 = shalt.err (!%p4109_p6)
}
  0x69   : > { %s4113_s20 = scalar_lea.vmem %s4424_s14, 4096  ;;  %s4209_s21 = smov [#allocation3]  }
  0x6a   : > { %p4114_p10 = scmp.ne.s32.totalorder %s4424_s14, %s4113_s20  ;;  %s4118_s16 = sshll.u32 %s4209_s21, 4  ;;  %s4119_s16 = int_to_ptr.vmem [resolvable:$false] %s4118_s16 }
  0x6b   : > { %s4120_s29 = scalar_lea.vmem %s4119_s16, 8192  ;;  %p4121_p12 = scmp.lt.s32.totalorder %s4424_s14, %s4119_s16 }
  0x6c   : > { %p4116_p3 = pnand %p4114_p10, %p4100_p9  ;;  %p4122_p1 = scmp.lt.s32.totalorder %s4120_s29, %s4113_s20 }
  0x6e   : > { %p4117_p7 = pneg %p4116_p3  ;;  %p4123_p2 = por %p4122_p1, %p4121_p12 }
  0x70   : > { %p4124_p4 = pnand %p4123_p2, %p4117_p7 }
  0x72   : > { %4127 = shalt.err (!%p4124_p4)
}
  0x73   : > { %3877 = dma.hbm_to_vmem [thread:$0]  (!%p4420_p11), %s4418_s10, 4096, %s4424_s14, %s4426_s12, %s4207_s13, %s4207_s13, %s4208_s15  }
  0x74   : > { %p5627_p9 = scmp.ne.s32.totalorder %s5621_s9, 0 }
  0x76   : > { %292 = sbr.rel (%p5627_p9) target bundleno = 1203 (0x4b3), region = 48 }
  0x7d   : > { %s4460_s17 = sand.u32 1, %s4194_s25   ;;  %p5628_p0 = scmp.ne.s32.totalorder %s5618_s30, 0 }
  0x7e   : > { %s2937_s23 = sshll.u32 %s4460_s17, 8  ;;  %s295_s11 = scalar_lea.sflag [#allocation4], %s4460_s17 }
  0x7f   : > { %s4466_s8 = scalar_lea.vmem [#allocation3], %s2937_s23 }
  0x80   : > { %4173 = dma.done.wait (%p5628_p0), %s295_s11, 4096  }
  0x81   : > { %4175 = vsyncadd (%p5628_p0), %s295_s11, 4294963200  ;;  %p5629_p11 = scmp.eq.s32.totalorder %s4276_s28, 0 }
  0x83   : > { %4177 = dma.done.wait (%p5629_p11), [#allocation7], 20480   ;;  %p5630_p8 = pmov %p5629_p11 }
  0x85   : > { %4179 = vsyncadd (%p5630_p8), [#allocation7], 4294946816  ;;  %p5631_p13 = pmov %p5630_p8 }
  0x86   : > { %p5632_p6 = pmov %p5630_p8 }
  0x87   : > { %4181 = dma.done.wait (%p5631_p13), [#allocation10], 2048  }
  0x88   : > { %4183 = vsyncadd (%p5632_p6), [#allocation10], 4294965248  ;;  %v4210_v0 = vmov 0.0|0.0   ;;  %v380_v1 = vld [vmem:[#allocation6] sm:$0xff]  ;;  %v381_v2 = vld [vmem:[#allocation6 + $0x8] sm:$0xff]  ;;  %vm692_vm0 = vcmask 1040384  }
  0x89   : > { %3624 = vmatprep.subr.bf16.mxu1 %v4210_v0  ;;  %v382_v3 = vld [vmem:[#allocation6 + $0x10] sm:$0xff]  ;;  %v3336_v4 = vpack.c.bf16 %v381_v2, %v380_v1  ;;  %v383_v5 = vld [vmem:[#allocation6 + $0x18] sm:$0xff]  ;;  %v384_v7 = vld [vmem:[#allocation6 + $0x20] sm:$0xff]  ;;  %s5454_s12 = scalar_lea.vmem [#allocation11], %s2937_s23  ;;  %s2951_s20 = sshll.u32 %s4276_s28, 12 }
  0x8a   : > { %v3340_v6 = vpack.c.bf16 %v383_v5, %v382_v3  ;;  %v385_v8 = vld [vmem:[#allocation6 + $0x28] sm:$0xff]  ;;  %v348_v10 = vld [vmem:[%s4466_s8] sm:$0xff]  ;;  %v386_v11 = vld [vmem:[#allocation6 + $0x30] sm:$0xff]  ;;  %s2825_s21 = sshll.u32 %s5454_s12, 4  ;;  %s5551_s23 = scalar_lea.hbm %s5606_s7, %s2951_s20  ;;  %s5553_s21 = int_to_ptr.vmem [resolvable:$true] %s2825_s21 }
  0x8b   : > { %3337 = vmatprep.subr.bf16.mxu0 %v3336_v4  ;;  %v3344_v9 = vpack.c.bf16 %v385_v8, %v384_v7  ;;  %v387_v12 = vld [vmem:[#allocation6 + $0x38] sm:$0xff]  ;;  %3128 = vmatprep.mubr.f32.mxu0 %v348_v10  ;;  %v388_v14 = vld [vmem:[#allocation6 + $0x40] sm:$0xff]  ;;  %v389_v15 = vld [vmem:[#allocation6 + $0x48] sm:$0xff]  ;;  %s2812_s28 = scalar_lea.sflag [#allocation5], %s4460_s17  ;;  %s4128_s11 = scalar_lea.vmem %s5553_s21, 4096 }
  0x8c   : > { %3339 = vmatpush3.bf16.msra.mxu0 %v3336_v4  ;;  %v3348_v13 = vpack.c.bf16 %v387_v12, %v386_v11  ;;  %v3352_v16 = vpack.c.bf16 %v389_v15, %v388_v14  ;;  %v390_v17 = vld [vmem:[#allocation6 + $0x50] sm:$0xff]  ;;  %v391_v18 = vld [vmem:[#allocation6 + $0x58] sm:$0xff]  ;;  %v392_v20 = vld [vmem:[#allocation6 + $0x60] sm:$0xff]  ;;  %p4129_p10 = scmp.ne.s32.totalorder %s5553_s21, %s4128_s11 }
  0x8d   : > { %3341 = vmatprep.subr.bf16.mxu0 %v3340_v6  ;;  %v3356_v19 = vpack.c.bf16 %v391_v18, %v390_v17  ;;  %v393_v21 = vld [vmem:[#allocation6 + $0x68] sm:$0xff]  ;;  %v1191_v23 = vld [vmem:[#allocation8 + $0x100] sm:$0xff]  ;;  %v394_v25 = vld [vmem:[#allocation6 + $0x70] sm:$0xff] }
  0x8e   : > { %v3360_v22 = vpack.c.bf16 %v393_v21, %v392_v20  ;;  %v1192_v24 = vld [vmem:[#allocation8 + $0x108] sm:$0xff]  ;;  %v395_v26 = vld [vmem:[#allocation6 + $0x78] sm:$0xff]  ;;  %v1193_v28 = vld [vmem:[#allocation8 + $0x110] sm:$0xff]  ;;  %p4130_p3 = pnand %p4129_p10, %p4409_p5 }
  0x8f   : > { %v4482_v27 = vpack.c.bf16 %v1192_v24, %v1191_v23  ;;  %v1194_v29 = vld [vmem:[#allocation8 + $0x118] sm:$0xff]  ;;  %v3364_v31 = vpack.c.bf16 %v395_v26, %v394_v25  ;;  %v1195_v32 = vld [vmem:[#allocation8 + $0x120] sm:$0xff]  ;;  %v1196_v33 = vld [vmem:[#allocation8 + $0x128] sm:$0xff] }
  0x90   : > { %3343 = vmatpush3.bf16.msra.mxu0 %v3340_v6  ;;  %v4485_v30 = vpack.c.bf16 %v1194_v29, %v1193_v28  ;;  %v4489_v34 = vpack.c.bf16 %v1196_v33, %v1195_v32  ;;  %v1159_v35 = vld [vmem:[#allocation8] sm:$0xff]  ;;  %v1160_v36 = vld [vmem:[#allocation8 + $0x8] sm:$0xff]  ;;  %v1197_v37 = vld [vmem:[#allocation8 + $0x130] sm:$0xff]  ;;  %p4131_p7 = pneg %p4130_p3 }
  0x91   : > { %3345 = vmatprep.subr.bf16.mxu0 %v3344_v9  ;;  %3640 = vmatpush1.bf16.msra.mxu1 %v4482_v27  ;;  %v1198_v38 = vld [vmem:[#allocation8 + $0x138] sm:$0xff]  ;;  %v349_v39 = vld [vmem:[%s4466_s8 + $0x8] sm:$0xff]  ;;  %v3369_v40 = vpack.c.bf16 %v1160_v36, %v1159_v35  ;;  %v350_v41 = vld [vmem:[%s4466_s8 + $0x10] sm:$0xff] }
  0x92   : > { %3625 = vmatprep.subr.bf16.mxu1 %v4210_v0  ;;  %v1161_v42 = vld [vmem:[#allocation8 + $0x10] sm:$0xff]  ;;  %v1162_v43 = vld [vmem:[#allocation8 + $0x18] sm:$0xff]  ;;  %v4497_v44 = vpack.c.bf16 %v1198_v38, %v1197_v37  ;;  %v1199_v45 = vld [vmem:[#allocation8 + $0x140] sm:$0xff] }
  0x93   : > { %v1200_v46 = vld [vmem:[#allocation8 + $0x148] sm:$0xff]  ;;  %v351_v47 = vld [vmem:[%s4466_s8 + $0x18] sm:$0xff]  ;;  %v3372_v48 = vpack.c.bf16 %v1162_v43, %v1161_v42  ;;  %v352_v49 = vld [vmem:[%s4466_s8 + $0x20] sm:$0xff] }
  0x94   : > { %3347 = vmatpush3.bf16.msra.mxu0 %v3344_v9  ;;  %v1163_v50 = vld [vmem:[#allocation8 + $0x20] sm:$0xff]  ;;  %v1164_v51 = vld [vmem:[#allocation8 + $0x28] sm:$0xff]  ;;  %v4503_v52 = vpack.c.bf16 %v1200_v46, %v1199_v45  ;;  %v1201_v53 = vld [vmem:[#allocation8 + $0x150] sm:$0xff] }
  0x95   : > { %3349 = vmatprep.subr.bf16.mxu0 %v3348_v13  ;;  %3641 = vmatpush1.bf16.msra.mxu1 %v4485_v30  ;;  %v1202_v54 = vld [vmem:[#allocation8 + $0x158] sm:$0xff]  ;;  %v353_v55 = vld [vmem:[%s4466_s8 + $0x28] sm:$0xff]  ;;  %v3375_v56 = vpack.c.bf16 %v1164_v51, %v1163_v50  ;;  %v354_v57 = vld [vmem:[%s4466_s8 + $0x30] sm:$0xff] }
  0x96   : > { %3626 = vmatprep.subr.bf16.mxu1 %v4210_v0  ;;  %v1165_v58 = vld [vmem:[#allocation8 + $0x30] sm:$0xff]  ;;  %v1166_v59 = vld [vmem:[#allocation8 + $0x38] sm:$0xff]  ;;  %v4510_v60 = vpack.c.bf16 %v1202_v54, %v1201_v53  ;;  %v356_v63 = vld [vmem:[%s4466_s8 + $0x40] sm:$0xff] }
  0x97   : > { %v355_v61 = vld [vmem:[%s4466_s8 + $0x38] sm:$0xff]  ;;  %v3378_v62 = vpack.c.bf16 %v1166_v59, %v1165_v58  ;;  %v1167_v1 = vld [vmem:[#allocation8 + $0x40] sm:$0xff]  ;;  %v1168_v2 = vld [vmem:[#allocation8 + $0x48] sm:$0xff] }
  0x98   : > { %3351 = vmatpush3.bf16.msra.mxu0 %v3348_v13  ;;  %v357_v3 = vld [vmem:[%s4466_s8 + $0x48] sm:$0xff]  ;;  %v3381_v4 = vpack.c.bf16 %v1168_v2, %v1167_v1  ;;  %v358_v5 = vld [vmem:[%s4466_s8 + $0x50] sm:$0xff]  ;;  %v1170_v7 = vld [vmem:[#allocation8 + $0x58] sm:$0xff] }
  0x99   : > { %3353 = vmatprep.subr.bf16.mxu0 %v3352_v16  ;;  %3642 = vmatpush1.bf16.msra.mxu1 %v4489_v34  ;;  %v1169_v6 = vld [vmem:[#allocation8 + $0x50] sm:$0xff]  ;;  %v359_v8 = vld [vmem:[%s4466_s8 + $0x58] sm:$0xff]  ;;  %v360_v10 = vld [vmem:[%s4466_s8 + $0x60] sm:$0xff] }
  0x9a   : > { %3627 = vmatprep.subr.bf16.mxu1 %v4210_v0  ;;  %v3384_v9 = vpack.c.bf16 %v1170_v7, %v1169_v6  ;;  %v1171_v11 = vld [vmem:[#allocation8 + $0x60] sm:$0xff]  ;;  %v1172_v12 = vld [vmem:[#allocation8 + $0x68] sm:$0xff]  ;;  %v362_v15 = vld [vmem:[%s4466_s8 + $0x70] sm:$0xff]  ;;  %v4211_v6 = vmov 0.0  }
  0x9b   : > { %v361_v13 = vld [vmem:[%s4466_s8 + $0x68] sm:$0xff]  ;;  %v3387_v14 = vpack.c.bf16 %v1172_v12, %v1171_v11  ;;  %v1174_v17 = vld [vmem:[#allocation8 + $0x78] sm:$0xff]  ;;  %v364_v20 = vld [vmem:[%s4466_s8 + $0x80] sm:$0xff]  ;;  %341 = vst [vmem:[#allocation2] sm:$0xff] %v4211_v6 }
  0x9c   : > { %3355 = vmatpush3.bf16.msra.mxu0 %v3352_v16  ;;  %v1173_v16 = vld [vmem:[#allocation8 + $0x70] sm:$0xff]  ;;  %v363_v18 = vld [vmem:[%s4466_s8 + $0x78] sm:$0xff]  ;;  %v1175_v21 = vld [vmem:[#allocation8 + $0x80] sm:$0xff]  ;;  %342 = vst [vmem:[#allocation2 + $0x8] sm:$0xff] %v4211_v6 }
  0x9d   : > { %3357 = vmatprep.subr.bf16.mxu0 %v3356_v19  ;;  %3643 = vmatpush1.bf16.msra.mxu1 %v4497_v44  ;;  %v365_v23 = vld [vmem:[%s4466_s8 + $0x88] sm:$0xff]  ;;  %v366_v25 = vld [vmem:[%s4466_s8 + $0x90] sm:$0xff]  ;;  %v1178_v28 = vld [vmem:[#allocation8 + $0x98] sm:$0xff]  ;;  %343 = vst [vmem:[#allocation2 + $0x10] sm:$0x3] %v4211_v6 }
  0x9e   : > { %3628 = vmatprep.subr.bf16.mxu1 %v4210_v0  ;;  %v1177_v26 = vld [vmem:[#allocation8 + $0x90] sm:$0xff]  ;;  %v367_v29 = vld [vmem:[%s4466_s8 + $0x98] sm:$0xff]  ;;  %v368_v32 = vld [vmem:[%s4466_s8 + $0xa0] sm:$0xff]  ;;  %345 = vst [vmem:[#allocation2 + $0x198] sm:$0xff] %v4211_v6 }
  0x9f   : > { %v1179_v33 = vld [vmem:[#allocation8 + $0xa0] sm:$0xff]  ;;  %v1180_v35 = vld [vmem:[#allocation8 + $0xa8] sm:$0xff]  ;;  %v370_v38 = vld [vmem:[%s4466_s8 + $0xb0] sm:$0xff]  ;;  %346 = vst [vmem:[#allocation2 + $0x1a0] sm:$0xff] %v4211_v6 }
  0xa0   : > { %3359 = vmatpush3.bf16.msra.mxu0 %v3356_v19  ;;  %v3390_v19 = vpack.c.bf16 %v1174_v17, %v1173_v16  ;;  %v369_v36 = vld [vmem:[%s4466_s8 + $0xa8] sm:$0xff]  ;;  %v3399_v37 = vpack.c.bf16 %v1180_v35, %v1179_v33  ;;  %v372_v43 = vld [vmem:[%s4466_s8 + $0xc0] sm:$0xff]  ;;  %v1185_v50 = vld [vmem:[#allocation8 + $0xd0] sm:$0xff]  ;;  %347 = vst [vmem:[#allocation2 + $0x1a8] sm:$0x3] %v4211_v6 }
  0xa1   : > { %3361 = vmatprep.subr.bf16.mxu0 %v3360_v22  ;;  %3644 = vmatpush1.bf16.msra.mxu1 %v4503_v52  ;;  %v1183_v45 = vld [vmem:[#allocation8 + $0xc0] sm:$0xff]  ;;  %v1184_v46 = vld [vmem:[#allocation8 + $0xc8] sm:$0xff]  ;;  %v1186_v51 = vld [vmem:[#allocation8 + $0xd8] sm:$0xff] }
  0xa2   : > { %3629 = vmatprep.subr.bf16.mxu1 %v4210_v0  ;;  %v375_v53 = vld [vmem:[%s4466_s8 + $0xd8] sm:$0xff]  ;;  %v3408_v54 = vpack.c.bf16 %v1186_v51, %v1185_v50  ;;  %v1203_v59 = vld [vmem:[#allocation8 + $0x160] sm:$0xff]  ;;  %vm4637_vm1 = vmneg %vm692_vm0 }
  0xa3   : > { %v379_v58 = vld [vmem:[%s4466_s8 + $0xf8] sm:$0xff]  ;;  %v1187_v2 = vld [vmem:[#allocation8 + $0xe0] sm:$0xff] }
  0xa4   : > { %3363 = vmatpush3.bf16.msra.mxu0 %v3360_v22  ;;  %v1176_v22 = vld [vmem:[#allocation8 + $0x88] sm:$0xff]  ;;  %v1206_v1 = vld [vmem:[#allocation8 + $0x178] sm:$0xff]  ;;  %v1207_v7 = vld [vmem:[#allocation8 + $0x180] sm:$0xff] }
  0xa5   : > { %3365 = vmatprep.subr.bf16.mxu0 %v3364_v31  ;;  %3645 = vmatpush1.bf16.msra.mxu1 %v4510_v60  ;;  %v3393_v24 = vpack.c.bf16 %v1176_v22, %v1175_v21  ;;  %v1211_v17 = vld [vmem:[#allocation8 + $0x1a0] sm:$0xff]  ;;  %v1213_v21 = vld [vmem:[#allocation8 + $0x1b0] sm:$0xff]  ;;  %v1214_v22 = vld [vmem:[#allocation8 + $0x1b8] sm:$0xff] }
  0xa6   : > { %3630 = vmatprep.subr.bf16.mxu1 %v4210_v0  ;;  %v1222_v33 = vld [vmem:[#allocation8 + $0x1f8] sm:$0xff] }
  0xa8   : > { %3367 = vmatpush3.bf16.msra.mxu0 %v3364_v31  ;;  %v3396_v31 = vpack.c.bf16 %v1178_v28, %v1177_v26  ;;  %v1217_v26 = vld [vmem:[#allocation8 + $0x1d0] sm:$0xff]  ;;  %v1218_v28 = vld [vmem:[#allocation8 + $0x1d8] sm:$0xff] }
  0xa9   : > { %3368 = vmatprep.subr.bf16.mxu0 %v4210_v0 }
  0xab   : > { %3129 = vmatmul.mubr.f32.vlgmr.msra.gmra.mrb[0].mxu0 %v349_v39  ;;  %v1181_v39 = vld [vmem:[#allocation8 + $0xb0] sm:$0xff] }
  0xac   : > { %3131 = vmatprep.mubr.f32.mxu0 %v350_v41  ;;  %3370 = vmatpush1.bf16.msra.mxu0 %v3369_v40  ;;  %v1182_v40 = vld [vmem:[#allocation8 + $0xb8] sm:$0xff] }
  0xad   : > { %3371 = vmatprep.subr.bf16.mxu0 %v4210_v0  ;;  %v371_v41 = vld [vmem:[%s4466_s8 + $0xb8] sm:$0xff]  ;;  %v3402_v42 = vpack.c.bf16 %v1182_v40, %v1181_v39 }
  0xaf   : > { %3132 = vmatmul.mubr.f32.gmra.mrb[2].mxu0 %v351_v47  ;;  %v373_v47 = vld [vmem:[%s4466_s8 + $0xc8] sm:$0xff] }
  0xb0   : > { %3134 = vmatprep.mubr.f32.mxu0 %v352_v49  ;;  %3373 = vmatpush1.bf16.msra.mxu0 %v3372_v48  ;;  %v3405_v48 = vpack.c.bf16 %v1184_v46, %v1183_v45  ;;  %v374_v49 = vld [vmem:[%s4466_s8 + $0xd0] sm:$0xff] }
  0xb1   : > { %3374 = vmatprep.subr.bf16.mxu0 %v4210_v0 }
  0xb3   : > { %3135 = vmatmul.mubr.f32.gmra.mrb[4].mxu0 %v353_v55  ;;  %v376_v55 = vld [vmem:[%s4466_s8 + $0xe0] sm:$0xff] }
  0xb4   : > { %3137 = vmatprep.mubr.f32.mxu0 %v354_v57  ;;  %3376 = vmatpush1.bf16.msra.mxu0 %v3375_v56  ;;  %v377_v56 = vld [vmem:[%s4466_s8 + $0xe8] sm:$0xff]  ;;  %v378_v57 = vld [vmem:[%s4466_s8 + $0xf0] sm:$0xff] }
  0xb5   : > { %3377 = vmatprep.subr.bf16.mxu0 %v4210_v0 }
  0xb7   : > { %3138 = vmatmul.mubr.f32.gmra.mrb[6].mxu0 %v355_v61  ;;  %v1204_v61 = vld [vmem:[#allocation8 + $0x168] sm:$0xff] }
  0xb8   : > { %3140 = vmatprep.mubr.f32.mxu0 %v356_v63  ;;  %3379 = vmatpush1.bf16.msra.mxu0 %v3378_v62  ;;  %v4552_v62 = vpack.c.bf16 %v1204_v61, %v1203_v59  ;;  %v1205_v63 = vld [vmem:[#allocation8 + $0x170] sm:$0xff] }
  0xb9   : > { %3380 = vmatprep.subr.bf16.mxu0 %v4210_v0 }
  0xba   : > { %3646 = vmatpush1.bf16.msra.mxu1 %v4552_v62 }
  0xbb   : > { %3141 = vmatmul.mubr.f32.gmra.mrb[8].mxu0 %v357_v3  ;;  %3631 = vmatprep.subr.bf16.mxu1 %v4210_v0  ;;  %v1188_v3 = vld [vmem:[#allocation8 + $0xe8] sm:$0xff] }
  0xbc   : > { %3143 = vmatprep.mubr.f32.mxu0 %v358_v5  ;;  %3382 = vmatpush1.bf16.msra.mxu0 %v3381_v4  ;;  %v4556_v4 = vpack.c.bf16 %v1206_v1, %v1205_v63  ;;  %v3411_v5 = vpack.c.bf16 %v1188_v3, %v1187_v2 }
  0xbd   : > { %3383 = vmatprep.subr.bf16.mxu0 %v4210_v0 }
  0xbe   : > { %3647 = vmatpush1.bf16.msra.mxu1 %v4556_v4 }
  0xbf   : > { %3144 = vmatmul.mubr.f32.gmra.mrb[10].mxu0 %v359_v8  ;;  %3632 = vmatprep.subr.bf16.mxu1 %v4210_v0  ;;  %v1208_v8 = vld [vmem:[#allocation8 + $0x188] sm:$0xff] }
  0xc0   : > { %3146 = vmatprep.mubr.f32.mxu0 %v360_v10  ;;  %3385 = vmatpush1.bf16.msra.mxu0 %v3384_v9  ;;  %v1189_v9 = vld [vmem:[#allocation8 + $0xf0] sm:$0xff]  ;;  %v1190_v10 = vld [vmem:[#allocation8 + $0xf8] sm:$0xff]  ;;  %v3441_v11 = vpack.c.bf16 %v1208_v8, %v1207_v7 }
  0xc1   : > { %3386 = vmatprep.subr.bf16.mxu0 %v4210_v0  ;;  %v3414_v12 = vpack.c.bf16 %v1190_v10, %v1189_v9 }
  0xc2   : > { %3648 = vmatpush1.bf16.msra.mxu1 %v3441_v11 }
  0xc3   : > { %3147 = vmatmul.mubr.f32.gmra.mrb[12].mxu0 %v361_v13  ;;  %3633 = vmatprep.subr.bf16.mxu1 %v4210_v0  ;;  %v1209_v13 = vld [vmem:[#allocation8 + $0x190] sm:$0xff] }
  0xc4   : > { %3149 = vmatprep.mubr.f32.mxu0 %v362_v15  ;;  %3388 = vmatpush1.bf16.msra.mxu0 %v3387_v14  ;;  %v1210_v14 = vld [vmem:[#allocation8 + $0x198] sm:$0xff] }
  0xc5   : > { %3389 = vmatprep.subr.bf16.mxu0 %v4210_v0  ;;  %v902_v15 = vld [vmem:[#allocation2 + $0x1] sm:$0xff]  ;;  %v3444_v16 = vpack.c.bf16 %v1210_v14, %v1209_v13 }
  0xc7   : > { %3150 = vmatmul.mubr.f32.gmra.mrb[14].mxu0 %v363_v18  ;;  %3649 = vmatpush1.bf16.msra.mxu1 %v3444_v16  ;;  %v1212_v18 = vld [vmem:[#allocation8 + $0x1a8] sm:$0xff] }
  0xc8   : > { %3152 = vmatprep.mubr.f32.mxu0 %v364_v20  ;;  %3391 = vmatpush1.bf16.msra.mxu0 %v3390_v19  ;;  %v903_v19 = vld [vmem:[#allocation2 + $0x9] sm:$0xff]  ;;  %v3447_v20 = vpack.c.bf16 %v1212_v18, %v1211_v17 }
  0xc9   : > { %3392 = vmatprep.subr.bf16.mxu0 %v4210_v0  ;;  %3634 = vmatprep.subr.bf16.mxu1 %v4210_v0 }
  0xcb   : > { %3153 = vmatmul.mubr.f32.gmra.mrb[16].mxu0 %v365_v23  ;;  %3650 = vmatpush1.bf16.msra.mxu1 %v3447_v20  ;;  %v3450_v23 = vpack.c.bf16 %v1214_v22, %v1213_v21 }
  0xcc   : > { %3155 = vmatprep.mubr.f32.mxu0 %v366_v25  ;;  %3394 = vmatpush1.bf16.msra.mxu0 %v3393_v24  ;;  %v1216_v24 = vld [vmem:[#allocation8 + $0x1c8] sm:$0xff] }
  0xcd   : > { %3395 = vmatprep.subr.bf16.mxu0 %v4210_v0  ;;  %3635 = vmatprep.subr.bf16.mxu1 %v4210_v0 }
  0xcf   : > { %3156 = vmatmul.mubr.f32.gmra.mrb[18].mxu0 %v367_v29  ;;  %3651 = vmatpush1.bf16.msra.mxu1 %v3450_v23  ;;  %v1219_v29 = vld [vmem:[#allocation8 + $0x1e0] sm:$0xff] }
  0xd0   : > { %3158 = vmatprep.mubr.f32.mxu0 %v368_v32  ;;  %3397 = vmatpush1.bf16.msra.mxu0 %v3396_v31  ;;  %v1220_v31 = vld [vmem:[#allocation8 + $0x1e8] sm:$0xff]  ;;  %v1221_v32 = vld [vmem:[#allocation8 + $0x1f0] sm:$0xff] }
  0xd1   : > { %3398 = vmatprep.subr.bf16.mxu0 %v4210_v0  ;;  %3636 = vmatprep.subr.bf16.mxu1 %v4210_v0 }
  0xd3   : > { %3159 = vmatmul.mubr.f32.gmra.mrb[20].mxu0 %v369_v36 }
  0xd4   : > { %3161 = vmatprep.mubr.f32.mxu0 %v370_v38  ;;  %3400 = vmatpush1.bf16.msra.mxu0 %v3399_v37 }
  0xd5   : > { %3401 = vmatprep.subr.bf16.mxu0 %v4210_v0 }
  0xd7   : > { %3162 = vmatmul.mubr.f32.gmra.mrb[22].mxu0 %v371_v41 }
  0xd8   : > { %3164 = vmatprep.mubr.f32.mxu0 %v372_v43  ;;  %3403 = vmatpush1.bf16.msra.mxu0 %v3402_v42 }
  0xd9   : > { %3404 = vmatprep.subr.bf16.mxu0 %v4210_v0 }
  0xdb   : > { %3165 = vmatmul.mubr.f32.gmra.mrb[24].mxu0 %v373_v47 }
  0xdc   : > { %3167 = vmatprep.mubr.f32.mxu0 %v374_v49  ;;  %3406 = vmatpush1.bf16.msra.mxu0 %v3405_v48 }
  0xdd   : > { %3407 = vmatprep.subr.bf16.mxu0 %v4210_v0 }
  0xdf   : > { %3168 = vmatmul.mubr.f32.gmra.mrb[26].mxu0 %v375_v53 }
  0xe0   : > { %3170 = vmatprep.mubr.f32.mxu0 %v376_v55  ;;  %3409 = vmatpush1.bf16.msra.mxu0 %v3408_v54 }
  0xe1   : > { %3410 = vmatprep.subr.bf16.mxu0 %v4210_v0 }
  0xe3   : > { %3171 = vmatmul.mubr.f32.gmra.mrb[28].mxu0 %v377_v56 }
  0xe4   : > { %3173 = vmatprep.mubr.f32.mxu0 %v378_v57  ;;  %3412 = vmatpush1.bf16.msra.mxu0 %v3411_v5 }
  0xe5   : > { %3413 = vmatprep.subr.bf16.mxu0 %v4210_v0 }
  0xe7   : > { %3174 = vmatmul.mubr.f32.gmra.mrb[30].mxu0 %v379_v58 }
  0xe8   : > { %3415 = vmatpush1.bf16.msra.mxu0 %v3414_v12  ;;  %1374 = vmatprep.mubr.f32.mxu0 %v902_v15 }
  0xe9   : > { %3416 = vmatprep.subr.bf16.mxu0 %v4210_v0 }
  0xeb   : > { %1375 = vmatmul.mubr.f32.vlgmr.msra.gmra.mrb[32].mxu0 %v4211_v6 }
  0xec   : > { %3418 = vmatpush1.bf16.msra.mxu0 %v4482_v27  ;;  %1379 = vmatprep.mubr.f32.mxu0 %v903_v19  ;;  %v1215_v27 = vld [vmem:[#allocation8 + $0x1c0] sm:$0xff] }
  0xed   : > { %3419 = vmatprep.subr.bf16.mxu0 %v4210_v0  ;;  %v3453_v25 = vpack.c.bf16 %v1216_v24, %v1215_v27 }
  0xef   : > { %1380 = vmatmul.mubr.f32.gmra.mrb[34].mxu0 %v4211_v6  ;;  %3652 = vmatpush1.bf16.msra.mxu1 %v3453_v25 }
  0xf0   : > { %3421 = vmatpush1.bf16.msra.mxu0 %v4485_v30  ;;  %3637 = vmatprep.subr.bf16.mxu1 %v4210_v0  ;;  %v3456_v30 = vpack.c.bf16 %v1218_v28, %v1217_v26 }
  0xf1   : > { %3422 = vmatprep.subr.bf16.mxu0 %v4210_v0 }
  0xf3   : > { %3653 = vmatpush1.bf16.msra.mxu1 %v3456_v30 }
  0xf4   : > { %3424 = vmatpush1.bf16.msra.mxu0 %v4489_v34  ;;  %3638 = vmatprep.subr.bf16.mxu1 %v4210_v0  ;;  %v3459_v34 = vpack.c.bf16 %v1220_v31, %v1219_v29 }
  0xf5   : > { %3425 = vmatprep.subr.bf16.mxu0 %v4210_v0 }
  0xf7   : > { %3654 = vmatpush1.bf16.msra.mxu1 %v3459_v34 }
  0xf8   : > { %3427 = vmatpush1.bf16.msra.mxu0 %v4497_v44  ;;  %3639 = vmatprep.subr.bf16.mxu1 %v4210_v0  ;;  %v3462_v44 = vpack.c.bf16 %v1222_v33, %v1221_v32 }
  0xf9   : > { %3428 = vmatprep.subr.bf16.mxu0 %v4210_v0 }
  0xfb   : > { %3655 = vmatpush1.bf16.msra.mxu1 %v3462_v44 }
  0xfc   : > { %3430 = vmatpush1.bf16.msra.mxu0 %v4503_v52  ;;  %3464 = vmatprep.subr.bf16.mxu1 %v4210_v0  ;;  %v4596_v52 = vld [vmem:[%s5601_s2] ss:$0 sm:$0xff] }
  0xfd   : > { %3431 = vmatprep.subr.bf16.mxu0 %v4210_v0 }
 0x100   : > { %3433 = vmatpush1.bf16.msra.mxu0 %v4510_v60 }
 0x101   : > { %3434 = vmatprep.subr.bf16.mxu0 %v4210_v0 }
 0x104   : > { %3436 = vmatpush1.bf16.msra.mxu0 %v4552_v62 }
 0x105   : > { %3437 = vmatprep.subr.bf16.mxu0 %v4210_v0 }
 0x108   : > { %3439 = vmatpush1.bf16.msra.mxu0 %v4556_v4 }
 0x109   : > { %3440 = vmatprep.subr.bf16.mxu0 %v4210_v0 }
 0x10c   : > { %3442 = vmatpush1.bf16.msra.mxu0 %v3441_v11 }
 0x10d   : > { %3443 = vmatprep.subr.bf16.mxu0 %v4210_v0 }
 0x110   : > { %3445 = vmatpush1.bf16.msra.mxu0 %v3444_v16 }
 0x111   : > { %3446 = vmatprep.subr.bf16.mxu0 %v4210_v0 }
 0x114   : > { %3448 = vmatpush1.bf16.msra.mxu0 %v3447_v20 }
 0x115   : > { %3449 = vmatprep.subr.bf16.mxu0 %v4210_v0 }
 0x118   : > { %3451 = vmatpush1.bf16.msra.mxu0 %v3450_v23 }
 0x119   : > { %3452 = vmatprep.subr.bf16.mxu0 %v4210_v0 }
 0x11c   : > { %3454 = vmatpush1.bf16.msra.mxu0 %v3453_v25 }
 0x11d   : > { %3455 = vmatprep.subr.bf16.mxu0 %v4210_v0 }
 0x120   : > { %3457 = vmatpush1.bf16.msra.mxu0 %v3456_v30 }
 0x121   : > { %3458 = vmatprep.subr.bf16.mxu0 %v4210_v0 }
 0x124   : > { %3460 = vmatpush1.bf16.msra.mxu0 %v3459_v34 }
 0x125   : > { %3461 = vmatprep.subr.bf16.mxu0 %v4210_v0 }
 0x128   : > { %3463 = vmatpush1.bf16.msra.mxu0 %v3462_v44 }
 0x17e   : > { %v3130_v60 = vpop.f32.mrb[0].mxu0 }
 0x17f   : > { %v475_v35 = vadd.f32 %v3130_v60, %v4596_v52  ;;  %v469_v36 = vpop.f32.mrb[1].mxu0 }
 0x180   : > { %v470_v37 = vadd.f32 %v4596_v52, %v469_v36 }
 0x181   : > { %v629_v38 = vmax.f32 %v475_v35, 0.0 }
 0x182   : > { %v628_v39 = vmax.f32 %v470_v37, 0.0  ;;  %v3133_v40 = vpop.f32.mrb[2].mxu0 }
 0x183   : > { %v694_v41 = vrot.slane %v629_v38, 7  ;;  %v485_v42 = vadd.f32 %v3133_v40, %v4596_v52  ;;  %v479_v43 = vpop.f32.mrb[3].mxu0 }
 0x184   : > { %v693_v45 = vrot.slane %v628_v39, 7  ;;  %v480_v46 = vadd.f32 %v4596_v52, %v479_v43 }
 0x185   : > { %v805_v47 = vsel %vm692_vm0, %v694_v41, 0.0  ;;  %v631_v48 = vmax.f32 %v485_v42, 0.0 }
 0x186   : > { %824 = vst [vmem:[#allocation2 + $0x28] sm:$0x3] %v805_v47  ;;  %v695_v49 = vsel %vm692_vm0, %v693_v45, %v694_v41  ;;  %v789_v50 = vsel %vm692_vm0, 0.0, %v693_v45  ;;  %v630_v51 = vmax.f32 %v480_v46, 0.0  ;;  %v3136_v53 = vpop.f32.mrb[4].mxu0  ;;  %v1287_v41 = vld [vmem:[#allocation8 + $0x400] sm:$0xff] }
 0x187   : > { %822 = vst [vmem:[#allocation2 + $0x18] sm:$0xff] %v789_v50  ;;  %823 = vst [vmem:[#allocation2 + $0x20] sm:$0xff] %v695_v49  ;;  %v697_v54 = vrot.slane %v631_v48, 7  ;;  %v495_v55 = vadd.f32 %v3136_v53, %v4596_v52  ;;  %v489_v56 = vpop.f32.mrb[5].mxu0  ;;  %v1288_v46 = vld [vmem:[#allocation8 + $0x408] sm:$0xff] }
 0x188   : > { %v4606_v57 = vrot.slane %v630_v51, 7  ;;  %v490_v58 = vadd.f32 %v4596_v52, %v489_v56 }
 0x189   : > { %v806_v59 = vsel %vm692_vm0, %v697_v54, 0.0  ;;  %v633_v61 = vmax.f32 %v495_v55, 0.0 }
 0x18a   : > { %827 = vst [vmem:[#allocation2 + $0x40] sm:$0x3] %v806_v59  ;;  %v4612_v62 = vsel %vm692_vm0, %v4606_v57, %v697_v54  ;;  %v790_v63 = vsel %vm692_vm0, 0.0, %v4606_v57  ;;  %v632_v1 = vmax.f32 %v490_v58, 0.0  ;;  %v3139_v2 = vpop.f32.mrb[6].mxu0 }
 0x18b   : > { %825 = vst [vmem:[#allocation2 + $0x30] sm:$0xff] %v790_v63  ;;  %826 = vst [vmem:[#allocation2 + $0x38] sm:$0xff] %v4612_v62  ;;  %v700_v3 = vrot.slane %v633_v61, 7  ;;  %v505_v4 = vadd.f32 %v3139_v2, %v4596_v52  ;;  %v499_v5 = vpop.f32.mrb[7].mxu0  ;;  %v1223_v2 = vld [vmem:[#allocation8 + $0x200] sm:$0xff] }
 0x18c   : > { %v4618_v6 = vrot.slane %v632_v1, 7  ;;  %v500_v7 = vadd.f32 %v4596_v52, %v499_v5 }
 0x18d   : > { %v807_v8 = vsel %vm692_vm0, %v700_v3, 0.0  ;;  %v635_v9 = vmax.f32 %v505_v4, 0.0 }
 0x18e   : > { %830 = vst [vmem:[#allocation2 + $0x58] sm:$0x3] %v807_v8  ;;  %v4624_v10 = vsel %vm692_vm0, %v4618_v6, %v700_v3  ;;  %v791_v11 = vsel %vm692_vm0, 0.0, %v4618_v6  ;;  %v634_v12 = vmax.f32 %v500_v7, 0.0  ;;  %v3142_v13 = vpop.f32.mrb[8].mxu0  ;;  %v4628_v14 = vld [vmem:[#allocation2 + $0x19] sm:$0xff] }
 0x18f   : > { %828 = vst [vmem:[#allocation2 + $0x48] sm:$0xff] %v791_v11  ;;  %829 = vst [vmem:[#allocation2 + $0x50] sm:$0xff] %v4624_v10  ;;  %v703_v15 = vrot.slane %v635_v9, 7  ;;  %v515_v16 = vadd.f32 %v3142_v13, %v4596_v52  ;;  %v509_v17 = vpop.f32.mrb[9].mxu0  ;;  %1384 = vmatprep.mubr.f32.mxu0 %v4628_v14  ;;  %v4643_v21 = vld [vmem:[#allocation2 + $0x21] sm:$0xff]  ;;  %v1224_v3 = vld [vmem:[#allocation8 + $0x208] sm:$0xff] }
 0x190   : > { %v4633_v18 = vrot.slane %v634_v12, 7  ;;  %v510_v19 = vadd.f32 %v4596_v52, %v509_v17  ;;  %3965 = vmatmul.mubr.msk.f32.gmra.mrb[36].mxu0 %vm4637_vm1, %v693_v45  ;;  %v966_v20 = vld [vmem:[#allocation2 + $0x18] sm:$0xff] }
 0x191   : > { %v808_v22 = vsel %vm692_vm0, %v703_v15, 0.0  ;;  %v637_v23 = vmax.f32 %v515_v16, 0.0  ;;  %1389 = vmatprep.mubr.f32.mxu0 %v4643_v21  ;;  %v3465_v16 = vpack.c.bf16 %v1224_v3, %v1223_v2 }
 0x192   : > { %833 = vst [vmem:[#allocation2 + $0x70] sm:$0x3] %v808_v22  ;;  %v4649_v27 = vsel %vm692_vm0, %v4633_v18, %v703_v15  ;;  %v792_v24 = vsel %vm692_vm0, 0.0, %v4633_v18  ;;  %v636_v25 = vmax.f32 %v510_v19, 0.0  ;;  %v3145_v26 = vpop.f32.mrb[10].mxu0  ;;  %v4658_v32 = vld [vmem:[#allocation2 + $0x31] sm:$0xff] }
 0x193   : > { %831 = vst [vmem:[#allocation2 + $0x60] sm:$0xff] %v792_v24  ;;  %832 = vst [vmem:[#allocation2 + $0x68] sm:$0xff] %v4649_v27  ;;  %v706_v28 = vrot.slane %v637_v23, 7  ;;  %v525_v30 = vadd.f32 %v3145_v26, %v4596_v52  ;;  %v519_v29 = vpop.f32.mrb[11].mxu0  ;;  %v4676_v45 = vld [vmem:[#allocation2 + $0x39] sm:$0xff]  ;;  %v1226_v23 = vld [vmem:[#allocation8 + $0x218] sm:$0xff] }
 0x194   : > { %v4655_v31 = vrot.slane %v636_v25, 7  ;;  %v520_v34 = vadd.f32 %v4596_v52, %v519_v29  ;;  %1390 = vmatmul.mubr.f32.gmra.mrb[38].mxu0 %v695_v49  ;;  %v4680_v49 = vpack.c.bf16 %v1288_v46, %v1287_v41  ;;  %v1225_v22 = vld [vmem:[#allocation8 + $0x210] sm:$0xff]  ;;  %v1228_v46 = vld [vmem:[#allocation8 + $0x228] sm:$0xff] }
 0x195   : > { %v809_v33 = vsel %vm692_vm0, %v706_v28, 0.0  ;;  %v639_v44 = vmax.f32 %v525_v30, 0.0  ;;  %1394 = vmatprep.mubr.f32.mxu0 %v4658_v32 }
 0x196   : > { %836 = vst [vmem:[#allocation2 + $0x88] sm:$0x3] %v809_v33  ;;  %v4664_v60 = vsel %vm692_vm0, %v4655_v31, %v706_v28  ;;  %v793_v35 = vsel %vm692_vm0, 0.0, %v4655_v31  ;;  %v638_v36 = vmax.f32 %v520_v34, 0.0  ;;  %v3148_v37 = vpop.f32.mrb[12].mxu0  ;;  %3561 = vmatprep.subr.bf16.mxu0 %v4680_v49  ;;  %v4694_v59 = vld [vmem:[#allocation2 + $0x49] sm:$0xff] }
 0x197   : > { %834 = vst [vmem:[#allocation2 + $0x78] sm:$0xff] %v793_v35  ;;  %835 = vst [vmem:[#allocation2 + $0x80] sm:$0xff] %v4664_v60  ;;  %v709_v38 = vrot.slane %v639_v44, 7  ;;  %v535_v39 = vadd.f32 %v3148_v37, %v4596_v52  ;;  %v529_v40 = vpop.f32.mrb[13].mxu0  ;;  %v4715_v13 = vld [vmem:[#allocation2 + $0x51] sm:$0xff]  ;;  %v3468_v35 = vpack.c.bf16 %v1226_v23, %v1225_v22 }
 0x198   : > { %v4670_v42 = vrot.slane %v638_v36, 7  ;;  %v530_v43 = vadd.f32 %v4596_v52, %v529_v40  ;;  %3967 = vmatmul.mubr.msk.f32.gmra.mrb[40].mxu0 %vm4637_vm1, %v4606_v57 }
 0x199   : > { %v810_v47 = vsel %vm692_vm0, %v709_v38, 0.0  ;;  %v641_v48 = vmax.f32 %v535_v39, 0.0  ;;  %1399 = vmatprep.mubr.f32.mxu0 %v4676_v45 }
 0x19a   : > { %839 = vst [vmem:[#allocation2 + $0xa0] sm:$0x3] %v810_v47  ;;  %v4684_v50 = vsel %vm692_vm0, %v4670_v42, %v709_v38  ;;  %v794_v51 = vsel %vm692_vm0, 0.0, %v4670_v42  ;;  %v640_v53 = vmax.f32 %v530_v43, 0.0  ;;  %v3151_v54 = vpop.f32.mrb[14].mxu0  ;;  %v4732_v33 = vld [vmem:[#allocation2 + $0x61] sm:$0xff] }
 0x19b   : > { %837 = vst [vmem:[#allocation2 + $0x90] sm:$0xff] %v794_v51  ;;  %838 = vst [vmem:[#allocation2 + $0x98] sm:$0xff] %v4684_v50  ;;  %v712_v55 = vrot.slane %v641_v48, 7  ;;  %v545_v56 = vadd.f32 %v3151_v54, %v4596_v52  ;;  %v539_v57 = vpop.f32.mrb[15].mxu0  ;;  %v1227_v43 = vld [vmem:[#allocation8 + $0x220] sm:$0xff] }
 0x19c   : > { %v4691_v58 = vrot.slane %v640_v53, 7  ;;  %1400 = vmatmul.mubr.f32.gmra.mrb[42].mxu0 %v4612_v62  ;;  %v540_v61 = vadd.f32 %v4596_v52, %v539_v57  ;;  %v4755_v54 = vld [vmem:[#allocation2 + $0x69] sm:$0xff] }
 0x19d   : > { %v811_v63 = vsel %vm692_vm0, %v712_v55, 0.0  ;;  %v643_v1 = vmax.f32 %v545_v56, 0.0  ;;  %1404 = vmatprep.mubr.f32.mxu0 %v4694_v59 }
 0x19e   : > { %842 = vst [vmem:[#allocation2 + $0xb8] sm:$0x3] %v811_v63  ;;  %v4701_v4 = vsel %vm692_vm0, %v4691_v58, %v712_v55  ;;  %v795_v5 = vsel %vm692_vm0, 0.0, %v4691_v58  ;;  %v642_v62 = vmax.f32 %v540_v61, 0.0  ;;  %v3154_v7 = vpop.f32.mrb[16].mxu0  ;;  %3969 = vmatprep.mubr.msk.f32.mxu1 %vm4637_vm1, %v4691_v58  ;;  %v3471_v61 = vpack.c.bf16 %v1228_v46, %v1227_v43 }
 0x19f   : > { %840 = vst [vmem:[#allocation2 + $0xa8] sm:$0xff] %v795_v5  ;;  %841 = vst [vmem:[#allocation2 + $0xb0] sm:$0xff] %v4701_v4  ;;  %v715_v8 = vrot.slane %v643_v1, 7  ;;  %v555_v9 = vadd.f32 %v3154_v7, %v4596_v52  ;;  %v549_v11 = vpop.f32.mrb[17].mxu0  ;;  %v1229_v5 = vld [vmem:[#allocation8 + $0x230] sm:$0xff] }
 0x1a0   : > { %v4710_v12 = vrot.slane %v642_v62, 7  ;;  %3971 = vmatmul.mubr.msk.f32.gmra.mrb[44].mxu0 %vm4637_vm1, %v4618_v6  ;;  %v550_v15 = vadd.f32 %v4596_v52, %v549_v11  ;;  %v1230_v62 = vld [vmem:[#allocation8 + $0x238] sm:$0xff] }
 0x1a1   : > { %v812_v17 = vsel %vm692_vm0, %v715_v8, 0.0  ;;  %1409 = vmatprep.mubr.f32.mxu0 %v4715_v13  ;;  %v645_v19 = vmax.f32 %v555_v9, 0.0  ;;  %v3474_v22 = vpack.c.bf16 %v1230_v62, %v1229_v5 }
 0x1a2   : > { %845 = vst [vmem:[#allocation2 + $0xd0] sm:$0x3] %v812_v17  ;;  %v4722_v24 = vsel %vm692_vm0, %v4710_v12, %v715_v8  ;;  %v796_v6 = vsel %vm692_vm0, 0.0, %v4710_v12  ;;  %v644_v25 = vmax.f32 %v550_v15, 0.0  ;;  %v4726_v26 = vld [vmem:[#allocation2 + $0x92] sm:$0xff]  ;;  %v3157_v28 = vpop.f32.mrb[18].mxu0 }
 0x1a3   : > { %843 = vst [vmem:[#allocation2 + $0xc0] sm:$0xff] %v796_v6  ;;  %844 = vst [vmem:[#allocation2 + $0xc8] sm:$0xff] %v4722_v24  ;;  %v718_v30 = vrot.slane %v645_v19, 7  ;;  %1660 = vmatmul.mubr.f32.vlgmr.msra.gmra.mrb[0].mxu1 %v4726_v26  ;;  %v565_v29 = vadd.f32 %v3157_v28, %v4596_v52  ;;  %v559_v34 = vpop.f32.mrb[19].mxu0  ;;  %v4746_v40 = vld [vmem:[#allocation2 + $0x9a] sm:$0xff]  ;;  %v1231_v28 = vld [vmem:[#allocation8 + $0x240] sm:$0xff] }
 0x1a4   : > { %1410 = vmatmul.mubr.f32.gmra.mrb[46].mxu0 %v4624_v10  ;;  %v4734_v44 = vrot.slane %v644_v25, 7  ;;  %3466 = vmatpush1.bf16.msra.mxu1 %v3465_v16  ;;  %v560_v36 = vadd.f32 %v4596_v52, %v559_v34  ;;  %v4778_v15 = vld [vmem:[#allocation2 + $0x79] sm:$0xff]  ;;  %v4824_v5 = vld [vmem:[#allocation2 + $0x91] sm:$0xff] }
 0x1a5   : > { %v813_v37 = vsel %vm692_vm0, %v718_v30, 0.0  ;;  %1414 = vmatprep.mubr.f32.mxu0 %v4732_v33  ;;  %1664 = vmatprep.mubr.f32.mxu1 %v4701_v4  ;;  %v647_v38 = vmax.f32 %v565_v29, 0.0 }
 0x1a6   : > { %848 = vst [vmem:[#allocation2 + $0xe8] sm:$0x3] %v813_v37  ;;  %v4742_v39 = vsel %vm692_vm0, %v4734_v44, %v718_v30  ;;  %v797_v10 = vsel %vm692_vm0, 0.0, %v4734_v44  ;;  %3467 = vmatprep.subr.bf16.mxu1 %v4210_v0  ;;  %v646_v41 = vmax.f32 %v560_v36, 0.0  ;;  %v3160_v47 = vpop.f32.mrb[20].mxu0  ;;  %v4771_v2 = vld [vmem:[#allocation2 + $0xaa] sm:$0xff] }
 0x1a7   : > { %846 = vst [vmem:[#allocation2 + $0xd8] sm:$0xff] %v797_v10  ;;  %847 = vst [vmem:[#allocation2 + $0xe0] sm:$0xff] %v4742_v39  ;;  %1665 = vmatmul.mubr.f32.gmra.mrb[2].mxu1 %v4746_v40  ;;  %v721_v48 = vrot.slane %v647_v38, 7  ;;  %v575_v51 = vadd.f32 %v3160_v47, %v4596_v52  ;;  %v569_v53 = vpop.f32.mrb[21].mxu0  ;;  %v4786_v6 = vld [vmem:[#allocation2 + $0xb2] sm:$0xff]  ;;  %v4801_v38 = vld [vmem:[#allocation2 + $0x81] sm:$0xff] }
 0x1a8   : > { %3973 = vmatmul.mubr.msk.f32.gmra.mrb[48].mxu0 %vm4637_vm1, %v4633_v18  ;;  %3469 = vmatpush1.bf16.msra.mxu1 %v3468_v35  ;;  %v4757_v55 = vrot.slane %v646_v41, 7  ;;  %v570_v56 = vadd.f32 %v4596_v52, %v569_v53  ;;  %v1232_v30 = vld [vmem:[#allocation8 + $0x248] sm:$0xff]  ;;  %v1233_v53 = vld [vmem:[#allocation8 + $0x250] sm:$0xff] }
 0x1a9   : > { %1419 = vmatprep.mubr.f32.mxu0 %v4755_v54  ;;  %v814_v57 = vsel %vm692_vm0, %v721_v48, 0.0  ;;  %3975 = vmatprep.mubr.msk.f32.mxu1 %vm4637_vm1, %v4710_v12  ;;  %v649_v63 = vmax.f32 %v575_v51, 0.0  ;;  %v3477_v43 = vpack.c.bf16 %v1232_v30, %v1231_v28 }
 0x1aa   : > { %851 = vst [vmem:[#allocation2 + $0x100] sm:$0x3] %v814_v57  ;;  %v4767_v18 = vsel %vm692_vm0, %v4757_v55, %v721_v48  ;;  %v798_v1 = vsel %vm692_vm0, 0.0, %v4757_v55  ;;  %3470 = vmatprep.subr.bf16.mxu1 %v4210_v0  ;;  %v648_v3 = vmax.f32 %v570_v56, 0.0  ;;  %v3163_v7 = vpop.f32.mrb[22].mxu0  ;;  %v4811_v48 = vld [vmem:[#allocation2 + $0xc2] sm:$0xff] }
 0x1ab   : > { %849 = vst [vmem:[#allocation2 + $0xf0] sm:$0xff] %v798_v1  ;;  %850 = vst [vmem:[#allocation2 + $0xf8] sm:$0xff] %v4767_v18  ;;  %1670 = vmatmul.mubr.f32.gmra.mrb[4].mxu1 %v4771_v2  ;;  %v724_v8 = vrot.slane %v649_v63, 7  ;;  %v585_v9 = vadd.f32 %v3163_v7, %v4596_v52  ;;  %v579_v11 = vpop.f32.mrb[23].mxu0  ;;  %v1234_v56 = vld [vmem:[#allocation8 + $0x258] sm:$0xff] }
 0x1ac   : > { %1420 = vmatmul.mubr.f32.gmra.mrb[50].mxu0 %v4649_v27  ;;  %1674 = vmatprep.mubr.f32.mxu1 %v4722_v24  ;;  %v4781_v16 = vrot.slane %v648_v3, 7  ;;  %v580_v17 = vadd.f32 %v4596_v52, %v579_v11 }
 0x1ad   : > { %1424 = vmatprep.mubr.f32.mxu0 %v4778_v15  ;;  %3472 = vmatpush1.bf16.msra.mxu1 %v3471_v61  ;;  %v815_v19 = vsel %vm692_vm0, %v724_v8, 0.0  ;;  %v651_v23 = vmax.f32 %v585_v9, 0.0 }
 0x1ae   : > { %854 = vst [vmem:[#allocation2 + $0x118] sm:$0x3] %v815_v19  ;;  %v4790_v27 = vsel %vm692_vm0, %v4781_v16, %v724_v8  ;;  %v799_v25 = vsel %vm692_vm0, 0.0, %v4781_v16  ;;  %3473 = vmatprep.subr.bf16.mxu1 %v4210_v0  ;;  %v650_v29 = vmax.f32 %v580_v17, 0.0  ;;  %v3166_v34 = vpop.f32.mrb[24].mxu0  ;;  %v3480_v8 = vpack.c.bf16 %v1234_v56, %v1233_v53  ;;  %v4832_v17 = vld [vmem:[#allocation2 + $0xca] sm:$0xff] }
 0x1af   : > { %1675 = vmatmul.mubr.f32.gmra.mrb[6].mxu1 %v4786_v6  ;;  %852 = vst [vmem:[#allocation2 + $0x108] sm:$0xff] %v799_v25  ;;  %853 = vst [vmem:[#allocation2 + $0x110] sm:$0xff] %v4790_v27  ;;  %v727_v35 = vrot.slane %v651_v23, 7  ;;  %v595_v36 = vadd.f32 %v3166_v34, %v4596_v52  ;;  %v589_v37 = vpop.f32.mrb[25].mxu0  ;;  %v1236_v23 = vld [vmem:[#allocation8 + $0x268] sm:$0xff] }
 0x1b0   : > { %3977 = vmatmul.mubr.msk.f32.gmra.mrb[52].mxu0 %vm4637_vm1, %v4655_v31  ;;  %3979 = vmatprep.mubr.msk.f32.mxu1 %vm4637_vm1, %v4734_v44  ;;  %v4806_v10 = vrot.slane %v650_v29, 7  ;;  %v590_v41 = vadd.f32 %v4596_v52, %v589_v37 }
 0x1b1   : > { %1429 = vmatprep.mubr.f32.mxu0 %v4801_v38  ;;  %3475 = vmatpush1.bf16.msra.mxu1 %v3474_v22  ;;  %v816_v46 = vsel %vm692_vm0, %v727_v35, 0.0  ;;  %v653_v47 = vmax.f32 %v595_v36, 0.0  ;;  %v1235_v22 = vld [vmem:[#allocation8 + $0x260] sm:$0xff] }
 0x1b2   : > { %3476 = vmatprep.subr.bf16.mxu1 %v4210_v0  ;;  %857 = vst [vmem:[#allocation2 + $0x130] sm:$0x3] %v816_v46  ;;  %v4816_v31 = vsel %vm692_vm0, %v4806_v10, %v727_v35  ;;  %v800_v51 = vsel %vm692_vm0, 0.0, %v4806_v10  ;;  %v652_v57 = vmax.f32 %v590_v41, 0.0  ;;  %v3169_v61 = vpop.f32.mrb[26].mxu0  ;;  %v4847_v35 = vld [vmem:[#allocation2 + $0x99] sm:$0xff]  ;;  %v3483_v41 = vpack.c.bf16 %v1236_v23, %v1235_v22 }
 0x1b3   : > { %1680 = vmatmul.mubr.f32.gmra.mrb[8].mxu1 %v4811_v48  ;;  %855 = vst [vmem:[#allocation2 + $0x120] sm:$0xff] %v800_v51  ;;  %856 = vst [vmem:[#allocation2 + $0x128] sm:$0xff] %v4816_v31  ;;  %v730_v63 = vrot.slane %v653_v47, 7  ;;  %v605_v1 = vadd.f32 %v3169_v61, %v4596_v52  ;;  %v599_v3 = vpop.f32.mrb[27].mxu0  ;;  %v4857_v47 = vld [vmem:[#allocation2 + $0xda] sm:$0xff]  ;;  %v1238_v51 = vld [vmem:[#allocation8 + $0x278] sm:$0xff] }
 0x1b4   : > { %1430 = vmatmul.mubr.f32.gmra.mrb[54].mxu0 %v4664_v60  ;;  %1684 = vmatprep.mubr.f32.mxu1 %v4742_v39  ;;  %v4827_v62 = vrot.slane %v652_v57, 7  ;;  %v600_v7 = vadd.f32 %v4596_v52, %v599_v3  ;;  %v4878_v23 = vld [vmem:[#allocation2 + $0xe2] sm:$0xff] }
 0x1b5   : > { %1434 = vmatprep.mubr.f32.mxu0 %v4824_v5  ;;  %3478 = vmatpush1.bf16.msra.mxu1 %v3477_v43  ;;  %v817_v9 = vsel %vm692_vm0, %v730_v63, 0.0  ;;  %v655_v11 = vmax.f32 %v605_v1, 0.0 }
 0x1b6   : > { %3479 = vmatprep.subr.bf16.mxu1 %v4210_v0  ;;  %860 = vst [vmem:[#allocation2 + $0x148] sm:$0x3] %v817_v9  ;;  %v4837_v60 = vsel %vm692_vm0, %v4827_v62, %v730_v63  ;;  %v801_v19 = vsel %vm692_vm0, 0.0, %v4827_v62  ;;  %v654_v25 = vmax.f32 %v600_v7, 0.0  ;;  %v3172_v28 = vpop.f32.mrb[28].mxu0  ;;  %v4870_v7 = vld [vmem:[#allocation2 + $0xa9] sm:$0xff] }
 0x1b7   : > { %1685 = vmatmul.mubr.f32.gmra.mrb[10].mxu1 %v4832_v17  ;;  %858 = vst [vmem:[#allocation2 + $0x138] sm:$0xff] %v801_v19  ;;  %859 = vst [vmem:[#allocation2 + $0x140] sm:$0xff] %v4837_v60  ;;  %v733_v30 = vrot.slane %v655_v11, 7  ;;  %v615_v29 = vadd.f32 %v3172_v28, %v4596_v52  ;;  %v609_v34 = vpop.f32.mrb[29].mxu0 }
 0x1b8   : > { %3981 = vmatmul.mubr.msk.f32.gmra.mrb[56].mxu0 %vm4637_vm1, %v4670_v42  ;;  %3983 = vmatprep.mubr.msk.f32.mxu1 %vm4637_vm1, %v4757_v55  ;;  %v4852_v36 = vrot.slane %v654_v25, 7  ;;  %v610_v37 = vadd.f32 %v4596_v52, %v609_v34  ;;  %v1237_v42 = vld [vmem:[#allocation8 + $0x270] sm:$0xff]  ;;  %v1240_v25 = vld [vmem:[#allocation8 + $0x288] sm:$0xff] }
 0x1b9   : > { %1439 = vmatprep.mubr.f32.mxu0 %v4847_v35  ;;  %3481 = vmatpush1.bf16.msra.mxu1 %v3480_v8  ;;  %v818_v43 = vsel %vm692_vm0, %v733_v30, 0.0  ;;  %v657_v46 = vmax.f32 %v615_v29, 0.0  ;;  %v3486_v11 = vpack.c.bf16 %v1238_v51, %v1237_v42  ;;  %v4892_v34 = vld [vmem:[#allocation2 + $0xb1] sm:$0xff]  ;;  %v1241_v42 = vld [vmem:[#allocation8 + $0x290] sm:$0xff] }
 0x1ba   : > { %3482 = vmatprep.subr.bf16.mxu1 %v4210_v0  ;;  %863 = vst [vmem:[#allocation2 + $0x160] sm:$0x3] %v818_v43  ;;  %v4862_v53 = vsel %vm692_vm0, %v4852_v36, %v733_v30  ;;  %v802_v56 = vsel %vm692_vm0, 0.0, %v4852_v36  ;;  %v656_v57 = vmax.f32 %v610_v37, 0.0  ;;  %v3175_v61 = vpop.f32.mrb[30].mxu0 }
 0x1bb   : > { %1690 = vmatmul.mubr.f32.gmra.mrb[12].mxu1 %v4857_v47  ;;  %861 = vst [vmem:[#allocation2 + $0x150] sm:$0xff] %v802_v56  ;;  %862 = vst [vmem:[#allocation2 + $0x158] sm:$0xff] %v4862_v53  ;;  %v736_v63 = vrot.slane %v657_v46, 7  ;;  %v625_v1 = vadd.f32 %v3175_v61, %v4596_v52  ;;  %v619_v3 = vpop.f32.mrb[31].mxu0  ;;  %v4901_v46 = vld [vmem:[#allocation2 + $0xf2] sm:$0xff] }
 0x1bc   : > { %1440 = vmatmul.mubr.f32.gmra.mrb[58].mxu0 %v4684_v50  ;;  %1694 = vmatprep.mubr.f32.mxu1 %v4767_v18  ;;  %v4873_v8 = vrot.slane %v656_v57, 7  ;;  %v620_v9 = vadd.f32 %v4596_v52, %v619_v3  ;;  %v1239_v50 = vld [vmem:[#allocation8 + $0x280] sm:$0xff]  ;;  %v4913_v57 = vld [vmem:[#allocation2 + $0xc1] sm:$0xff]  ;;  %v1244_v3 = vld [vmem:[#allocation8 + $0x2a8] sm:$0xff] }
 0x1bd   : > { %1444 = vmatprep.mubr.f32.mxu0 %v4870_v7  ;;  %3484 = vmatpush1.bf16.msra.mxu1 %v3483_v41  ;;  %v819_v19 = vsel %vm692_vm0, %v736_v63, 0.0  ;;  %v659_v22 = vmax.f32 %v625_v1, 0.0  ;;  %v3489_v41 = vpack.c.bf16 %v1240_v25, %v1239_v50  ;;  %v1243_v1 = vld [vmem:[#allocation8 + $0x2a0] sm:$0xff] }
 0x1be   : > { %3485 = vmatprep.subr.bf16.mxu1 %v4210_v0  ;;  %866 = vst [vmem:[#allocation2 + $0x178] sm:$0x3] %v819_v19  ;;  %v4883_v28 = vsel %vm692_vm0, %v4873_v8, %v736_v63  ;;  %v803_v52 = vsel %vm692_vm0, 0.0, %v4873_v8  ;;  %v658_v30 = vmax.f32 %v620_v9, 0.0  ;;  %v4917_v63 = vld [vmem:[#allocation2 + $0xfa] sm:$0xff]  ;;  %v3495_v9 = vpack.c.bf16 %v1244_v3, %v1243_v1  ;;  %v4939_v25 = vld [vmem:[#allocation2 + $0x112] sm:$0xff] }
 0x1bf   : > { %1695 = vmatmul.mubr.f32.gmra.mrb[14].mxu1 %v4878_v23  ;;  %864 = vst [vmem:[#allocation2 + $0x168] sm:$0xff] %v803_v52  ;;  %865 = vst [vmem:[#allocation2 + $0x170] sm:$0xff] %v4883_v28  ;;  %v739_v29 = vrot.slane %v659_v22, 7  ;;  %v1245_v19 = vld [vmem:[#allocation8 + $0x2b0] sm:$0xff]  ;;  %v1246_v22 = vld [vmem:[#allocation8 + $0x2b8] sm:$0xff] }
 0x1c0   : > { %3985 = vmatmul.mubr.msk.f32.gmra.mrb[60].mxu0 %vm4637_vm1, %v4691_v58  ;;  %3987 = vmatprep.mubr.msk.f32.mxu1 %vm4637_vm1, %v4781_v16  ;;  %v4897_v37 = vrot.slane %v658_v30, 7  ;;  %v1242_v58 = vld [vmem:[#allocation8 + $0x298] sm:$0xff]  ;;  %v3498_v50 = vpack.c.bf16 %v1246_v22, %v1245_v19  ;;  %v1247_v52 = vld [vmem:[#allocation8 + $0x2c0] sm:$0xff]  ;;  %v1248_v30 = vld [vmem:[#allocation8 + $0x2c8] sm:$0xff] }
 0x1c1   : > { %1449 = vmatprep.mubr.f32.mxu0 %v4892_v34  ;;  %3487 = vmatpush1.bf16.msra.mxu1 %v3486_v11  ;;  %v820_v43 = vsel %vm692_vm0, %v739_v29, 0.0  ;;  %v3492_v61 = vpack.c.bf16 %v1242_v58, %v1241_v42  ;;  %v4930_v11 = vld [vmem:[#allocation2 + $0x10a] sm:$0xff]  ;;  %v1252_v1 = vld [vmem:[#allocation8 + $0x2e8] sm:$0xff]  ;;  %v1253_v19 = vld [vmem:[#allocation8 + $0x2f0] sm:$0xff] }
 0x1c2   : > { %3488 = vmatprep.subr.bf16.mxu1 %v4210_v0  ;;  %869 = vst [vmem:[#allocation2 + $0x190] sm:$0x3] %v820_v43  ;;  %v4906_v51 = vsel %vm692_vm0, %v4897_v37, %v739_v29  ;;  %v804_v56 = vsel %vm692_vm0, 0.0, %v4897_v37  ;;  %v3501_v29 = vpack.c.bf16 %v1248_v30, %v1247_v52  ;;  %v1249_v43 = vld [vmem:[#allocation8 + $0x2d0] sm:$0xff]  ;;  %v1250_v42 = vld [vmem:[#allocation8 + $0x2d8] sm:$0xff]  ;;  %v4990_v30 = vld [vmem:[#allocation2 + $0x111] sm:$0xff] }
 0x1c3   : > { %1700 = vmatmul.mubr.f32.gmra.mrb[16].mxu1 %v4901_v46  ;;  %867 = vst [vmem:[#allocation2 + $0x180] sm:$0xff] %v804_v56  ;;  %868 = vst [vmem:[#allocation2 + $0x188] sm:$0xff] %v4906_v51  ;;  %v3504_v58 = vpack.c.bf16 %v1250_v42, %v1249_v43  ;;  %v4961_v56 = vld [vmem:[#allocation2 + $0x12a] sm:$0xff]  ;;  %v4983_v52 = vld [vmem:[#allocation2 + $0x142] sm:$0xff] }
 0x1c4   : > { %1450 = vmatmul.mubr.f32.gmra.mrb[62].mxu0 %v4701_v4  ;;  %1704 = vmatprep.mubr.f32.mxu1 %v4790_v27  ;;  %v4924_v4 = vld [vmem:[#allocation2 + $0xc9] sm:$0xff]  ;;  %v5021_v42 = vld [vmem:[#allocation2 + $0x139] sm:$0xff] }
 0x1c5   : > { %1454 = vmatprep.mubr.f32.mxu0 %v4913_v57  ;;  %3490 = vmatpush1.bf16.msra.mxu1 %v3489_v41  ;;  %v4952_v41 = vld [vmem:[#allocation2 + $0x122] sm:$0xff] }
 0x1c6   : > { %3491 = vmatprep.subr.bf16.mxu1 %v4210_v0  ;;  %v1254_v22 = vld [vmem:[#allocation8 + $0x2f8] sm:$0xff] }
 0x1c7   : > { %1705 = vmatmul.mubr.f32.gmra.mrb[18].mxu1 %v4917_v63  ;;  %v5011_v43 = vld [vmem:[#allocation2 + $0x129] sm:$0xff] }
 0x1c8   : > { %3989 = vmatmul.mubr.msk.f32.gmra.mrb[64].mxu0 %vm4637_vm1, %v4710_v12  ;;  %3991 = vmatprep.mubr.msk.f32.mxu1 %vm4637_vm1, %v4806_v10  ;;  %v4935_v12 = vld [vmem:[#allocation2 + $0xd9] sm:$0xff] }
 0x1c9   : > { %1459 = vmatprep.mubr.f32.mxu0 %v4924_v4  ;;  %3493 = vmatpush1.bf16.msra.mxu1 %v3492_v61  ;;  %v1251_v61 = vld [vmem:[#allocation8 + $0x2e0] sm:$0xff] }
 0x1ca   : > { %3494 = vmatprep.subr.bf16.mxu1 %v4210_v0  ;;  %v3507_v3 = vpack.c.bf16 %v1252_v1, %v1251_v61  ;;  %v5025_v61 = vld [vmem:[#allocation2 + $0x172] sm:$0xff]  ;;  %v5033_v1 = vld [vmem:[#allocation2 + $0x141] sm:$0xff] }
 0x1cb   : > { %1710 = vmatmul.mubr.f32.gmra.mrb[20].mxu1 %v4930_v11  ;;  %5636 = vst [vmem:[#allocation18_spill] sm:$0xff] %v5025_v61 }
 0x1cc   : > { %1460 = vmatmul.mubr.f32.gmra.mrb[66].mxu0 %v4722_v24  ;;  %1714 = vmatprep.mubr.f32.mxu1 %v4816_v31  ;;  %v4946_v24 = vld [vmem:[#allocation2 + $0xe1] sm:$0xff] }
 0x1cd   : > { %1464 = vmatprep.mubr.f32.mxu0 %v4935_v12  ;;  %3496 = vmatpush1.bf16.msra.mxu1 %v3495_v9  ;;  %v4974_v9 = vld [vmem:[#allocation2 + $0x13a] sm:$0xff] }
 0x1ce   : > { %3497 = vmatprep.subr.bf16.mxu1 %v4210_v0 }
 0x1cf   : > { %1715 = vmatmul.mubr.f32.gmra.mrb[22].mxu1 %v4939_v25 }
 0x1d0   : > { %3993 = vmatmul.mubr.msk.f32.gmra.mrb[68].mxu0 %vm4637_vm1, %v4734_v44  ;;  %3995 = vmatprep.mubr.msk.f32.mxu1 %vm4637_vm1, %v4827_v62  ;;  %v4957_v44 = vld [vmem:[#allocation2 + $0xf1] sm:$0xff] }
 0x1d1   : > { %1469 = vmatprep.mubr.f32.mxu0 %v4946_v24  ;;  %3499 = vmatpush1.bf16.msra.mxu1 %v3498_v50  ;;  %v3510_v50 = vpack.c.bf16 %v1254_v22, %v1253_v19  ;;  %v5039_v19 = vld [vmem:[#allocation2 + $0x151] sm:$0xff]  ;;  %v5041_v22 = vld [vmem:[#allocation2 + $0x22] sm:$0xff] }
 0x1d2   : > { %3500 = vmatprep.subr.bf16.mxu1 %v4210_v0 }
 0x1d3   : > { %1720 = vmatmul.mubr.f32.gmra.mrb[24].mxu1 %v4952_v41 }
 0x1d4   : > { %1470 = vmatmul.mubr.f32.gmra.mrb[70].mxu0 %v4742_v39  ;;  %1724 = vmatprep.mubr.f32.mxu1 %v4837_v60  ;;  %v4968_v39 = vld [vmem:[#allocation2 + $0xf9] sm:$0xff] }
 0x1d5   : > { %1474 = vmatprep.mubr.f32.mxu0 %v4957_v44  ;;  %3502 = vmatpush1.bf16.msra.mxu1 %v3501_v29  ;;  %v5001_v29 = vld [vmem:[#allocation2 + $0x121] sm:$0xff] }
 0x1d6   : > { %3503 = vmatprep.subr.bf16.mxu1 %v4210_v0 }
 0x1d7   : > { %1725 = vmatmul.mubr.f32.gmra.mrb[26].mxu1 %v4961_v56 }
 0x1d8   : > { %3997 = vmatmul.mubr.msk.f32.gmra.mrb[72].mxu0 %vm4637_vm1, %v4757_v55  ;;  %3999 = vmatprep.mubr.msk.f32.mxu1 %vm4637_vm1, %v4852_v36  ;;  %v4979_v55 = vld [vmem:[#allocation2 + $0x109] sm:$0xff] }
 0x1d9   : > { %1479 = vmatprep.mubr.f32.mxu0 %v4968_v39  ;;  %3505 = vmatpush1.bf16.msra.mxu1 %v3504_v58  ;;  %v1256_v58 = vld [vmem:[#allocation8 + $0x308] sm:$0xff] }
 0x1da   : > { %3506 = vmatprep.subr.bf16.mxu1 %v4210_v0 }
 0x1db   : > { %1730 = vmatmul.mubr.f32.gmra.mrb[28].mxu1 %v4974_v9 }
 0x1dc   : > { %1480 = vmatmul.mubr.f32.gmra.mrb[74].mxu0 %v4767_v18  ;;  %1734 = vmatprep.mubr.f32.mxu1 %v4862_v53  ;;  %v4996_v18 = vld [vmem:[#allocation2 + $0x152] sm:$0xff] }
 0x1dd   : > { %1484 = vmatprep.mubr.f32.mxu0 %v4979_v55  ;;  %3508 = vmatpush1.bf16.msra.mxu1 %v3507_v3  ;;  %v1258_v3 = vld [vmem:[#allocation8 + $0x318] sm:$0xff] }
 0x1de   : > { %3509 = vmatprep.subr.bf16.mxu1 %v4210_v0 }
 0x1df   : > { %1735 = vmatmul.mubr.f32.gmra.mrb[30].mxu1 %v4983_v52 }
 0x1e0   : > { %4001 = vmatmul.mubr.msk.f32.gmra.mrb[76].mxu0 %vm4637_vm1, %v4781_v16  ;;  %4003 = vmatprep.mubr.msk.f32.mxu1 %vm4637_vm1, %v4873_v8  ;;  %v5005_v16 = vld [vmem:[#allocation2 + $0x15a] sm:$0xff] }
 0x1e1   : > { %1489 = vmatprep.mubr.f32.mxu0 %v4990_v30  ;;  %3511 = vmatpush1.bf16.msra.mxu1 %v3510_v50  ;;  %v1259_v50 = vld [vmem:[#allocation8 + $0x320] sm:$0xff] }
 0x1e2   : > { %3512 = vmatprep.subr.bf16.mxu1 %v4210_v0 }
 0x1e3   : > { %1740 = vmatmul.mubr.f32.gmra.mrb[32].mxu1 %v4996_v18 }
 0x1e4   : > { %1490 = vmatmul.mubr.f32.gmra.mrb[78].mxu0 %v4790_v27  ;;  %1744 = vmatprep.mubr.f32.mxu1 %v4883_v28  ;;  %v5017_v27 = vld [vmem:[#allocation2 + $0x16a] sm:$0xff] }
 0x1e5   : > { %1494 = vmatprep.mubr.f32.mxu0 %v5001_v29  ;;  %5635 = vst [vmem:[#allocation17_spill] sm:$0xff] %v5017_v27 }
 0x1e7   : > { %1745 = vmatmul.mubr.f32.gmra.mrb[34].mxu1 %v5005_v16 }
 0x1e8   : > { %4005 = vmatmul.mubr.msk.f32.gmra.mrb[80].mxu0 %vm4637_vm1, %v4806_v10  ;;  %4007 = vmatprep.mubr.msk.f32.mxu1 %vm4637_vm1, %v4897_v37  ;;  %v1255_v10 = vld [vmem:[#allocation8 + $0x300] sm:$0xff]  ;;  %v5028_v37 = vld [vmem:[#allocation2 + $0x1a] sm:$0xff] }
 0x1e9   : > { %1499 = vmatprep.mubr.f32.mxu0 %v5011_v43 }
 0x1eb   : > { %1750 = vmatmul.mubr.f32.gmra.mrb[36].mxu1 %v5017_v27  ;;  %v1268_v27 = vld [vmem:[#allocation8 + $0x368] sm:$0xff] }
 0x1ec   : > { %1500 = vmatmul.mubr.f32.gmra.mrb[82].mxu0 %v4816_v31  ;;  %1754 = vmatprep.mubr.f32.mxu1 %v4906_v51  ;;  %v3513_v31 = vpack.c.bf16 %v1256_v58, %v1255_v10  ;;  %v1257_v51 = vld [vmem:[#allocation8 + $0x310] sm:$0xff]  ;;  %v1260_v10 = vld [vmem:[#allocation8 + $0x328] sm:$0xff] }
 0x1ed   : > { %1504 = vmatprep.mubr.f32.mxu0 %v5021_v42  ;;  %v5047_v58 = vld [vmem:[#allocation2 + $0x32] sm:$0xff] }
 0x1ef   : > { %1755 = vmatmul.mubr.f32.gmra.mrb[38].mxu1 %v5025_v61  ;;  %v1266_v61 = vld [vmem:[#allocation8 + $0x358] sm:$0xff] }
 0x1f0   : > { %4009 = vmatmul.mubr.msk.f32.gmra.mrb[84].mxu0 %vm4637_vm1, %v4827_v62  ;;  %1824 = vmatprep.mubr.f32.mxu1 %v5028_v37  ;;  %v3516_v62 = vpack.c.bf16 %v1258_v3, %v1257_v51  ;;  %v1262_v51 = vld [vmem:[#allocation8 + $0x338] sm:$0xff] }
 0x1f1   : > { %1509 = vmatprep.mubr.f32.mxu0 %v5033_v1  ;;  %v5061_v3 = vld [vmem:[#allocation2 + $0x169] sm:$0xff] }
 0x1f2   : > { %5638 = vst [vmem:[#allocation20_spill] sm:$0xff] %v5061_v3 }
 0x1f3   : > { %1825 = vmatmul.mubr.f32.vlgmr.msra.gmra.mrb[40].mxu1 %v4628_v14  ;;  %v5052_v14 = vld [vmem:[#allocation2 + $0x159] sm:$0xff] }
 0x1f4   : > { %1510 = vmatmul.mubr.f32.gmra.mrb[86].mxu0 %v4837_v60  ;;  %3514 = vmatpush1.bf16.msra.mxu1 %v3513_v31  ;;  %5637 = vst [vmem:[#allocation19_spill] sm:$0xff] %v5052_v14  ;;  %v3519_v60 = vpack.c.bf16 %v1260_v10, %v1259_v50  ;;  %v1261_v31 = vld [vmem:[#allocation8 + $0x330] sm:$0xff]  ;;  %v1264_v50 = vld [vmem:[#allocation8 + $0x348] sm:$0xff]  ;;  %v5067_v10 = vld [vmem:[#allocation2 + $0x4a] sm:$0xff] }
 0x1f5   : > { %1514 = vmatprep.mubr.f32.mxu0 %v5039_v19  ;;  %1829 = vmatprep.mubr.f32.mxu1 %v5041_v22 }
 0x1f6   : > { %3515 = vmatprep.subr.bf16.mxu1 %v4210_v0 }
 0x1f7   : > { %1830 = vmatmul.mubr.f32.gmra.mrb[42].mxu1 %v4643_v21  ;;  %v5058_v21 = vld [vmem:[#allocation2 + $0x3a] sm:$0xff] }
 0x1f8   : > { %4011 = vmatmul.mubr.msk.f32.gmra.mrb[88].mxu0 %vm4637_vm1, %v4852_v36  ;;  %1834 = vmatprep.mubr.f32.mxu1 %v5047_v58  ;;  %v3522_v36 = vpack.c.bf16 %v1262_v51, %v1261_v31  ;;  %v1289_v31 = vld [vmem:[#allocation8 + $0x410] sm:$0xff] }
 0x1f9   : > { %1519 = vmatprep.mubr.f32.mxu0 %v5052_v14  ;;  %3517 = vmatpush1.bf16.msra.mxu1 %v3516_v62  ;;  %v1263_v62 = vld [vmem:[#allocation8 + $0x340] sm:$0xff]  ;;  %v1265_v51 = vld [vmem:[#allocation8 + $0x350] sm:$0xff] }
 0x1fa   : > { %3518 = vmatprep.subr.bf16.mxu1 %v4210_v0  ;;  %v5092_v14 = vld [vmem:[#allocation2 + $0x30] sm:$0xff] }
 0x1fb   : > { %1835 = vmatmul.mubr.f32.gmra.mrb[44].mxu1 %v4658_v32  ;;  %v5072_v32 = vld [vmem:[#allocation2 + $0x171] sm:$0xff] }
 0x1fc   : > { %1520 = vmatmul.mubr.f32.gmra.mrb[90].mxu0 %v4862_v53  ;;  %1839 = vmatprep.mubr.f32.mxu1 %v5058_v21  ;;  %5639 = vst [vmem:[#allocation21_spill] sm:$0xff] %v5072_v32  ;;  %v3525_v53 = vpack.c.bf16 %v1264_v50, %v1263_v62  ;;  %v3528_v50 = vpack.c.bf16 %v1266_v61, %v1265_v51  ;;  %v1293_v61 = vld [vmem:[#allocation8 + $0x430] sm:$0xff] }
 0x1fd   : > { %1524 = vmatprep.mubr.f32.mxu0 %v5061_v3  ;;  %3520 = vmatpush1.bf16.msra.mxu1 %v3519_v60  ;;  %v5076_v60 = vld [vmem:[#allocation2 + $0x52] sm:$0xff]  ;;  %v1269_v51 = vld [vmem:[#allocation8 + $0x370] sm:$0xff] }
 0x1fe   : > { %3521 = vmatprep.subr.bf16.mxu1 %v4210_v0  ;;  %v1267_v3 = vld [vmem:[#allocation8 + $0x360] sm:$0xff] }
 0x1ff   : > { %1840 = vmatmul.mubr.f32.gmra.mrb[46].mxu1 %v4676_v45  ;;  %v1290_v45 = vld [vmem:[#allocation8 + $0x418] sm:$0xff] }
 0x200   : > { %4013 = vmatmul.mubr.msk.f32.gmra.mrb[92].mxu0 %vm4637_vm1, %v4873_v8  ;;  %1844 = vmatprep.mubr.f32.mxu1 %v5067_v10  ;;  %v934_v8 = vld [vmem:[#allocation2 + $0x2] sm:$0xff]  ;;  %v3564_v62 = vpack.c.bf16 %v1290_v45, %v1289_v31  ;;  %v3531_v45 = vpack.c.bf16 %v1268_v27, %v1267_v3  ;;  %v1295_v27 = vld [vmem:[#allocation8 + $0x440] sm:$0xff]  ;;  %v1296_v3 = vld [vmem:[#allocation8 + $0x448] sm:$0xff] }
 0x201   : > { %1529 = vmatprep.mubr.f32.mxu0 %v5072_v32  ;;  %3523 = vmatpush1.bf16.msra.mxu1 %v3522_v36  ;;  %v5082_v36 = vld [vmem:[#allocation2 + $0x62] sm:$0xff]  ;;  %v1291_v32 = vld [vmem:[#allocation8 + $0x420] sm:$0xff] }
 0x202   : > { %3524 = vmatprep.subr.bf16.mxu1 %v4210_v0 }
 0x203   : > { %1845 = vmatmul.mubr.f32.gmra.mrb[48].mxu1 %v4694_v59  ;;  %v1292_v59 = vld [vmem:[#allocation8 + $0x428] sm:$0xff] }
 0x204   : > { %1530 = vmatmul.mubr.f32.gmra.mrb[94].mxu0 %v4883_v28  ;;  %1849 = vmatprep.mubr.f32.mxu1 %v5076_v60  ;;  %v967_v28 = vld [vmem:[#allocation2 + $0x20] sm:$0xff]  ;;  %v3568_v31 = vpack.c.bf16 %v1292_v59, %v1291_v32  ;;  %v1272_v59 = vld [vmem:[#allocation8 + $0x388] sm:$0xff] }
 0x205   : > { %1599 = vmatprep.mubr.f32.mxu0 %v966_v20  ;;  %3526 = vmatpush1.bf16.msra.mxu1 %v3525_v53  ;;  %v935_v20 = vld [vmem:[#allocation2 + $0xa] sm:$0xff] }
 0x206   : > { %3527 = vmatprep.subr.bf16.mxu1 %v4210_v0  ;;  %v5088_v53 = vld [vmem:[#allocation2 + $0x6a] sm:$0xff] }
 0x207   : > { %1850 = vmatmul.mubr.f32.gmra.mrb[50].mxu1 %v4715_v13  ;;  %v1294_v13 = vld [vmem:[#allocation8 + $0x438] sm:$0xff] }
 0x208   : > { %1600 = vmatmul.mubr.f32.vlgmr.msra.gmra.mrb[32].mxu0 %v934_v8  ;;  %1854 = vmatprep.mubr.f32.mxu1 %v5082_v36  ;;  %v1270_v8 = vld [vmem:[#allocation8 + $0x378] sm:$0xff]  ;;  %v3572_v32 = vpack.c.bf16 %v1294_v13, %v1293_v61  ;;  %v1297_v61 = vld [vmem:[#allocation8 + $0x450] sm:$0xff] }
 0x209   : > { %1604 = vmatprep.mubr.f32.mxu0 %v967_v28  ;;  %3563 = vmatpush3.bf16.msra.mxu0 %v4680_v49  ;;  %v5096_v49 = vld [vmem:[#allocation2 + $0x7a] sm:$0xff]  ;;  %v1274_v13 = vld [vmem:[#allocation8 + $0x398] sm:$0xff] }
 0x20a   : > { %3565 = vmatprep.subr.bf16.mxu0 %v3564_v62  ;;  %3529 = vmatpush1.bf16.msra.mxu1 %v3528_v50  ;;  %v1271_v50 = vld [vmem:[#allocation8 + $0x380] sm:$0xff]  ;;  %v5101_v28 = vld [vmem:[#allocation2 + $0x38] sm:$0xff] }
 0x20b   : > { %1855 = vmatmul.mubr.f32.gmra.mrb[52].mxu1 %v4732_v33  ;;  %3530 = vmatprep.subr.bf16.mxu1 %v4210_v0  ;;  %v3534_v33 = vpack.c.bf16 %v1270_v8, %v1269_v51  ;;  %v5110_v51 = vld [vmem:[#allocation2 + $0x48] sm:$0xff]  ;;  %v1299_v8 = vld [vmem:[#allocation8 + $0x460] sm:$0xff] }
 0x20c   : > { %1605 = vmatmul.mubr.f32.gmra.mrb[34].mxu0 %v935_v20  ;;  %1859 = vmatprep.mubr.f32.mxu1 %v5088_v53  ;;  %v3576_v20 = vpack.c.bf16 %v1296_v3, %v1295_v27  ;;  %v1276_v3 = vld [vmem:[#allocation8 + $0x3a8] sm:$0xff] }
 0x20d   : > { %1609 = vmatprep.mubr.f32.mxu0 %v5092_v14  ;;  %3567 = vmatpush3.bf16.msra.mxu0 %v3564_v62  ;;  %v5105_v62 = vld [vmem:[#allocation2 + $0x82] sm:$0xff] }
 0x20e   : > { %3569 = vmatprep.subr.bf16.mxu0 %v3568_v31  ;;  %3532 = vmatpush1.bf16.msra.mxu1 %v3531_v45  ;;  %v1298_v45 = vld [vmem:[#allocation8 + $0x458] sm:$0xff] }
 0x20f   : > { %1860 = vmatmul.mubr.f32.gmra.mrb[54].mxu1 %v4755_v54  ;;  %3533 = vmatprep.subr.bf16.mxu1 %v4210_v0  ;;  %v3537_v54 = vpack.c.bf16 %v1272_v59, %v1271_v50  ;;  %v1301_v50 = vld [vmem:[#allocation8 + $0x470] sm:$0xff] }
 0x210   : > { %1610 = vmatmul.mubr.f32.gmra.mrb[36].mxu0 %v5028_v37  ;;  %1864 = vmatprep.mubr.f32.mxu1 %v5096_v49  ;;  %v1273_v37 = vld [vmem:[#allocation8 + $0x390] sm:$0xff] }
 0x211   : > { %1614 = vmatprep.mubr.f32.mxu0 %v5101_v28  ;;  %3571 = vmatpush3.bf16.msra.mxu0 %v3568_v31  ;;  %v3580_v31 = vpack.c.bf16 %v1298_v45, %v1297_v61  ;;  %v3540_v27 = vpack.c.bf16 %v1274_v13, %v1273_v37  ;;  %v1277_v61 = vld [vmem:[#allocation8 + $0x3b0] sm:$0xff]  ;;  %v1280_v37 = vld [vmem:[#allocation8 + $0x3c8] sm:$0xff]  ;;  %v5131_v13 = vld [vmem:[#allocation2 + $0x68] sm:$0xff] }
 0x212   : > { %3573 = vmatprep.subr.bf16.mxu0 %v3572_v32  ;;  %3535 = vmatpush1.bf16.msra.mxu1 %v3534_v33  ;;  %v1275_v33 = vld [vmem:[#allocation8 + $0x3a0] sm:$0xff]  ;;  %v5124_v45 = vld [vmem:[#allocation2 + $0x60] sm:$0xff] }
 0x213   : > { %1865 = vmatmul.mubr.f32.gmra.mrb[56].mxu1 %v4778_v15  ;;  %3536 = vmatprep.subr.bf16.mxu1 %v4210_v0  ;;  %v1300_v15 = vld [vmem:[#allocation8 + $0x468] sm:$0xff]  ;;  %v3543_v59 = vpack.c.bf16 %v1276_v3, %v1275_v33  ;;  %v1285_v33 = vld [vmem:[#allocation8 + $0x3f0] sm:$0xff]  ;;  %v5152_v3 = vld [vmem:[#allocation2 + $0x90] sm:$0xff] }
 0x214   : > { %1615 = vmatmul.mubr.f32.gmra.mrb[38].mxu0 %v5041_v22  ;;  %1869 = vmatprep.mubr.f32.mxu1 %v5105_v62  ;;  %v5117_v22 = vld [vmem:[#allocation2 + $0x50] sm:$0xff] }
 0x215   : > { %1619 = vmatprep.mubr.f32.mxu0 %v5110_v51  ;;  %3575 = vmatpush3.bf16.msra.mxu0 %v3572_v32  ;;  %v3584_v32 = vpack.c.bf16 %v1300_v15, %v1299_v8  ;;  %v5138_v8 = vld [vmem:[#allocation2 + $0x78] sm:$0xff]  ;;  %v5145_v15 = vld [vmem:[#allocation2 + $0x80] sm:$0xff] }
 0x216   : > { %3577 = vmatprep.subr.bf16.mxu0 %v3576_v20  ;;  %3538 = vmatpush1.bf16.msra.mxu1 %v3537_v54  ;;  %v1278_v54 = vld [vmem:[#allocation8 + $0x3b8] sm:$0xff] }
 0x217   : > { %1870 = vmatmul.mubr.f32.gmra.mrb[58].mxu1 %v4801_v38  ;;  %3539 = vmatprep.subr.bf16.mxu1 %v4210_v0  ;;  %v1302_v38 = vld [vmem:[#allocation8 + $0x478] sm:$0xff] }
 0x218   : > { %1620 = vmatmul.mubr.f32.gmra.mrb[40].mxu0 %v5047_v58  ;;  %1874 = vmatprep.mubr.f32.mxu1 %v4726_v26  ;;  %v3588_v26 = vpack.c.bf16 %v1302_v38, %v1301_v50 }
 0x219   : > { %1624 = vmatprep.mubr.f32.mxu0 %v5117_v22  ;;  %3579 = vmatpush3.bf16.msra.mxu0 %v3576_v20  ;;  %v3546_v20 = vpack.c.bf16 %v1278_v54, %v1277_v61  ;;  %v1074_v61 = vld [vmem:[#allocation2 + $0xb0] sm:$0xff] }
 0x21a   : > { %3581 = vmatprep.subr.bf16.mxu0 %v3580_v31  ;;  %3541 = vmatpush1.bf16.msra.mxu1 %v3540_v27  ;;  %v1284_v27 = vld [vmem:[#allocation8 + $0x3e8] sm:$0xff] }
 0x21b   : > { %1875 = vmatmul.mubr.f32.gmra.mrb[60].mxu1 %v4824_v5  ;;  %3542 = vmatprep.subr.bf16.mxu1 %v4210_v0  ;;  %v1279_v5 = vld [vmem:[#allocation8 + $0x3c0] sm:$0xff] }
 0x21c   : > { %1625 = vmatmul.mubr.f32.gmra.mrb[42].mxu0 %v5058_v21  ;;  %1879 = vmatprep.mubr.f32.mxu1 %v4746_v40  ;;  %v3549_v40 = vpack.c.bf16 %v1280_v37, %v1279_v5  ;;  %v1108_v37 = vld [vmem:[#allocation2 + $0xc9] sm:$0xff] }
 0x21d   : > { %1629 = vmatprep.mubr.f32.mxu0 %v5124_v45  ;;  %3583 = vmatpush3.bf16.msra.mxu0 %v3580_v31  ;;  %v1282_v31 = vld [vmem:[#allocation8 + $0x3d8] sm:$0xff] }
 0x21e   : > { %3585 = vmatprep.subr.bf16.mxu0 %v3584_v32  ;;  %3544 = vmatpush1.bf16.msra.mxu1 %v3543_v59  ;;  %v1106_v59 = vld [vmem:[#allocation2 + $0xb1] sm:$0xff] }
 0x21f   : > { %1880 = vmatmul.mubr.f32.gmra.mrb[62].mxu1 %v4847_v35  ;;  %3545 = vmatprep.subr.bf16.mxu1 %v4210_v0  ;;  %v1281_v35 = vld [vmem:[#allocation8 + $0x3d0] sm:$0xff] }
 0x220   : > { %1630 = vmatmul.mubr.f32.gmra.mrb[44].mxu0 %v5067_v10  ;;  %1884 = vmatprep.mubr.f32.mxu1 %v4771_v2  ;;  %v3552_v2 = vpack.c.bf16 %v1282_v31, %v1281_v35  ;;  %v1109_v31 = vld [vmem:[#allocation2 + $0xd9] sm:$0xff] }
 0x221   : > { %1634 = vmatprep.mubr.f32.mxu0 %v5131_v13  ;;  %3587 = vmatpush3.bf16.msra.mxu0 %v3584_v32  ;;  %v1073_v32 = vld [vmem:[#allocation2 + $0xa8] sm:$0xff] }
 0x222   : > { %3589 = vmatprep.subr.bf16.mxu0 %v3588_v26  ;;  %3547 = vmatpush1.bf16.msra.mxu1 %v3546_v20  ;;  %v1075_v20 = vld [vmem:[#allocation2 + $0xc0] sm:$0xff] }
 0x223   : > { %1885 = vmatmul.mubr.f32.gmra.mrb[0].mxu1 %v4870_v7  ;;  %3548 = vmatprep.subr.bf16.mxu1 %v4210_v0  ;;  %v1283_v7 = vld [vmem:[#allocation8 + $0x3e0] sm:$0xff] }
 0x224   : > { %1635 = vmatmul.mubr.f32.gmra.mrb[46].mxu0 %v5076_v60  ;;  %1889 = vmatprep.mubr.f32.mxu1 %v4786_v6  ;;  %v3555_v6 = vpack.c.bf16 %v1284_v27, %v1283_v7  ;;  %v1110_v27 = vld [vmem:[#allocation2 + $0xe1] sm:$0xff] }
 0x225   : > { %1639 = vmatprep.mubr.f32.mxu0 %v5138_v8  ;;  %3591 = vmatpush3.bf16.msra.mxu0 %v3588_v26 }
 0x226   : > { %3550 = vmatpush1.bf16.msra.mxu1 %v3549_v40  ;;  %v1076_v40 = vld [vmem:[#allocation2 + $0xc8] sm:$0xff] }
 0x227   : > { %1890 = vmatmul.mubr.f32.gmra.mrb[2].mxu1 %v4892_v34  ;;  %3551 = vmatprep.subr.bf16.mxu1 %v4210_v0  ;;  %v1286_v34 = vld [vmem:[#allocation8 + $0x3f8] sm:$0xff] }
 0x228   : > { %1640 = vmatmul.mubr.f32.gmra.mrb[48].mxu0 %v5082_v36  ;;  %1894 = vmatprep.mubr.f32.mxu1 %v4811_v48  ;;  %v3558_v48 = vpack.c.bf16 %v1286_v34, %v1285_v33  ;;  %v1111_v34 = vld [vmem:[#allocation2 + $0xf1] sm:$0xff] }
 0x229   : > { %1644 = vmatprep.mubr.f32.mxu0 %v5145_v15 }
 0x22a   : > { %3553 = vmatpush1.bf16.msra.mxu1 %v3552_v2  ;;  %v1077_v2 = vld [vmem:[#allocation2 + $0xd8] sm:$0xff] }
 0x22b   : > { %1895 = vmatmul.mubr.f32.gmra.mrb[4].mxu1 %v4913_v57  ;;  %3554 = vmatprep.subr.bf16.mxu1 %v4210_v0  ;;  %v5159_v57 = vld [vmem:[#allocation2 + $0x98] sm:$0xff] }
 0x22c   : > { %1645 = vmatmul.mubr.f32.gmra.mrb[50].mxu0 %v5088_v53  ;;  %1899 = vmatprep.mubr.f32.mxu1 %v4832_v17  ;;  %v1136_v17 = vld [vmem:[#allocation2 + $0x9a] sm:$0xff] }
 0x22d   : > { %1649 = vmatprep.mubr.f32.mxu0 %v5152_v3 }
 0x22e   : > { %3556 = vmatpush1.bf16.msra.mxu1 %v3555_v6  ;;  %v1078_v6 = vld [vmem:[#allocation2 + $0xe0] sm:$0xff] }
 0x22f   : > { %1900 = vmatmul.mubr.f32.gmra.mrb[6].mxu1 %v4924_v4  ;;  %3557 = vmatprep.subr.bf16.mxu1 %v4210_v0  ;;  %v1135_v0 = vld [vmem:[#allocation2 + $0x92] sm:$0xff]  ;;  %v1139_v4 = vld [vmem:[#allocation2 + $0xc2] sm:$0xff] }
 0x230   : > { %1650 = vmatmul.mubr.f32.gmra.mrb[52].mxu0 %v5096_v49  ;;  %1904 = vmatprep.mubr.f32.mxu1 %v4857_v47  ;;  %v1137_v47 = vld [vmem:[#allocation2 + $0xaa] sm:$0xff] }
 0x231   : > { %1654 = vmatprep.mubr.f32.mxu0 %v5159_v57 }
 0x232   : > { %3559 = vmatpush1.bf16.msra.mxu1 %v3558_v48  ;;  %v1079_v48 = vld [vmem:[#allocation2 + $0xf0] sm:$0xff] }
 0x233   : > { %1905 = vmatmul.mubr.f32.gmra.mrb[8].mxu1 %v4935_v12  ;;  %v1140_v12 = vld [vmem:[#allocation2 + $0xca] sm:$0xff] }
 0x234   : > { %1655 = vmatmul.mubr.f32.gmra.mrb[54].mxu0 %v5105_v62  ;;  %1909 = vmatprep.mubr.f32.mxu1 %v4878_v23  ;;  %v1138_v23 = vld [vmem:[#allocation2 + $0xb2] sm:$0xff] }
 0x235   : > { %3208 = vmatprep.mubr.f32.mxu0 %v5047_v58 }
 0x237   : > { %1910 = vmatmul.mubr.f32.gmra.mrb[10].mxu1 %v4946_v24  ;;  %v1141_v24 = vld [vmem:[#allocation2 + $0xda] sm:$0xff] }
 0x238   : > { %3209 = vmatmul.mubr.f32.vlgmr.msra.gmra.mrb[96].mxu0 %v5058_v21  ;;  %1914 = vmatprep.mubr.f32.mxu1 %v4901_v46 }
 0x239   : > { %3211 = vmatprep.mubr.f32.mxu0 %v5067_v10 }
 0x23b   : > { %1915 = vmatmul.mubr.f32.gmra.mrb[12].mxu1 %v4957_v44  ;;  %v1142_v44 = vld [vmem:[#allocation2 + $0xe2] sm:$0xff] }
 0x23c   : > { %3212 = vmatmul.mubr.f32.gmra.mrb[98].mxu0 %v5076_v60  ;;  %1919 = vmatprep.mubr.f32.mxu1 %v4917_v63  ;;  %v1103_v60 = vld [vmem:[#allocation2 + $0x91] sm:$0xff] }
 0x23d   : > { %3214 = vmatprep.mubr.f32.mxu0 %v5082_v36 }
 0x23f   : > { %1920 = vmatmul.mubr.f32.gmra.mrb[14].mxu1 %v4968_v39  ;;  %v5640_v39 = vld [vmem:[#allocation19_spill] sm:$0xff] }
 0x240   : > { %3215 = vmatmul.mubr.f32.gmra.mrb[100].mxu0 %v5088_v53  ;;  %1924 = vmatprep.mubr.f32.mxu1 %v4930_v11 }
 0x241   : > { %3217 = vmatprep.mubr.f32.mxu0 %v5096_v49  ;;  %v1104_v49 = vld [vmem:[#allocation2 + $0x99] sm:$0xff] }
 0x243   : > { %1925 = vmatmul.mubr.f32.gmra.mrb[16].mxu1 %v4979_v55  ;;  %v1060_v55 = vld [vmem:[#allocation2 + $0x182] sm:$0xff] }
 0x244   : > { %3218 = vmatmul.mubr.f32.gmra.mrb[102].mxu0 %v5105_v62  ;;  %1929 = vmatprep.mubr.f32.mxu1 %v4939_v25 }
 0x245   : > { %3220 = vmatprep.mubr.f32.mxu0 %v1135_v0  ;;  %v1112_v0 = vld [vmem:[#allocation2 + $0xf9] sm:$0xff] }
 0x247   : > { %1930 = vmatmul.mubr.f32.gmra.mrb[18].mxu1 %v4990_v30  ;;  %v1157_v30 = vld [vmem:[#allocation2 + $0x19a] sm:$0xff] }
 0x248   : > { %3221 = vmatmul.mubr.f32.gmra.mrb[104].mxu0 %v1136_v17  ;;  %1934 = vmatprep.mubr.f32.mxu1 %v4952_v41  ;;  %v2467_v17 = vld [vmem:[#allocation9] sm:$0xff] }
 0x249   : > { %3223 = vmatprep.mubr.f32.mxu0 %v1137_v47  ;;  %v2468_v47 = vld [vmem:[#allocation9 + $0x8] sm:$0xff] }
 0x24b   : > { %1935 = vmatmul.mubr.f32.gmra.mrb[20].mxu1 %v5001_v29  ;;  %v1096_v29 = vld [vmem:[#allocation2 + $0x39] sm:$0xff] }
 0x24c   : > { %3224 = vmatmul.mubr.f32.gmra.mrb[106].mxu0 %v1138_v23  ;;  %1939 = vmatprep.mubr.f32.mxu1 %v4961_v56 }
 0x24d   : > { %3226 = vmatprep.mubr.f32.mxu0 %v1139_v4  ;;  %v3592_v4 = vpack.c.bf16 %v2468_v47, %v2467_v17 }
 0x24f   : > { %1940 = vmatmul.mubr.f32.gmra.mrb[22].mxu1 %v5011_v43  ;;  %v1098_v43 = vld [vmem:[#allocation2 + $0x51] sm:$0xff]  ;;  %3593 = vmatprep.subr.bf16.mxu0 %v3592_v4 }
 0x250   : > { %3227 = vmatmul.mubr.f32.gmra.mrb[108].mxu0 %v1140_v12  ;;  %1944 = vmatprep.mubr.f32.mxu1 %v4974_v9  ;;  %v1080_v12 = vld [vmem:[#allocation2 + $0xf8] sm:$0xff] }
 0x251   : > { %3229 = vmatprep.mubr.f32.mxu0 %v1141_v24  ;;  %3595 = vmatpush3.bf16.msra.mxu0 %v3592_v4 }
 0x253   : > { %1945 = vmatmul.mubr.f32.gmra.mrb[24].mxu1 %v5021_v42  ;;  %v1099_v42 = vld [vmem:[#allocation2 + $0x61] sm:$0xff] }
 0x254   : > { %3230 = vmatmul.mubr.f32.gmra.mrb[110].mxu0 %v1142_v44  ;;  %1949 = vmatprep.mubr.f32.mxu1 %v4983_v52  ;;  %v1113_v44 = vld [vmem:[#allocation2 + $0x109] sm:$0xff] }
 0x255   : > { %3232 = vmatprep.mubr.f32.mxu0 %v4901_v46  ;;  %v5641_v46 = vld [vmem:[#allocation17_spill] sm:$0xff] }
 0x257   : > { %1950 = vmatmul.mubr.f32.gmra.mrb[26].mxu1 %v5033_v1  ;;  %v1100_v1 = vld [vmem:[#allocation2 + $0x69] sm:$0xff] }
 0x258   : > { %3233 = vmatmul.mubr.f32.gmra.mrb[112].mxu0 %v4917_v63  ;;  %1954 = vmatprep.mubr.f32.mxu1 %v4996_v18  ;;  %v5642_v63 = vld [vmem:[#allocation20_spill] sm:$0xff] }
 0x259   : > { %3235 = vmatprep.mubr.f32.mxu0 %v4930_v11  ;;  %v5643_v11 = vld [vmem:[#allocation18_spill] sm:$0xff] }
 0x25b   : > { %1955 = vmatmul.mubr.f32.gmra.mrb[28].mxu1 %v5039_v19  ;;  %v1101_v19 = vld [vmem:[#allocation2 + $0x79] sm:$0xff] }
 0x25c   : > { %3236 = vmatmul.mubr.f32.gmra.mrb[114].mxu0 %v4939_v25  ;;  %1959 = vmatprep.mubr.f32.mxu1 %v5005_v16  ;;  %v5644_v25 = vld [vmem:[#allocation21_spill] sm:$0xff] }
 0x25d   : > { %3238 = vmatprep.mubr.f32.mxu0 %v4952_v41  ;;  %v5210_v41 = vld [vmem:[#allocation2 + $0x181] sm:$0xff] }
 0x25f   : > { %1960 = vmatmul.mubr.f32.gmra.mrb[30].mxu1 %v5640_v39  ;;  %v2469_v39 = vld [vmem:[#allocation9 + $0x10] sm:$0xff] }
 0x260   : > { %3239 = vmatmul.mubr.f32.gmra.mrb[116].mxu0 %v4961_v56  ;;  %1964 = vmatprep.mubr.f32.mxu1 %v5641_v46  ;;  %v1156_v56 = vld [vmem:[#allocation2 + $0x18a] sm:$0xff] }
 0x261   : > { %3241 = vmatprep.mubr.f32.mxu0 %v4974_v9  ;;  %v5214_v9 = vld [vmem:[#allocation2 + $0x189] sm:$0xff] }
 0x263   : > { %1965 = vmatmul.mubr.f32.gmra.mrb[32].mxu1 %v5642_v63 }
 0x264   : > { %3242 = vmatmul.mubr.f32.gmra.mrb[118].mxu0 %v4983_v52  ;;  %1969 = vmatprep.mubr.f32.mxu1 %v5643_v11  ;;  %v1095_v52 = vld [vmem:[#allocation2 + $0x31] sm:$0xff] }
 0x265   : > { %3244 = vmatprep.mubr.f32.mxu0 %v4996_v18  ;;  %v1158_v18 = vld [vmem:[#allocation2 + $0x1a2] sm:$0xff] }
 0x267   : > { %1970 = vmatmul.mubr.f32.gmra.mrb[34].mxu1 %v5644_v25  ;;  %v1081_v25 = vld [vmem:[#allocation2 + $0x108] sm:$0xff] }
 0x268   : > { %3245 = vmatmul.mubr.f32.gmra.mrb[120].mxu0 %v5005_v16  ;;  %1974 = vmatprep.mubr.f32.mxu1 %v1060_v55  ;;  %v1097_v16 = vld [vmem:[#allocation2 + $0x49] sm:$0xff] }
 0x269   : > { %3247 = vmatprep.mubr.f32.mxu0 %v5641_v46  ;;  %v2470_v46 = vld [vmem:[#allocation9 + $0x18] sm:$0xff] }
 0x26b   : > { %1975 = vmatmul.mubr.f32.gmra.mrb[36].mxu1 %v5210_v41 }
 0x26c   : > { %3248 = vmatmul.mubr.f32.gmra.mrb[122].mxu0 %v5643_v11  ;;  %1979 = vmatprep.mubr.f32.mxu1 %v1156_v56  ;;  %v3596_v11 = vpack.c.bf16 %v2470_v46, %v2469_v39  ;;  %v1088_v39 = vld [vmem:[#allocation2 + $0x158] sm:$0xff] }
 0x26d   : > { %3250 = vmatprep.mubr.f32.mxu0 %v1060_v55 }
 0x26e   : > { %3597 = vmatprep.subr.bf16.mxu0 %v3596_v11 }
 0x26f   : > { %1980 = vmatmul.mubr.f32.gmra.mrb[38].mxu1 %v5214_v9  ;;  %3599 = vmatpush3.bf16.msra.mxu0 %v3596_v11 }
 0x270   : > { %3251 = vmatmul.mubr.f32.gmra.mrb[124].mxu0 %v1156_v56  ;;  %2049 = vmatprep.mubr.f32.mxu1 %v1095_v52  ;;  %v1114_v56 = vld [vmem:[#allocation2 + $0x111] sm:$0xff] }
 0x271   : > { %3253 = vmatprep.mubr.f32.mxu0 %v1157_v30  ;;  %v2471_v52 = vld [vmem:[#allocation9 + $0x20] sm:$0xff]  ;;  %v2472_v30 = vld [vmem:[#allocation9 + $0x28] sm:$0xff] }
 0x273   : > { %2050 = vmatmul.mubr.f32.vlgmr.msra.gmra.mrb[40].mxu1 %v5092_v14  ;;  %v1102_v14 = vld [vmem:[#allocation2 + $0x81] sm:$0xff] }
 0x274   : > { %2054 = vmatprep.mubr.f32.mxu1 %v1096_v29  ;;  %3254 = vmatmul.mubr.f32.gmra.mrb[126].mxu0 %v1158_v18  ;;  %v3600_v29 = vpack.c.bf16 %v2472_v30, %v2471_v52  ;;  %v1122_v52 = vld [vmem:[#allocation2 + $0x171] sm:$0xff] }
 0x276   : > { %3601 = vmatprep.subr.bf16.mxu0 %v3600_v29 }
 0x277   : > { %2055 = vmatmul.mubr.f32.gmra.mrb[42].mxu1 %v5101_v28  ;;  %3603 = vmatpush3.bf16.msra.mxu0 %v3600_v29 }
 0x278   : > { %2059 = vmatprep.mubr.f32.mxu1 %v1097_v16  ;;  %v1082_v16 = vld [vmem:[#allocation2 + $0x110] sm:$0xff] }
 0x27b   : > { %2060 = vmatmul.mubr.f32.gmra.mrb[44].mxu1 %v5110_v51  ;;  %v1105_v51 = vld [vmem:[#allocation2 + $0xa9] sm:$0xff] }
 0x27c   : > { %2064 = vmatprep.mubr.f32.mxu1 %v1098_v43 }
 0x27f   : > { %2065 = vmatmul.mubr.f32.gmra.mrb[46].mxu1 %v5117_v22 }
 0x280   : > { %2069 = vmatprep.mubr.f32.mxu1 %v1099_v42  ;;  %v1115_v42 = vld [vmem:[#allocation2 + $0x121] sm:$0xff] }
 0x283   : > { %2070 = vmatmul.mubr.f32.gmra.mrb[48].mxu1 %v5124_v45  ;;  %v1107_v45 = vld [vmem:[#allocation2 + $0xc1] sm:$0xff] }
 0x284   : > { %2074 = vmatprep.mubr.f32.mxu1 %v1100_v1  ;;  %v2473_v1 = vld [vmem:[#allocation9 + $0x30] sm:$0xff] }
 0x287   : > { %2075 = vmatmul.mubr.f32.gmra.mrb[50].mxu1 %v5131_v13 }
 0x288   : > { %2079 = vmatprep.mubr.f32.mxu1 %v1101_v19  ;;  %v2474_v19 = vld [vmem:[#allocation9 + $0x38] sm:$0xff] }
 0x28b   : > { %v5223_v58 = vpop.f32.mrb[56].mxu0  ;;  %2080 = vmatmul.mubr.f32.gmra.mrb[52].mxu1 %v5138_v8 }
 0x28c   : > { %v1438_v21 = vpop.f32.mrb[57].mxu0  ;;  %2084 = vmatprep.mubr.f32.mxu1 %v1102_v14 }
 0x28d   : > { %v3604_v21 = vpack.c.bf16 %v2474_v19, %v2473_v1 }
 0x28f   : > { %v5226_v10 = vpop.f32.mrb[58].mxu0  ;;  %2085 = vmatmul.mubr.f32.gmra.mrb[54].mxu1 %v5145_v15  ;;  %3605 = vmatprep.subr.bf16.mxu0 %v3604_v21 }
 0x290   : > { %v1443_v36 = vpop.f32.mrb[59].mxu0  ;;  %2089 = vmatprep.mubr.f32.mxu1 %v1103_v60  ;;  %v1083_v60 = vld [vmem:[#allocation2 + $0x120] sm:$0xff]  ;;  %3607 = vmatpush3.bf16.msra.mxu0 %v3604_v21  ;;  %v1092_v21 = vld [vmem:[#allocation2 + $0x188] sm:$0xff] }
 0x293   : > { %v5229_v53 = vpop.f32.mrb[60].mxu0  ;;  %2090 = vmatmul.mubr.f32.gmra.mrb[56].mxu1 %v5152_v3 }
 0x294   : > { %v1448_v28 = vpop.f32.mrb[61].mxu0  ;;  %2094 = vmatprep.mubr.f32.mxu1 %v1104_v49  ;;  %v1116_v49 = vld [vmem:[#allocation2 + $0x129] sm:$0xff] }
 0x295   : > { %v2475_v28 = vld [vmem:[#allocation9 + $0x40] sm:$0xff] }
 0x297   : > { %v5232_v62 = vpop.f32.mrb[62].mxu0  ;;  %2095 = vmatmul.mubr.f32.gmra.mrb[58].mxu1 %v5159_v57 }
 0x298   : > { %v1453_v22 = vpop.f32.mrb[63].mxu0  ;;  %2099 = vmatprep.mubr.f32.mxu1 %v1105_v51  ;;  %v2476_v51 = vld [vmem:[#allocation9 + $0x48] sm:$0xff] }
 0x29b   : > { %v5235_v50 = vpop.f32.mrb[64].mxu0  ;;  %2100 = vmatmul.mubr.f32.gmra.mrb[60].mxu1 %v1073_v32  ;;  %v3608_v32 = vpack.c.bf16 %v2476_v51, %v2475_v28  ;;  %v1126_v28 = vld [vmem:[#allocation2 + $0x1a1] sm:$0xff] }
 0x29c   : > { %v1458_v38 = vpop.f32.mrb[65].mxu0  ;;  %2104 = vmatprep.mubr.f32.mxu1 %v1106_v59  ;;  %v2477_v59 = vld [vmem:[#allocation9 + $0x50] sm:$0xff] }
 0x29d   : > { %v2478_v38 = vld [vmem:[#allocation9 + $0x58] sm:$0xff]  ;;  %3609 = vmatprep.subr.bf16.mxu0 %v3608_v32 }
 0x29e   : > { %3611 = vmatpush3.bf16.msra.mxu0 %v3608_v32 }
 0x29f   : > { %v5237_v54 = vpop.f32.mrb[66].mxu0  ;;  %2105 = vmatmul.mubr.f32.gmra.mrb[62].mxu1 %v1074_v61  ;;  %v3612_v61 = vpack.c.bf16 %v2478_v38, %v2477_v59 }
 0x2a0   : > { %v1463_v26 = vpop.f32.mrb[67].mxu0  ;;  %2109 = vmatprep.mubr.f32.mxu1 %v1107_v45  ;;  %v1084_v45 = vld [vmem:[#allocation2 + $0x128] sm:$0xff] }
 0x2a1   : > { %3613 = vmatprep.subr.bf16.mxu0 %v3612_v61 }
 0x2a2   : > { %3615 = vmatpush3.bf16.msra.mxu0 %v3612_v61 }
 0x2a3   : > { %v5239_v5 = vpop.f32.mrb[68].mxu0  ;;  %2110 = vmatmul.mubr.f32.gmra.mrb[0].mxu1 %v1075_v20  ;;  %v1117_v20 = vld [vmem:[#allocation2 + $0x139] sm:$0xff] }
 0x2a4   : > { %v1468_v13 = vpop.f32.mrb[69].mxu0  ;;  %2114 = vmatprep.mubr.f32.mxu1 %v1108_v37 }
 0x2a5   : > { %v1085_v13 = vld [vmem:[#allocation2 + $0x138] sm:$0xff] }
 0x2a7   : > { %v5241_v35 = vpop.f32.mrb[70].mxu0  ;;  %2115 = vmatmul.mubr.f32.gmra.mrb[2].mxu1 %v1076_v40 }
 0x2a8   : > { %v1473_v8 = vpop.f32.mrb[71].mxu0  ;;  %2119 = vmatprep.mubr.f32.mxu1 %v1109_v31  ;;  %v1118_v31 = vld [vmem:[#allocation2 + $0x141] sm:$0xff] }
 0x2a9   : > { %v2479_v8 = vld [vmem:[#allocation9 + $0x60] sm:$0xff] }
 0x2ab   : > { %v5243_v7 = vpop.f32.mrb[72].mxu0  ;;  %2120 = vmatmul.mubr.f32.gmra.mrb[4].mxu1 %v1077_v2  ;;  %v2480_v2 = vld [vmem:[#allocation9 + $0x68] sm:$0xff] }
 0x2ac   : > { %v1478_v15 = vpop.f32.mrb[73].mxu0  ;;  %2124 = vmatprep.mubr.f32.mxu1 %v1110_v27 }
 0x2ad   : > { %v3616_v15 = vpack.c.bf16 %v2480_v2, %v2479_v8 }
 0x2af   : > { %v5245_v33 = vpop.f32.mrb[74].mxu0  ;;  %2125 = vmatmul.mubr.f32.gmra.mrb[6].mxu1 %v1078_v6  ;;  %v1086_v6 = vld [vmem:[#allocation2 + $0x140] sm:$0xff]  ;;  %3617 = vmatprep.subr.bf16.mxu0 %v3616_v15 }
 0x2b0   : > { %v1483_v3 = vpop.f32.mrb[75].mxu0  ;;  %2129 = vmatprep.mubr.f32.mxu1 %v1111_v34  ;;  %3619 = vmatpush3.bf16.msra.mxu0 %v3616_v15 }
 0x2b1   : > { %v1119_v3 = vld [vmem:[#allocation2 + $0x151] sm:$0xff] }
 0x2b3   : > { %v5247_v57 = vpop.f32.mrb[76].mxu0  ;;  %2130 = vmatmul.mubr.f32.gmra.mrb[8].mxu1 %v1079_v48  ;;  %v2481_v48 = vld [vmem:[#allocation9 + $0x70] sm:$0xff] }
 0x2b4   : > { %v1488_v23 = vpop.f32.mrb[77].mxu0  ;;  %2134 = vmatprep.mubr.f32.mxu1 %v1112_v0  ;;  %v2482_v0 = vld [vmem:[#allocation9 + $0x78] sm:$0xff] }
 0x2b5   : > { %v3620_v47 = vpack.c.bf16 %v2482_v0, %v2481_v48  ;;  %v1087_v23 = vld [vmem:[#allocation2 + $0x150] sm:$0xff] }
 0x2b7   : > { %v5249_v24 = vpop.f32.mrb[78].mxu0  ;;  %2135 = vmatmul.mubr.f32.gmra.mrb[10].mxu1 %v1080_v12  ;;  %3621 = vmatprep.subr.bf16.mxu0 %v3620_v47  ;;  %v1120_v12 = vld [vmem:[#allocation2 + $0x159] sm:$0xff] }
 0x2b8   : > { %v1493_v63 = vpop.f32.mrb[79].mxu0  ;;  %2139 = vmatprep.mubr.f32.mxu1 %v1113_v44  ;;  %3623 = vmatpush3.bf16.msra.mxu0 %v3620_v47 }
 0x2b9   : > { %v1121_v63 = vld [vmem:[#allocation2 + $0x169] sm:$0xff] }
 0x2bb   : > { %v5251_v55 = vpop.f32.mrb[80].mxu0  ;;  %2140 = vmatmul.mubr.f32.gmra.mrb[12].mxu1 %v1081_v25  ;;  %v1089_v25 = vld [vmem:[#allocation2 + $0x168] sm:$0xff] }
 0x2bc   : > { %v1498_v18 = vpop.f32.mrb[81].mxu0  ;;  %2144 = vmatprep.mubr.f32.mxu1 %v1114_v56 }
 0x2bd   : > { %v1090_v18 = vld [vmem:[#allocation2 + $0x170] sm:$0xff] }
 0x2bf   : > { %v5253_v43 = vpop.f32.mrb[82].mxu0  ;;  %2145 = vmatmul.mubr.f32.gmra.mrb[14].mxu1 %v1082_v16 }
 0x2c0   : > { %5645 = vst [vmem:[#allocation19_spill] sm:$0xff] %v5253_v43  ;;  %v1503_v14 = vpop.f32.mrb[83].mxu0  ;;  %2149 = vmatprep.mubr.f32.mxu1 %v1115_v42  ;;  %v1091_v42 = vld [vmem:[#allocation2 + $0x180] sm:$0xff] }
 0x2c1   : > { %v1125_v14 = vld [vmem:[#allocation2 + $0x199] sm:$0xff] }
 0x2c3   : > { %v5255_v36 = vpop.f32.mrb[84].mxu0  ;;  %2150 = vmatmul.mubr.f32.gmra.mrb[16].mxu1 %v1083_v60 }
 0x2c4   : > { %5646 = vst [vmem:[#allocation17_spill] sm:$0xff] %v5255_v36  ;;  %v1508_v22 = vpop.f32.mrb[85].mxu0  ;;  %2154 = vmatprep.mubr.f32.mxu1 %v1116_v49 }
 0x2c5   : > { %v3931_v22 = vld [vmem:[#allocation2] sm:$0xff] }
 0x2c7   : > { %v5257_v26 = vpop.f32.mrb[86].mxu0  ;;  %2155 = vmatmul.mubr.f32.gmra.mrb[18].mxu1 %v1084_v45 }
 0x2c8   : > { %5647 = vst [vmem:[#allocation20_spill] sm:$0xff] %v5257_v26  ;;  %v1513_v37 = vpop.f32.mrb[87].mxu0  ;;  %2159 = vmatprep.mubr.f32.mxu1 %v1117_v20 }
 0x2cb   : > { %v5259_v40 = vpop.f32.mrb[88].mxu0  ;;  %2160 = vmatmul.mubr.f32.gmra.mrb[20].mxu1 %v1085_v13 }
 0x2cc   : > { %5648 = vst [vmem:[#allocation18_spill] sm:$0xff] %v5259_v40  ;;  %v1518_v27 = vpop.f32.mrb[89].mxu0  ;;  %2164 = vmatprep.mubr.f32.mxu1 %v1118_v31 }
 0x2cf   : > { %v5261_v34 = vpop.f32.mrb[90].mxu0  ;;  %2165 = vmatmul.mubr.f32.gmra.mrb[22].mxu1 %v1086_v6 }
 0x2d0   : > { %5649 = vst [vmem:[#allocation21_spill] sm:$0xff] %v5261_v34  ;;  %v1523_v17 = vpop.f32.mrb[91].mxu0  ;;  %2169 = vmatprep.mubr.f32.mxu1 %v1119_v3 }
 0x2d3   : > { %v5263_v4 = vpop.f32.mrb[92].mxu0  ;;  %2170 = vmatmul.mubr.f32.gmra.mrb[24].mxu1 %v1087_v23 }
 0x2d4   : > { %5650 = vst [vmem:[#allocation22_spill] sm:$0xff] %v5263_v4  ;;  %v1528_v44 = vpop.f32.mrb[93].mxu0  ;;  %2174 = vmatprep.mubr.f32.mxu1 %v1120_v12 }
 0x2d7   : > { %v5265_v46 = vpop.f32.mrb[94].mxu0  ;;  %2175 = vmatmul.mubr.f32.gmra.mrb[26].mxu1 %v1088_v39 }
 0x2d8   : > { %5651 = vst [vmem:[#allocation23_spill] sm:$0xff] %v5265_v46  ;;  %v1533_v11 = vpop.f32.mrb[95].mxu0  ;;  %2179 = vmatprep.mubr.f32.mxu1 %v1121_v63 }
 0x2db   : > { %v5267_v56 = vpop.f32.mrb[32].mxu0  ;;  %2180 = vmatmul.mubr.f32.gmra.mrb[28].mxu1 %v1089_v25 }
 0x2dc   : > { %v1603_v30 = vpop.f32.mrb[33].mxu0  ;;  %2184 = vmatprep.mubr.f32.mxu1 %v1122_v52 }
 0x2df   : > { %v5269_v29 = vpop.f32.mrb[34].mxu0  ;;  %2185 = vmatmul.mubr.f32.gmra.mrb[30].mxu1 %v1090_v18 }
 0x2e0   : > { %v1608_v16 = vpop.f32.mrb[35].mxu0  ;;  %2189 = vmatprep.mubr.f32.mxu1 %v5210_v41 }
 0x2e3   : > { %v5272_v1 = vpop.f32.mrb[36].mxu0  ;;  %2190 = vmatmul.mubr.f32.gmra.mrb[32].mxu1 %v1091_v42 }
 0x2e4   : > { %v1613_v19 = vpop.f32.mrb[37].mxu0  ;;  %2194 = vmatprep.mubr.f32.mxu1 %v5214_v9 }
 0x2e7   : > { %v5275_v60 = vpop.f32.mrb[38].mxu0  ;;  %2195 = vmatmul.mubr.f32.gmra.mrb[34].mxu1 %v1092_v21 }
 0x2e8   : > { %v1618_v49 = vpop.f32.mrb[39].mxu0  ;;  %2199 = vmatprep.mubr.f32.mxu1 %v1125_v14 }
 0x2eb   : > { %v5277_v51 = vpop.f32.mrb[40].mxu0  ;;  %2200 = vmatmul.mubr.f32.gmra.mrb[36].mxu1 %v3931_v22 }
 0x2ec   : > { %v1623_v41 = vpop.f32.mrb[41].mxu0  ;;  %2204 = vmatprep.mubr.f32.mxu1 %v1126_v28 }
 0x2ef   : > { %v5279_v32 = vpop.f32.mrb[42].mxu0  ;;  %2205 = vmatmul.mubr.f32.gmra.mrb[38].mxu1 %v3931_v22 }
 0x2f0   : > { %v1628_v59 = vpop.f32.mrb[43].mxu0 }
 0x2f3   : > { %v5281_v38 = vpop.f32.mrb[44].mxu0 }
 0x2f4   : > { %v1633_v9 = vpop.f32.mrb[45].mxu0 }
 0x2f7   : > { %v5283_v61 = vpop.f32.mrb[46].mxu0 }
 0x2f8   : > { %v1638_v45 = vpop.f32.mrb[47].mxu0 }
 0x2fb   : > { %v5285_v20 = vpop.f32.mrb[48].mxu0 }
 0x2fc   : > { %v1643_v37 = vpop.f32.mrb[49].mxu0 }
 0x2ff   : > { %v5287_v13 = vpop.f32.mrb[50].mxu0 }
 0x300   : > { %v1648_v31 = vpop.f32.mrb[51].mxu0 }
 0x301   : > { %v5344_v31 = vld [vmem:[%s5603_s4] ss:$0 sm:$0xff] }
 0x303   : > { %v5289_v8 = vpop.f32.mrb[52].mxu0 }
 0x304   : > { %v1653_v2 = vpop.f32.mrb[53].mxu0 }
 0x307   : > { %v5291_v27 = vpop.f32.mrb[54].mxu0 }
 0x308   : > { %v1658_v15 = vpop.f32.mrb[55].mxu0 }
 0x309   : > { %v3656_v15 = vadd.f32 %v5344_v31, %v5267_v56 }
 0x30b   : > { %v3210_v6 = vpop.f32.mrb[96].mxu0 }
 0x30c   : > { %v2276_v3 = vpop.f32.mrb[97].mxu0 }
 0x30f   : > { %v3213_v48 = vpop.f32.mrb[98].mxu0 }
 0x310   : > { %v2286_v0 = vpop.f32.mrb[99].mxu0 }
 0x313   : > { %v5293_v17 = vpop.f32.mrb[100].mxu0 }
 0x314   : > { %v2296_v47 = vpop.f32.mrb[101].mxu0 }
 0x317   : > { %v5295_v23 = vpop.f32.mrb[102].mxu0 }
 0x318   : > { %v5297_v12 = vpop.f32.mrb[103].mxu0 }
 0x31b   : > { %v5299_v44 = vpop.f32.mrb[104].mxu0 }
 0x31c   : > { %v5301_v39 = vpop.f32.mrb[105].mxu0 }
 0x31f   : > { %v5303_v63 = vpop.f32.mrb[106].mxu0 }
 0x320   : > { %v5305_v11 = vpop.f32.mrb[107].mxu0 }
 0x323   : > { %v5307_v25 = vpop.f32.mrb[108].mxu0 }
 0x324   : > { %v5309_v52 = vpop.f32.mrb[109].mxu0 }
 0x327   : > { %v5311_v30 = vpop.f32.mrb[110].mxu0 }
 0x328   : > { %v5313_v18 = vpop.f32.mrb[111].mxu0 }
 0x32b   : > { %v5315_v16 = vpop.f32.mrb[112].mxu0 }
 0x32c   : > { %v5317_v42 = vpop.f32.mrb[113].mxu0 }
 0x32f   : > { %v5319_v19 = vpop.f32.mrb[114].mxu0 }
 0x330   : > { %v5321_v14 = vpop.f32.mrb[115].mxu0 }
 0x333   : > { %v5323_v21 = vpop.f32.mrb[116].mxu0 }
 0x334   : > { %v5325_v49 = vpop.f32.mrb[117].mxu0 }
 0x337   : > { %v5327_v28 = vpop.f32.mrb[118].mxu0 }
 0x338   : > { %v5329_v22 = vpop.f32.mrb[119].mxu0 }
 0x33b   : > { %v5331_v41 = vpop.f32.mrb[120].mxu0 }
 0x33c   : > { %5652 = vst [vmem:[#allocation24_spill] sm:$0xff] %v5331_v41  ;;  %v5333_v59 = vpop.f32.mrb[121].mxu0 }
 0x33d   : > { %5653 = vst [vmem:[#allocation25_spill] sm:$0xff] %v5333_v59 }
 0x33f   : > { %v5335_v9 = vpop.f32.mrb[122].mxu0 }
 0x340   : > { %5654 = vst [vmem:[#allocation26_spill] sm:$0xff] %v5335_v9  ;;  %v5337_v45 = vpop.f32.mrb[123].mxu0 }
 0x341   : > { %5655 = vst [vmem:[#allocation27_spill] sm:$0xff] %v5337_v45 }
 0x343   : > { %v5339_v37 = vpop.f32.mrb[124].mxu0 }
 0x344   : > { %5656 = vst [vmem:[#allocation28_spill] sm:$0xff] %v5339_v37  ;;  %v5346_v2 = vpop.f32.mrb[125].mxu0  ;;  %v3658_v37 = vadd.f32 %v5344_v31, %v5269_v29 }
 0x345   : > { %5657 = vst [vmem:[#allocation29_spill] sm:$0xff] %v5346_v2  ;;  %v3660_v2 = vadd.f32 %v5344_v31, %v5272_v1 }
 0x346   : > { %v2051_v46 = vpop.f32.mrb[40].mxu1 }
 0x347   : > { %v3657_v4 = vadd.f32 %v3656_v15, %v2051_v46  ;;  %v2053_v34 = vpop.f32.mrb[41].mxu1  ;;  %v5350_v40 = vpop.f32.mrb[126].mxu0 }
 0x348   : > { %5658 = vst [vmem:[#allocation30_spill] sm:$0xff] %v5350_v40  ;;  %v5352_v9 = vpop.f32.mrb[127].mxu0  ;;  %v3662_v40 = vadd.f32 %v5344_v31, %v5275_v60 }
 0x349   : > { %5659 = vst [vmem:[#allocation31_spill] sm:$0xff] %v5352_v9  ;;  %v2277_v45 = vadd.f32 %v3657_v4, %v2276_v3 }
 0x34a   : > { %v2056_v26 = vpop.f32.mrb[42].mxu1 }
 0x34b   : > { %v2435_v41 = vmax.f32 %v2277_v45, 0.0  ;;  %v3659_v36 = vadd.f32 %v3658_v37, %v2056_v26  ;;  %v2058_v59 = vpop.f32.mrb[43].mxu1  ;;  %v3664_v26 = vadd.f32 %v5344_v31, %v5277_v51 }
 0x34d   : > { %v2282_v43 = vadd.f32 %v3659_v36, %v3210_v6  ;;  %3288 = vmatprep.mubr.f32.mxu0 %v2435_v41  ;;  %v3666_v41 = vadd.f32 %v5344_v31, %v5279_v32 }
 0x34e   : > { %v2061_v56 = vpop.f32.mrb[44].mxu1 }
 0x34f   : > { %v2436_v46 = vmax.f32 %v2282_v43, 0.0  ;;  %v3661_v34 = vadd.f32 %v3660_v2, %v2061_v56  ;;  %v2063_v15 = vpop.f32.mrb[45].mxu1 }
 0x350   : > { %v3670_v15 = vadd.f32 %v5344_v31, %v5283_v61  ;;  %v3674_v61 = vadd.f32 %v5344_v31, %v5287_v13  ;;  %v3678_v13 = vadd.f32 %v5344_v31, %v5291_v27  ;;  %v1442_v27 = vadd.f32 %v5344_v31, %v5226_v10 }
 0x351   : > { %v2287_v9 = vadd.f32 %v3661_v34, %v2286_v0  ;;  %3289 = vmatmul.mubr.f32.vlgmr.msra.gmra.mrb[128].mxu0 %v2436_v46  ;;  %v1452_v10 = vadd.f32 %v5344_v31, %v5232_v62  ;;  %v1462_v62 = vadd.f32 %v5344_v31, %v5237_v54  ;;  %v1472_v54 = vadd.f32 %v5344_v31, %v5241_v35 }
 0x352   : > { %v2066_v29 = vpop.f32.mrb[46].mxu1  ;;  %v1482_v35 = vadd.f32 %v5344_v31, %v5245_v33  ;;  %v1492_v33 = vadd.f32 %v5344_v31, %v5249_v24 }
 0x353   : > { %v2437_v4 = vmax.f32 %v2287_v9, 0.0  ;;  %v3663_v3 = vadd.f32 %v3662_v40, %v2066_v29  ;;  %v2068_v45 = vpop.f32.mrb[47].mxu1  ;;  %v3668_v40 = vadd.f32 %v5344_v31, %v5281_v38  ;;  %v3672_v38 = vadd.f32 %v5344_v31, %v5285_v20 }
 0x354   : > { %v3676_v20 = vadd.f32 %v5344_v31, %v5289_v8  ;;  %v1437_v8 = vadd.f32 %v5344_v31, %v5223_v58  ;;  %v1447_v58 = vadd.f32 %v5344_v31, %v5229_v53  ;;  %v1457_v53 = vadd.f32 %v5344_v31, %v5235_v50 }
 0x355   : > { %v2292_v59 = vadd.f32 %v3663_v3, %v3213_v48  ;;  %3291 = vmatprep.mubr.f32.mxu0 %v2437_v4  ;;  %v1467_v50 = vadd.f32 %v5344_v31, %v5239_v5  ;;  %v1477_v5 = vadd.f32 %v5344_v31, %v5243_v7  ;;  %v1487_v7 = vadd.f32 %v5344_v31, %v5247_v57 }
 0x356   : > { %v2071_v36 = vpop.f32.mrb[48].mxu1  ;;  %v1497_v57 = vadd.f32 %v5344_v31, %v5251_v55 }
 0x357   : > { %v2438_v1 = vmax.f32 %v2292_v59, 0.0  ;;  %v3665_v6 = vadd.f32 %v3664_v26, %v2071_v36  ;;  %v2073_v43 = vpop.f32.mrb[49].mxu1 }
 0x359   : > { %v2297_v37 = vadd.f32 %v3665_v6, %v2296_v47  ;;  %3292 = vmatmul.mubr.f32.gmra.mrb[130].mxu0 %v2438_v1 }
 0x35a   : > { %v2076_v60 = vpop.f32.mrb[50].mxu1 }
 0x35b   : > { %v2439_v0 = vmax.f32 %v2297_v37, 0.0  ;;  %v3667_v2 = vadd.f32 %v3666_v41, %v2076_v60  ;;  %v2078_v9 = vpop.f32.mrb[51].mxu1 }
 0x35d   : > { %v2302_v51 = vadd.f32 %v3667_v2, %v5293_v17  ;;  %3294 = vmatprep.mubr.f32.mxu0 %v2439_v0 }
 0x35e   : > { %v2081_v48 = vpop.f32.mrb[52].mxu1 }
 0x35f   : > { %v2440_v56 = vmax.f32 %v2302_v51, 0.0  ;;  %v3669_v46 = vadd.f32 %v3668_v40, %v2081_v48  ;;  %v2083_v34 = vpop.f32.mrb[53].mxu1 }
 0x361   : > { %v2307_v32 = vadd.f32 %v3669_v46, %v5297_v12  ;;  %3295 = vmatmul.mubr.f32.gmra.mrb[132].mxu0 %v2440_v56 }
 0x362   : > { %v2086_v47 = vpop.f32.mrb[54].mxu1 }
 0x363   : > { %v2441_v29 = vmax.f32 %v2307_v32, 0.0  ;;  %v3671_v4 = vadd.f32 %v3670_v15, %v2086_v47  ;;  %v2088_v3 = vpop.f32.mrb[55].mxu1 }
 0x365   : > { %v2312_v17 = vadd.f32 %v3671_v4, %v5295_v23  ;;  %3297 = vmatprep.mubr.f32.mxu0 %v2441_v29 }
 0x366   : > { %v2091_v45 = vpop.f32.mrb[56].mxu1 }
 0x367   : > { %v2442_v26 = vmax.f32 %v2312_v17, 0.0  ;;  %v3673_v59 = vadd.f32 %v3672_v38, %v2091_v45  ;;  %v2093_v36 = vpop.f32.mrb[57].mxu1 }
 0x369   : > { %v2317_v12 = vadd.f32 %v3673_v59, %v5301_v39  ;;  %3298 = vmatmul.mubr.f32.gmra.mrb[134].mxu0 %v2442_v26 }
 0x36a   : > { %v2096_v1 = vpop.f32.mrb[58].mxu1 }
 0x36b   : > { %v2443_v6 = vmax.f32 %v2317_v12, 0.0  ;;  %v3675_v43 = vadd.f32 %v3674_v61, %v2096_v1  ;;  %v2098_v41 = vpop.f32.mrb[59].mxu1 }
 0x36d   : > { %v2322_v23 = vadd.f32 %v3675_v43, %v5299_v44  ;;  %3300 = vmatprep.mubr.f32.mxu0 %v2443_v6 }
 0x36e   : > { %v2101_v37 = vpop.f32.mrb[60].mxu1 }
 0x36f   : > { %v2444_v60 = vmax.f32 %v2322_v23, 0.0  ;;  %v3677_v0 = vadd.f32 %v3676_v20, %v2101_v37  ;;  %v2103_v2 = vpop.f32.mrb[61].mxu1 }
 0x371   : > { %v2327_v39 = vadd.f32 %v3677_v0, %v5305_v11  ;;  %3301 = vmatmul.mubr.f32.gmra.mrb[136].mxu0 %v2444_v60 }
 0x372   : > { %v2106_v9 = vpop.f32.mrb[62].mxu1 }
 0x373   : > { %v2445_v40 = vmax.f32 %v2327_v39, 0.0  ;;  %v3679_v51 = vadd.f32 %v3678_v13, %v2106_v9  ;;  %v2108_v48 = vpop.f32.mrb[63].mxu1 }
 0x375   : > { %v2332_v44 = vadd.f32 %v3679_v51, %v5303_v63  ;;  %3303 = vmatprep.mubr.f32.mxu0 %v2445_v40 }
 0x376   : > { %v2111_v56 = vpop.f32.mrb[0].mxu1 }
 0x377   : > { %v2446_v46 = vmax.f32 %v2332_v44, 0.0  ;;  %v3681_v34 = vadd.f32 %v2111_v56, %v1437_v8  ;;  %v2113_v15 = vpop.f32.mrb[1].mxu1 }
 0x379   : > { %v2337_v11 = vadd.f32 %v3681_v34, %v5309_v52  ;;  %3304 = vmatmul.mubr.f32.gmra.mrb[138].mxu0 %v2446_v46 }
 0x37a   : > { %v2116_v32 = vpop.f32.mrb[2].mxu1 }
 0x37b   : > { %v2447_v47 = vmax.f32 %v2337_v11, 0.0  ;;  %v3683_v29 = vadd.f32 %v2116_v32, %v1442_v27  ;;  %v2118_v4 = vpop.f32.mrb[3].mxu1 }
 0x37d   : > { %v2342_v63 = vadd.f32 %v3683_v29, %v5307_v25  ;;  %3306 = vmatprep.mubr.f32.mxu0 %v2447_v47 }
 0x37e   : > { %v2121_v3 = vpop.f32.mrb[4].mxu1 }
 0x37f   : > { %v2448_v38 = vmax.f32 %v2342_v63, 0.0  ;;  %v3685_v17 = vadd.f32 %v2121_v3, %v1447_v58  ;;  %v2123_v45 = vpop.f32.mrb[5].mxu1 }
 0x381   : > { %v2347_v52 = vadd.f32 %v3685_v17, %v5313_v18  ;;  %3307 = vmatmul.mubr.f32.gmra.mrb[140].mxu0 %v2448_v38 }
 0x382   : > { %v2126_v26 = vpop.f32.mrb[6].mxu1 }
 0x383   : > { %v2449_v59 = vmax.f32 %v2347_v52, 0.0  ;;  %v3687_v36 = vadd.f32 %v2126_v26, %v1452_v10  ;;  %v2128_v61 = vpop.f32.mrb[7].mxu1  ;;  %v5660_v52 = vld [vmem:[#allocation19_spill] sm:$0xff]  ;;  %v5661_v26 = vld [vmem:[#allocation25_spill] sm:$0xff] }
 0x384   : > { %v1502_v24 = vadd.f32 %v5344_v31, %v5660_v52  ;;  %v3932_v52 = vld [vmem:[%s4466_s8 + $0x8] sm:$0xff] }
 0x385   : > { %v2352_v25 = vadd.f32 %v3687_v36, %v5311_v30  ;;  %3309 = vmatprep.mubr.f32.mxu0 %v2449_v59 }
 0x386   : > { %v2131_v12 = vpop.f32.mrb[8].mxu1 }
 0x387   : > { %v2450_v1 = vmax.f32 %v2352_v25, 0.0  ;;  %v3689_v6 = vadd.f32 %v2131_v12, %v1457_v53  ;;  %v2133_v43 = vpop.f32.mrb[9].mxu1  ;;  %v5662_v25 = vld [vmem:[#allocation17_spill] sm:$0xff]  ;;  %v5663_v12 = vld [vmem:[#allocation24_spill] sm:$0xff] }
 0x388   : > { %v1507_v55 = vadd.f32 %v5344_v31, %v5662_v25 }
 0x389   : > { %v2357_v18 = vadd.f32 %v3689_v6, %v5317_v42  ;;  %3310 = vmatmul.mubr.f32.gmra.mrb[142].mxu0 %v2450_v1 }
 0x38a   : > { %v2136_v41 = vpop.f32.mrb[10].mxu1 }
 0x38b   : > { %v2451_v20 = vmax.f32 %v2357_v18, 0.0  ;;  %v3691_v23 = vadd.f32 %v2136_v41, %v1462_v62  ;;  %v2138_v37 = vpop.f32.mrb[11].mxu1  ;;  %v5664_v18 = vld [vmem:[#allocation20_spill] sm:$0xff] }
 0x38c   : > { %v1512_v41 = vadd.f32 %v5344_v31, %v5664_v18 }
 0x38d   : > { %v2362_v30 = vadd.f32 %v3691_v23, %v5315_v16  ;;  %3312 = vmatprep.mubr.f32.mxu0 %v2451_v20  ;;  %v5665_v20 = vld [vmem:[#allocation27_spill] sm:$0xff] }
 0x38e   : > { %v2141_v60 = vpop.f32.mrb[12].mxu1 }
 0x38f   : > { %v2452_v0 = vmax.f32 %v2362_v30, 0.0  ;;  %v3693_v2 = vadd.f32 %v2141_v60, %v1467_v50  ;;  %v2143_v13 = vpop.f32.mrb[13].mxu1 }
 0x390   : > { %v5667_v13 = vld [vmem:[#allocation26_spill] sm:$0xff] }
 0x391   : > { %v2367_v42 = vadd.f32 %v3693_v2, %v5321_v14  ;;  %3313 = vmatmul.mubr.f32.gmra.mrb[144].mxu0 %v2452_v0  ;;  %v5666_v0 = vld [vmem:[#allocation18_spill] sm:$0xff] }
 0x392   : > { %v2146_v39 = vpop.f32.mrb[14].mxu1  ;;  %v1517_v2 = vadd.f32 %v5344_v31, %v5666_v0 }
 0x393   : > { %v2453_v9 = vmax.f32 %v2367_v42, 0.0  ;;  %v3695_v40 = vadd.f32 %v2146_v39, %v1472_v54  ;;  %v2148_v51 = vpop.f32.mrb[15].mxu1 }
 0x394   : > { %v5668_v51 = vld [vmem:[#allocation21_spill] sm:$0xff] }
 0x395   : > { %v2372_v16 = vadd.f32 %v3695_v40, %v5319_v19  ;;  %3315 = vmatprep.mubr.f32.mxu0 %v2453_v9 }
 0x396   : > { %v2151_v48 = vpop.f32.mrb[16].mxu1 }
 0x397   : > { %v2454_v8 = vmax.f32 %v2372_v16, 0.0  ;;  %v3697_v44 = vadd.f32 %v2151_v48, %v1477_v5  ;;  %v2153_v56 = vpop.f32.mrb[17].mxu1  ;;  %v1522_v5 = vadd.f32 %v5344_v31, %v5668_v51  ;;  %v5669_v16 = vld [vmem:[#allocation29_spill] sm:$0xff]  ;;  %v3939_v51 = vld [vmem:[%s4466_s8 + $0x30] sm:$0xff] }
 0x399   : > { %v2377_v14 = vadd.f32 %v3697_v44, %v5325_v49  ;;  %3316 = vmatmul.mubr.f32.gmra.mrb[146].mxu0 %v2454_v8 }
 0x39a   : > { %v2156_v46 = vpop.f32.mrb[18].mxu1 }
 0x39b   : > { %v2455_v34 = vmax.f32 %v2377_v14, 0.0  ;;  %v3699_v15 = vadd.f32 %v2156_v46, %v1482_v35  ;;  %v2158_v27 = vpop.f32.mrb[19].mxu1  ;;  %v5670_v14 = vld [vmem:[#allocation22_spill] sm:$0xff] }
 0x39c   : > { %v1527_v46 = vadd.f32 %v5344_v31, %v5670_v14  ;;  %v3940_v14 = vld [vmem:[%s4466_s8 + $0x48] sm:$0xff] }
 0x39d   : > { %v2382_v19 = vadd.f32 %v3699_v15, %v5323_v21  ;;  %3318 = vmatprep.mubr.f32.mxu0 %v2455_v34  ;;  %v5671_v34 = vld [vmem:[#allocation28_spill] sm:$0xff] }
 0x39e   : > { %v2161_v11 = vpop.f32.mrb[20].mxu1 }
 0x39f   : > { %v2456_v32 = vmax.f32 %v2382_v19, 0.0  ;;  %v3701_v47 = vadd.f32 %v2161_v11, %v1487_v7  ;;  %v2163_v29 = vpop.f32.mrb[21].mxu1 }
 0x3a0   : > { %v5673_v29 = vld [vmem:[#allocation31_spill] sm:$0xff] }
 0x3a1   : > { %v2387_v49 = vadd.f32 %v3701_v47, %v5329_v22  ;;  %3319 = vmatmul.mubr.f32.gmra.mrb[148].mxu0 %v2456_v32  ;;  %v5672_v32 = vld [vmem:[#allocation23_spill] sm:$0xff] }
 0x3a2   : > { %v2166_v4 = vpop.f32.mrb[22].mxu1  ;;  %v1532_v47 = vadd.f32 %v5344_v31, %v5672_v32 }
 0x3a3   : > { %v2457_v58 = vmax.f32 %v2387_v49, 0.0  ;;  %v3703_v63 = vadd.f32 %v2166_v4, %v1492_v33  ;;  %v2168_v3 = vpop.f32.mrb[23].mxu1 }
 0x3a4   : > { %v5674_v3 = vld [vmem:[#allocation30_spill] sm:$0xff] }
 0x3a5   : > { %v2392_v21 = vadd.f32 %v3703_v63, %v5327_v28  ;;  %3321 = vmatprep.mubr.f32.mxu0 %v2457_v58 }
 0x3a6   : > { %v2171_v38 = vpop.f32.mrb[24].mxu1 }
 0x3a7   : > { %v2458_v17 = vmax.f32 %v2392_v21, 0.0  ;;  %v3705_v45 = vadd.f32 %v2171_v38, %v1497_v57  ;;  %v2173_v10 = vpop.f32.mrb[25].mxu1  ;;  %v5446_v38 = vld [vmem:[%s5605_s6] ss:$0 sm:$0xff] }
 0x3a9   : > { %v2397_v22 = vadd.f32 %v3705_v45, %v5661_v26  ;;  %3322 = vmatmul.mubr.f32.gmra.mrb[150].mxu0 %v2458_v17  ;;  %v3933_v26 = vld [vmem:[%s4466_s8] sm:$0xff] }
 0x3aa   : > { %v2176_v59 = vpop.f32.mrb[26].mxu1 }
 0x3ab   : > { %v2459_v36 = vmax.f32 %v2397_v22, 0.0  ;;  %v3707_v61 = vadd.f32 %v2176_v59, %v1502_v24  ;;  %v2178_v53 = vpop.f32.mrb[27].mxu1 }
 0x3ad   : > { %v2402_v28 = vadd.f32 %v3707_v61, %v5663_v12  ;;  %3324 = vmatprep.mubr.f32.mxu0 %v2459_v36  ;;  %v3934_v12 = vld [vmem:[%s4466_s8 + $0x18] sm:$0xff] }
 0x3ae   : > { %v2181_v1 = vpop.f32.mrb[28].mxu1 }
 0x3af   : > { %v2460_v6 = vmax.f32 %v2402_v28, 0.0  ;;  %v3709_v43 = vadd.f32 %v2181_v1, %v1507_v55  ;;  %v2183_v62 = vpop.f32.mrb[29].mxu1  ;;  %v3935_v1 = vld [vmem:[%s4466_s8 + $0x10] sm:$0xff] }
 0x3b1   : > { %v2407_v23 = vadd.f32 %v3709_v43, %v5665_v20  ;;  %3325 = vmatmul.mubr.f32.gmra.mrb[152].mxu0 %v2460_v6 }
 0x3b2   : > { %v2186_v37 = vpop.f32.mrb[30].mxu1 }
 0x3b3   : > { %v2461_v50 = vmax.f32 %v2407_v23, 0.0  ;;  %v3711_v30 = vadd.f32 %v2186_v37, %v1512_v41  ;;  %v2188_v60 = vpop.f32.mrb[31].mxu1  ;;  %v3936_v37 = vld [vmem:[%s4466_s8 + $0x28] sm:$0xff] }
 0x3b5   : > { %v2412_v54 = vadd.f32 %v3711_v30, %v5667_v13  ;;  %3327 = vmatprep.mubr.f32.mxu0 %v2461_v50  ;;  %v3937_v30 = vld [vmem:[%s4466_s8 + $0x20] sm:$0xff] }
 0x3b6   : > { %v2191_v42 = vpop.f32.mrb[32].mxu1 }
 0x3b7   : > { %v2462_v39 = vmax.f32 %v2412_v54, 0.0  ;;  %v3713_v9 = vadd.f32 %v2191_v42, %v1517_v2  ;;  %v2193_v40 = vpop.f32.mrb[33].mxu1 }
 0x3b9   : > { %v2417_v48 = vadd.f32 %v3713_v9, %v5669_v16  ;;  %3328 = vmatmul.mubr.f32.gmra.mrb[154].mxu0 %v2462_v39  ;;  %v3938_v9 = vld [vmem:[%s4466_s8 + $0x38] sm:$0xff] }
 0x3ba   : > { %v2196_v8 = vpop.f32.mrb[34].mxu1 }
 0x3bb   : > { %v2463_v44 = vmax.f32 %v2417_v48, 0.0  ;;  %v3715_v56 = vadd.f32 %v2196_v8, %v1522_v5  ;;  %v2198_v35 = vpop.f32.mrb[35].mxu1 }
 0x3bd   : > { %v2422_v15 = vadd.f32 %v3715_v56, %v5671_v34  ;;  %3330 = vmatprep.mubr.f32.mxu0 %v2463_v44  ;;  %v3941_v34 = vld [vmem:[%s4466_s8 + $0x40] sm:$0xff] }
 0x3be   : > { %v2201_v27 = vpop.f32.mrb[36].mxu1 }
 0x3bf   : > { %v2464_v7 = vmax.f32 %v2422_v15, 0.0  ;;  %v3717_v19 = vadd.f32 %v2201_v27, %v1527_v46  ;;  %v2203_v11 = vpop.f32.mrb[37].mxu1 }
 0x3c1   : > { %v2427_v33 = vadd.f32 %v3717_v19, %v5673_v29  ;;  %3331 = vmatmul.mubr.f32.gmra.mrb[156].mxu0 %v2464_v7  ;;  %v3942_v29 = vld [vmem:[%s4466_s8 + $0x58] sm:$0xff] }
 0x3c2   : > { %v2206_v49 = vpop.f32.mrb[38].mxu1 }
 0x3c3   : > { %v2465_v4 = vmax.f32 %v2427_v33, 0.0  ;;  %v3719_v58 = vadd.f32 %v2206_v49, %v1532_v47  ;;  %v2208_v63 = vpop.f32.mrb[39].mxu1  ;;  %v3943_v49 = vld [vmem:[%s4466_s8 + $0x50] sm:$0xff] }
 0x3c5   : > { %v2432_v57 = vadd.f32 %v3719_v58, %v5674_v3  ;;  %3333 = vmatprep.mubr.f32.mxu0 %v2465_v4 }
 0x3c7   : > { %v2466_v21 = vmax.f32 %v2432_v57, 0.0 }
 0x3c9   : > { %3334 = vmatmul.mubr.f32.gmra.mrb[158].mxu0 %v2466_v21 }
 0x424   : > { %v3290_v31 = vpop.f32.mrb[128].mxu0 }
 0x425   : > { %v2562_v17 = vadd.f32 %v3290_v31, %v5446_v38  ;;  %v2556_v45 = vpop.f32.mrb[129].mxu0 }
 0x426   : > { %v2557_v10 = vadd.f32 %v5446_v38, %v2556_v45 }
 0x427   : > { %v2716_v24 = vadd.f32 %v3932_v52, %v2562_v17  ;;  %v3944_v17 = vld [vmem:[%s4466_s8 + $0x68] sm:$0xff] }
 0x428   : > { %v2715_v22 = vadd.f32 %v3933_v26, %v2557_v10  ;;  %v3945_v10 = vld [vmem:[%s4466_s8 + $0x60] sm:$0xff] }
 0x429   : > { %v2748_v59 = vmax.f32 %v2716_v24, 0.0 }
 0x42a   : > { %v2747_v36 = vmax.f32 %v2715_v22, 0.0 }
 0x42b   : > { %2780 = vst [vmem:[%s5454_s12 + $0x8] sm:$0xff] %v2748_v59 }
 0x42c   : > { %2779 = vst [vmem:[%s5454_s12] sm:$0xff] %v2747_v36  ;;  %v3293_v61 = vpop.f32.mrb[130].mxu0 }
 0x42d   : > { %v2572_v53 = vadd.f32 %v3293_v61, %v5446_v38  ;;  %v2566_v25 = vpop.f32.mrb[131].mxu0 }
 0x42e   : > { %v2567_v55 = vadd.f32 %v5446_v38, %v2566_v25 }
 0x42f   : > { %v2718_v28 = vadd.f32 %v3934_v12, %v2572_v53  ;;  %v3946_v53 = vld [vmem:[%s4466_s8 + $0x78] sm:$0xff] }
 0x430   : > { %v2717_v6 = vadd.f32 %v3935_v1, %v2567_v55  ;;  %v3947_v55 = vld [vmem:[%s4466_s8 + $0x70] sm:$0xff] }
 0x431   : > { %v2750_v43 = vmax.f32 %v2718_v28, 0.0 }
 0x432   : > { %v2749_v62 = vmax.f32 %v2717_v6, 0.0 }
 0x433   : > { %2782 = vst [vmem:[%s5454_s12 + $0x18] sm:$0xff] %v2750_v43 }
 0x434   : > { %2781 = vst [vmem:[%s5454_s12 + $0x10] sm:$0xff] %v2749_v62  ;;  %v3296_v18 = vpop.f32.mrb[132].mxu0 }
 0x435   : > { %v2582_v41 = vadd.f32 %v3296_v18, %v5446_v38  ;;  %v2576_v20 = vpop.f32.mrb[133].mxu0 }
 0x436   : > { %v2577_v23 = vadd.f32 %v5446_v38, %v2576_v20 }
 0x437   : > { %v2720_v50 = vadd.f32 %v3936_v37, %v2582_v41  ;;  %v3948_v41 = vld [vmem:[%s4466_s8 + $0x88] sm:$0xff] }
 0x438   : > { %v2719_v60 = vadd.f32 %v3937_v30, %v2577_v23  ;;  %v3949_v23 = vld [vmem:[%s4466_s8 + $0x80] sm:$0xff] }
 0x439   : > { %v2752_v0 = vmax.f32 %v2720_v50, 0.0 }
 0x43a   : > { %v2751_v2 = vmax.f32 %v2719_v60, 0.0 }
 0x43b   : > { %2784 = vst [vmem:[%s5454_s12 + $0x28] sm:$0xff] %v2752_v0 }
 0x43c   : > { %2783 = vst [vmem:[%s5454_s12 + $0x20] sm:$0xff] %v2751_v2  ;;  %v3299_v13 = vpop.f32.mrb[134].mxu0 }
 0x43d   : > { %v2592_v54 = vadd.f32 %v3299_v13, %v5446_v38  ;;  %v2586_v42 = vpop.f32.mrb[135].mxu0 }
 0x43e   : > { %v2587_v39 = vadd.f32 %v5446_v38, %v2586_v42 }
 0x43f   : > { %v2722_v40 = vadd.f32 %v3938_v9, %v2592_v54  ;;  %v3950_v54 = vld [vmem:[%s4466_s8 + $0x98] sm:$0xff] }
 0x440   : > { %v2721_v5 = vadd.f32 %v3939_v51, %v2587_v39  ;;  %v3951_v39 = vld [vmem:[%s4466_s8 + $0x90] sm:$0xff] }
 0x441   : > { %v2754_v16 = vmax.f32 %v2722_v40, 0.0 }
 0x442   : > { %v2753_v48 = vmax.f32 %v2721_v5, 0.0 }
 0x443   : > { %2786 = vst [vmem:[%s5454_s12 + $0x38] sm:$0xff] %v2754_v16 }
 0x444   : > { %2785 = vst [vmem:[%s5454_s12 + $0x30] sm:$0xff] %v2753_v48  ;;  %v3302_v8 = vpop.f32.mrb[136].mxu0 }
 0x445   : > { %v2602_v44 = vadd.f32 %v3302_v8, %v5446_v38  ;;  %v2596_v56 = vpop.f32.mrb[137].mxu0 }
 0x446   : > { %v2597_v35 = vadd.f32 %v5446_v38, %v2596_v56 }
 0x447   : > { %v2724_v46 = vadd.f32 %v3940_v14, %v2602_v44  ;;  %v3952_v44 = vld [vmem:[%s4466_s8 + $0xa8] sm:$0xff] }
 0x448   : > { %v2723_v15 = vadd.f32 %v3941_v34, %v2597_v35  ;;  %v3953_v35 = vld [vmem:[%s4466_s8 + $0xa0] sm:$0xff] }
 0x449   : > { %v2756_v27 = vmax.f32 %v2724_v46, 0.0 }
 0x44a   : > { %v2755_v7 = vmax.f32 %v2723_v15, 0.0 }
 0x44b   : > { %2788 = vst [vmem:[%s5454_s12 + $0x48] sm:$0xff] %v2756_v27 }
 0x44c   : > { %2787 = vst [vmem:[%s5454_s12 + $0x40] sm:$0xff] %v2755_v7  ;;  %v3305_v19 = vpop.f32.mrb[138].mxu0 }
 0x44d   : > { %v2612_v11 = vadd.f32 %v3305_v19, %v5446_v38  ;;  %v2606_v32 = vpop.f32.mrb[139].mxu0 }
 0x44e   : > { %v2607_v47 = vadd.f32 %v5446_v38, %v2606_v32 }
 0x44f   : > { %v2726_v33 = vadd.f32 %v3942_v29, %v2612_v11  ;;  %v3954_v11 = vld [vmem:[%s4466_s8 + $0xb8] sm:$0xff] }
 0x450   : > { %v2725_v4 = vadd.f32 %v3943_v49, %v2607_v47  ;;  %v3955_v47 = vld [vmem:[%s4466_s8 + $0xb0] sm:$0xff] }
 0x451   : > { %v2758_v58 = vmax.f32 %v2726_v33, 0.0 }
 0x452   : > { %v2757_v63 = vmax.f32 %v2725_v4, 0.0 }
 0x453   : > { %2790 = vst [vmem:[%s5454_s12 + $0x58] sm:$0xff] %v2758_v58 }
 0x454   : > { %2789 = vst [vmem:[%s5454_s12 + $0x50] sm:$0xff] %v2757_v63  ;;  %v3308_v3 = vpop.f32.mrb[140].mxu0 }
 0x455   : > { %v2622_v57 = vadd.f32 %v3308_v3, %v5446_v38  ;;  %v2616_v21 = vpop.f32.mrb[141].mxu0 }
 0x456   : > { %v2617_v31 = vadd.f32 %v5446_v38, %v2616_v21 }
 0x457   : > { %v2728_v45 = vadd.f32 %v3944_v17, %v2622_v57  ;;  %v3956_v57 = vld [vmem:[%s4466_s8 + $0xc8] sm:$0xff] }
 0x458   : > { %v2727_v52 = vadd.f32 %v3945_v10, %v2617_v31  ;;  %v3957_v31 = vld [vmem:[%s4466_s8 + $0xc0] sm:$0xff] }
 0x459   : > { %v2760_v24 = vmax.f32 %v2728_v45, 0.0 }
 0x45a   : > { %v2759_v26 = vmax.f32 %v2727_v52, 0.0 }
 0x45b   : > { %2792 = vst [vmem:[%s5454_s12 + $0x68] sm:$0xff] %v2760_v24 }
 0x45c   : > { %2791 = vst [vmem:[%s5454_s12 + $0x60] sm:$0xff] %v2759_v26  ;;  %v3311_v22 = vpop.f32.mrb[142].mxu0 }
 0x45d   : > { %v2632_v59 = vadd.f32 %v3311_v22, %v5446_v38  ;;  %v2626_v36 = vpop.f32.mrb[143].mxu0 }
 0x45e   : > { %v2627_v61 = vadd.f32 %v5446_v38, %v2626_v36 }
 0x45f   : > { %v2730_v25 = vadd.f32 %v3946_v53, %v2632_v59  ;;  %v3958_v59 = vld [vmem:[%s4466_s8 + $0xd8] sm:$0xff] }
 0x460   : > { %v2729_v12 = vadd.f32 %v3947_v55, %v2627_v61  ;;  %v3959_v61 = vld [vmem:[%s4466_s8 + $0xd0] sm:$0xff] }
 0x461   : > { %v2762_v28 = vmax.f32 %v2730_v25, 0.0 }
 0x462   : > { %v2761_v1 = vmax.f32 %v2729_v12, 0.0 }
 0x463   : > { %2794 = vst [vmem:[%s5454_s12 + $0x78] sm:$0xff] %v2762_v28 }
 0x464   : > { %2793 = vst [vmem:[%s5454_s12 + $0x70] sm:$0xff] %v2761_v1  ;;  %v3314_v6 = vpop.f32.mrb[144].mxu0 }
 0x465   : > { %v2642_v43 = vadd.f32 %v3314_v6, %v5446_v38  ;;  %v2636_v62 = vpop.f32.mrb[145].mxu0 }
 0x466   : > { %v2637_v18 = vadd.f32 %v5446_v38, %v2636_v62 }
 0x467   : > { %v2732_v20 = vadd.f32 %v3948_v41, %v2642_v43  ;;  %v3960_v43 = vld [vmem:[%s4466_s8 + $0xe8] sm:$0xff] }
 0x468   : > { %v2731_v37 = vadd.f32 %v3949_v23, %v2637_v18  ;;  %v3961_v18 = vld [vmem:[%s4466_s8 + $0xe0] sm:$0xff] }
 0x469   : > { %v2764_v50 = vmax.f32 %v2732_v20, 0.0 }
 0x46a   : > { %v2763_v30 = vmax.f32 %v2731_v37, 0.0 }
 0x46b   : > { %2796 = vst [vmem:[%s5454_s12 + $0x88] sm:$0xff] %v2764_v50 }
 0x46c   : > { %2795 = vst [vmem:[%s5454_s12 + $0x80] sm:$0xff] %v2763_v30  ;;  %v3317_v60 = vpop.f32.mrb[146].mxu0 }
 0x46d   : > { %v2652_v0 = vadd.f32 %v3317_v60, %v5446_v38  ;;  %v2646_v2 = vpop.f32.mrb[147].mxu0 }
 0x46e   : > { %v2647_v13 = vadd.f32 %v5446_v38, %v2646_v2 }
 0x46f   : > { %v2734_v42 = vadd.f32 %v3950_v54, %v2652_v0  ;;  %v3962_v0 = vld [vmem:[%s4466_s8 + $0xf8] sm:$0xff] }
 0x470   : > { %v2733_v9 = vadd.f32 %v3951_v39, %v2647_v13  ;;  %v3963_v13 = vld [vmem:[%s4466_s8 + $0xf0] sm:$0xff]  ;;  %s4212_s8 = smov [#allocation11]  }
 0x471   : > { %v2766_v40 = vmax.f32 %v2734_v42, 0.0  ;;  %s4132_s30 = sshll.u32 %s4212_s8, 4  ;;  %s4133_s30 = int_to_ptr.vmem [resolvable:$false] %s4132_s30 }
 0x472   : > { %v2765_v51 = vmax.f32 %v2733_v9, 0.0  ;;  %s4134_s9 = scalar_lea.vmem %s4133_s30, 8192  ;;  %p4135_p12 = scmp.lt.s32.totalorder %s5553_s21, %s4133_s30 }
 0x473   : > { %2798 = vst [vmem:[%s5454_s12 + $0x98] sm:$0xff] %v2766_v40  ;;  %p4136_p1 = scmp.lt.s32.totalorder %s4134_s9, %s4128_s11 }
 0x474   : > { %2797 = vst [vmem:[%s5454_s12 + $0x90] sm:$0xff] %v2765_v51  ;;  %v3320_v5 = vpop.f32.mrb[148].mxu0 }
 0x475   : > { %v2662_v16 = vadd.f32 %v3320_v5, %v5446_v38  ;;  %v2656_v48 = vpop.f32.mrb[149].mxu0  ;;  %p4137_p2 = por %p4136_p1, %p4135_p12 }
 0x476   : > { %v2657_v8 = vadd.f32 %v5446_v38, %v2656_v48 }
 0x477   : > { %v2736_v56 = vadd.f32 %v3952_v44, %v2662_v16  ;;  %p4138_p4 = pnand %p4137_p2, %p4131_p7 }
 0x478   : > { %v2735_v14 = vadd.f32 %v3953_v35, %v2657_v8 }
 0x479   : > { %v2768_v46 = vmax.f32 %v2736_v56, 0.0 }
 0x47a   : > { %v2767_v34 = vmax.f32 %v2735_v14, 0.0 }
 0x47b   : > { %2800 = vst [vmem:[%s5454_s12 + $0xa8] sm:$0xff] %v2768_v46 }
 0x47c   : > { %2799 = vst [vmem:[%s5454_s12 + $0xa0] sm:$0xff] %v2767_v34  ;;  %v3323_v15 = vpop.f32.mrb[150].mxu0 }
 0x47d   : > { %v2672_v27 = vadd.f32 %v3323_v15, %v5446_v38  ;;  %v2666_v7 = vpop.f32.mrb[151].mxu0 }
 0x47e   : > { %v2667_v19 = vadd.f32 %v5446_v38, %v2666_v7 }
 0x47f   : > { %v2738_v32 = vadd.f32 %v3954_v11, %v2672_v27 }
 0x480   : > { %v2737_v29 = vadd.f32 %v3955_v47, %v2667_v19 }
 0x481   : > { %v2770_v33 = vmax.f32 %v2738_v32, 0.0 }
 0x482   : > { %v2769_v49 = vmax.f32 %v2737_v29, 0.0 }
 0x483   : > { %2802 = vst [vmem:[%s5454_s12 + $0xb8] sm:$0xff] %v2770_v33 }
 0x484   : > { %2801 = vst [vmem:[%s5454_s12 + $0xb0] sm:$0xff] %v2769_v49  ;;  %v3326_v4 = vpop.f32.mrb[152].mxu0 }
 0x485   : > { %v2682_v58 = vadd.f32 %v3326_v4, %v5446_v38  ;;  %v2676_v63 = vpop.f32.mrb[153].mxu0 }
 0x486   : > { %v2677_v3 = vadd.f32 %v5446_v38, %v2676_v63 }
 0x487   : > { %v2740_v21 = vadd.f32 %v3956_v57, %v2682_v58 }
 0x488   : > { %v2739_v17 = vadd.f32 %v3957_v31, %v2677_v3 }
 0x489   : > { %v2772_v45 = vmax.f32 %v2740_v21, 0.0 }
 0x48a   : > { %v2771_v10 = vmax.f32 %v2739_v17, 0.0 }
 0x48b   : > { %2804 = vst [vmem:[%s5454_s12 + $0xc8] sm:$0xff] %v2772_v45 }
 0x48c   : > { %2803 = vst [vmem:[%s5454_s12 + $0xc0] sm:$0xff] %v2771_v10  ;;  %v3329_v52 = vpop.f32.mrb[154].mxu0 }
 0x48d   : > { %v2692_v24 = vadd.f32 %v3329_v52, %v5446_v38  ;;  %v2686_v26 = vpop.f32.mrb[155].mxu0 }
 0x48e   : > { %v2687_v22 = vadd.f32 %v5446_v38, %v2686_v26 }
 0x48f   : > { %v2742_v36 = vadd.f32 %v3958_v59, %v2692_v24 }
 0x490   : > { %v2741_v53 = vadd.f32 %v3959_v61, %v2687_v22 }
 0x491   : > { %v2774_v25 = vmax.f32 %v2742_v36, 0.0 }
 0x492   : > { %v2773_v55 = vmax.f32 %v2741_v53, 0.0 }
 0x493   : > { %2806 = vst [vmem:[%s5454_s12 + $0xd8] sm:$0xff] %v2774_v25 }
 0x494   : > { %2805 = vst [vmem:[%s5454_s12 + $0xd0] sm:$0xff] %v2773_v55  ;;  %v3332_v12 = vpop.f32.mrb[156].mxu0 }
 0x495   : > { %v2702_v28 = vadd.f32 %v3332_v12, %v5446_v38  ;;  %v2696_v1 = vpop.f32.mrb[157].mxu0 }
 0x496   : > { %v2697_v6 = vadd.f32 %v5446_v38, %v2696_v1 }
 0x497   : > { %v2744_v62 = vadd.f32 %v3960_v43, %v2702_v28 }
 0x498   : > { %v2743_v41 = vadd.f32 %v3961_v18, %v2697_v6 }
 0x499   : > { %v2776_v20 = vmax.f32 %v2744_v62, 0.0 }
 0x49a   : > { %v2775_v23 = vmax.f32 %v2743_v41, 0.0 }
 0x49b   : > { %2808 = vst [vmem:[%s5454_s12 + $0xe8] sm:$0xff] %v2776_v20 }
 0x49c   : > { %2807 = vst [vmem:[%s5454_s12 + $0xe0] sm:$0xff] %v2775_v23  ;;  %v3335_v37 = vpop.f32.mrb[158].mxu0 }
 0x49d   : > { %v2712_v50 = vadd.f32 %v3335_v37, %v5446_v38  ;;  %v2706_v30 = vpop.f32.mrb[159].mxu0 }
 0x49e   : > { %v2707_v60 = vadd.f32 %v5446_v38, %v2706_v30 }
 0x49f   : > { %v2746_v2 = vadd.f32 %v3962_v0, %v2712_v50 }
 0x4a0   : > { %v2745_v54 = vadd.f32 %v3963_v13, %v2707_v60 }
 0x4a1   : > { %v2778_v42 = vmax.f32 %v2746_v2, 0.0 }
 0x4a2   : > { %v2777_v39 = vmax.f32 %v2745_v54, 0.0 }
 0x4a3   : > { %2810 = vst [vmem:[%s5454_s12 + $0xf8] sm:$0xff] %v2778_v42 }
 0x4a4   : > { %2809 = vst [vmem:[%s5454_s12 + $0xf0] sm:$0xff] %v2777_v39 }
 0x4a5   : > { %4141 = shalt.err (!%p4138_p4)
}
 0x4a6   : > { %s4142_s13 = scalar_lea.hbm %s5551_s23, 4096  ;;  %s4146_s14 = scalar_lea.hbm %s5606_s7, 8192 }
 0x4a7   : > { %p4143_p9 = scmp.ne.s32.totalorder %s5551_s23, %s4142_s13  ;;  %p4147_p8 = scmp.lt.u32.totalorder %s5551_s23, %s5606_s7 }
 0x4a8   : > { %p4148_p13 = scmp.lt.u32.totalorder %s4146_s14, %s4142_s13  ;;  %p4150_p10 = scmp.lt.u32.totalorder %s4142_s13, %s5551_s23 }
 0x4a9   : > { %p4144_p0 = pnand %p4143_p9, %p4409_p5 }
 0x4aa   : > { %p4149_p6 = por %p4148_p13, %p4147_p8 }
 0x4ab   : > { %p4145_p11 = pneg %p4144_p0 }
 0x4ac   : > { %p4151_p3 = por %p4150_p10, %p4149_p6 }
 0x4ae   : > { %p4152_p7 = pnand %p4151_p3, %p4145_p11 }
 0x4b0   : > { %4155 = shalt.err (!%p4152_p7)
}
 0x4b1   : > { %s4213_s16 = smov 128   ;;  %s4214_s29 = smov 8  }
 0x4b2   : > { %3862 = dma.vmem_to_hbm [thread:$0]  (%p4409_p5), %s5553_s21, 4096, %s5551_s23, %s2812_s28, %s4213_s16, %s4213_s16, %s4214_s29  }
 0x4b3 PF: > { %s5675_s11 = sld [smem:[#allocation16_spill]]  ;;  %s2840_s8 = sand.u32 1, %s4190_s24  }
 0x4b4   : > { %p5677_p1 = scmp.ge.s32.totalorder %s4202_s27, 2  ;;  %s2841_s30 = scalar_lea.sflag [#allocation5], %s2840_s8 }
 0x4b9   : > { %p5676_p12 = scmp.ne.s32.totalorder %s5675_s11, 0 }
 0x4bb   : > { %p3879_p2 = pnand %p5677_p1, %p5676_p12 }
 0x4bd   : > { %4185 = dma.done.wait (!%p3879_p2), %s2841_s30, 4096  }
 0x4be   : > { %4187 = vsyncadd (!%p3879_p2), %s2841_s30, 4294963200  ;;  %p22_p4 = scmp.ge.s32.totalorder %s4395_s22, 4   ;;  %s5678_s24 = smov %s4194_s25 }
 0x4bf   : > { %s5679_s25 = smov %s4198_s26  ;;  %s5680_s26 = smov %s4405_s18 }
 0x4c0   : > { %s5681_s27 = smov %s4395_s22  ;;  %24 = sbr.rel (!%p22_p4) target bundleno = 7 (0x7), region = 108 }
 0x4c7   :  { %2846 = vsyncpa [#allocation4], 1 }
 0x4c8   :  { %2848 = vsyncpa [#allocation4 + $0x1], 1 }
 0x4c9   :  { %2849 = vsyncpa [#allocation7], 1 }
 0x4ca   :  { %2850 = vsyncpa [#allocation10], 1 }
 0x4cb   :  { %2851 = vsyncpa [#allocation5], 1 }
 0x4cc   :  { %2853 = vsyncpa [#allocation5 + $0x1], 1 }

</bundles_post_ra>
